<compile_context>
chip_gen: v6e
topology: v6e:2x2x1
jax: 0.10.0
libtpu: 0.0.40
codegen_flags: <defaults>
</compile_context>

<pallas_src>
import jax
import jax.numpy as jnp
from jax import lax
from jax.experimental import pallas as pl
from jax.experimental.pallas import tpu as pltpu

# ---------------- configuration (small shapes consistent with Model.__init__) ----
B = 2            # batch
C_IN = 4         # one-hot DNA channels (fixed by Model: Conv1d(4, n_filters, ...))
L = 256          # sequence length
N_FILTERS = 64   # n_filters
N_LAYERS = 4     # n_layers (dilations 2, 4, 8, 16)
N_OUTPUTS = 2    # n_outputs (strands)
TRIMMING = 64    # trimming (passed explicitly; must be >= deconv_kernel//2)

K_ICONV = 21
K_RCONV = 3
K_FCONV = 75     # deconv_kernel_size

START = TRIMMING
END = L - TRIMMING
S0 = START - K_FCONV // 2              # slice start (27)
SLICE_LEN = (END + K_FCONV // 2) - S0  # 202
OUT_LEN = END - START                  # 128  (profile output length)
PAD_I = K_ICONV // 2                   # 10

HPAD_OFF = 128                         # lane-aligned left guard for the rconv scratch
HPAD_W = HPAD_OFF + L + 128            # 512

Z_ROWS = ((K_FCONV * N_OUTPUTS + 7) // 8) * 8   # 152 (150 tap rows + 2 zero pad rows)
N_ACC = 5                                        # accumulators to break the add chain


# ---------------------------- Pallas kernel ---------------------------------------
def procapnet_kernel(xcol_ref, wi_ref, bi_ref, wr_ref, br_ref,
                     wf_ref, bf_ref, wl_ref, bl_ref,
                     yprof_ref, ycount_ref, hpad_ref, zcol_ref):
    # ---- iconv: single fused matmul over (tap, channel) = 84 contraction rows.
    # xcol_ref[0] is the wrapper-built im2col slab (84, L); wi_ref is (64, 84).
    h = jnp.maximum(
        jnp.dot(wi_ref[...], xcol_ref[0], preferred_element_type=jnp.float32)
        + bi_ref[...], 0.0)                                      # (NF, L)

    # ---- guard-lane zeroing: only on the first grid step (scratch persists and
    # the guards are never written later; only lanes within MAXD=16 of the
    # center region are ever read back).
    @pl.when(pl.program_id(0) == 0)
    def _():
        hpad_ref[:, :HPAD_OFF] = jnp.zeros((N_FILTERS, HPAD_OFF), jnp.float32)
        hpad_ref[:, HPAD_OFF + L:] = jnp.zeros(
            (N_FILTERS, HPAD_W - HPAD_OFF - L), jnp.float32)

    # ---- residual dilated conv stack: X = X + relu(rconv_i(X)).
    # Three (64,64)@(64,L) dots per layer (same MXU pushes as one K=192 dot),
    # with h[t-d]/h[t+d] read straight from the lane-aligned padded scratch —
    # no jnp.concatenate, no (192,L) stacked operand.
    for i in range(N_LAYERS):
        d = 2 ** (i + 1)
        hpad_ref[:, HPAD_OFF:HPAD_OFF + L] = h                   # lane-aligned store
        h_m = hpad_ref[:, HPAD_OFF - d:HPAD_OFF - d + L]         # h[t - d], zero-padded
        h_p = hpad_ref[:, HPAD_OFF + d:HPAD_OFF + d + L]         # h[t + d], zero-padded
        acc = (jnp.dot(wr_ref[i, 0], h_m, preferred_element_type=jnp.float32)
               + jnp.dot(wr_ref[i, 1], h, preferred_element_type=jnp.float32)
               + jnp.dot(wr_ref[i, 2], h_p, preferred_element_type=jnp.float32))
        h = h + jnp.maximum(acc + br_ref[i], 0.0)

    # ---- fconv (valid conv, kernel 75) WITHOUT an im2col:
    #   Z[2k+o, t]  = sum_c wf[o,c,k] * h[c,t]      (one skewed matmul, K=64)
    #   y[o, t']    = sum_k Z[2k+o, S0 + t' + k]    (75 cheap (2,128) shifted reads)
    zcol_ref[...] = jnp.dot(wf_ref[...], h, preferred_element_type=jnp.float32)
    accs = [jnp.zeros((N_OUTPUTS, OUT_LEN), jnp.float32) for _ in range(N_ACC)]
    for k in range(K_FCONV):
        accs[k % N_ACC] = accs[k % N_ACC] + zcol_ref[
            2 * k:2 * k + 2, S0 + k:S0 + k + OUT_LEN]
    y = accs[0]
    for a in accs[1:]:
        y = y + a
    yprof_ref[0] = y + bf_ref[...]

    # ---- counts head on the VPU: mean over the trimmed slice, dot with wl (64,1).
    xmean = jnp.sum(h[:, S0:S0 + SLICE_LEN], axis=1, keepdims=True) * (1.0 / SLICE_LEN)
    ycount_ref[0] = jnp.sum(wl_ref[...] * xmean, axis=0, keepdims=True) + bl_ref[...]


# ---------------------------- wrapper ----------------------------------------------
def build_forward(params):
    (wi, bi, wr, br, wf, bf, wl, bl) = params

    # Flatten conv weights so each conv is one (or three) plain matmuls:
    #   wi_flat[o, k*C_IN + c]   = wi[o, c, k]        (64, 84)
    #   wr_sep[i, k, o, c]       = wr[i, o, c, k]     (4, 3, 64, 64)   (taps -d,0,+d)
    #   wf_rows[2k + o, c]       = wf[o, c, k]        (150, 64) -> padded to (152, 64)
    wi_flat = jnp.transpose(wi, (0, 2, 1)).reshape(N_FILTERS, K_ICONV * C_IN)
    wr_sep = jnp.transpose(wr, (0, 3, 1, 2))
    wf_rows = jnp.transpose(wf, (2, 0, 1)).reshape(K_FCONV * N_OUTPUTS, N_FILTERS)
    wf_rows = jnp.pad(wf_rows, ((0, Z_ROWS - K_FCONV * N_OUTPUTS), (0, 0)))

    bi_c = bi.reshape(N_FILTERS, 1)
    br_c = br.reshape(N_LAYERS, N_FILTERS, 1)
    bf_c = bf.reshape(N_OUTPUTS, 1)
    wl_c = wl.reshape(N_FILTERS, 1)     # Linear weight as a column vector
    bl_c = bl.reshape(1, 1)

    grid_spec = pltpu.PrefetchScalarGridSpec(
        num_scalar_prefetch=0,
        grid=(B,),
        in_specs=[
            pl.BlockSpec((1, K_ICONV * C_IN, L), lambda b: (b, 0, 0)),
            pl.BlockSpec((N_FILTERS, K_ICONV * C_IN), lambda b: (0, 0)),
            pl.BlockSpec((N_FILTERS, 1), lambda b: (0, 0)),
            pl.BlockSpec((N_LAYERS, K_RCONV, N_FILTERS, N_FILTERS),
                         lambda b: (0, 0, 0, 0)),
            pl.BlockSpec((N_LAYERS, N_FILTERS, 1), lambda b: (0, 0, 0)),
            pl.BlockSpec((Z_ROWS, N_FILTERS), lambda b: (0, 0)),
            pl.BlockSpec((N_OUTPUTS, 1), lambda b: (0, 0)),
            pl.BlockSpec((N_FILTERS, 1), lambda b: (0, 0)),
            pl.BlockSpec((1, 1), lambda b: (0, 0)),
        ],
        out_specs=[
            pl.BlockSpec((1, N_OUTPUTS, OUT_LEN), lambda b: (b, 0, 0)),
            pl.BlockSpec((1, 1, 1), lambda b: (b, 0, 0)),
        ],
        scratch_shapes=[
            pltpu.VMEM((N_FILTERS, HPAD_W), jnp.float32),   # rconv zero-padded h
            pltpu.VMEM((Z_ROWS, L), jnp.float32),           # fconv skewed partials
        ],
    )

    call = pl.pallas_call(
        procapnet_kernel,
        out_shape=(jax.ShapeDtypeStruct((B, N_OUTPUTS, OUT_LEN), jnp.float32),
                   jax.ShapeDtypeStruct((B, 1, 1), jnp.float32)),
        grid_spec=grid_spec,
        compiler_params=pltpu.CompilerParams(dimension_semantics=("parallel",)),
    )

    @jax.jit
    def forward(X):
        # iconv "same" padding + im2col built by XLA: xcol[b, k*C_IN + c, t] = xp[b, c, t+k]
        xp = jnp.pad(X, ((0, 0), (0, 0), (PAD_I, PAD_I)))
        xcol = jnp.stack([xp[:, :, k:k + L] for k in range(K_ICONV)], axis=1)
        xcol = xcol.reshape(B, K_ICONV * C_IN, L)
        y_profile, y_counts = call(xcol, wi_flat, bi_c, wr_sep, br_c,
                                   wf_rows, bf_c, wl_c, bl_c)
        return y_profile, y_counts.reshape(B, 1)

    return forward


# ---------------------------- pure-JAX reference ------------------------------------
def ref_forward(X, params):
    (wi, bi, wr, br, wf, bf, wl, bl) = params

    def conv1d(x, w, b, padding, dilation=1):
        out = lax.conv_general_dilated(
            x, w, window_strides=(1,), padding=[(padding, padding)],
            rhs_dilation=(dilation,),
            dimension_numbers=("NCH", "OIH", "NCH"))
        return out + b[None, :, None]

    h = jax.nn.relu(conv1d(X, wi, bi, PAD_I))
    for i in range(N_LAYERS):
        d = 2 ** (i + 1)
        h = h + jax.nn.relu(conv1d(h, wr[i], br[i], d, d))
    xs = h[:, :, S0:S0 + SLICE_LEN]
    y_profile = conv1d(xs, wf, bf, 0)
    xm = jnp.mean(xs, axis=2)
    y_counts = (xm @ wl.T + bl).reshape(B, 1)
    return y_profile, y_counts


# ---------------------------- main ---------------------------------------------------
if __name__ == "__main__":
    key = jax.random.PRNGKey(0)
    ks = jax.random.split(key, 10)
    scale = 0.05

    wi = scale * jax.random.normal(ks[0], (N_FILTERS, C_IN, K_ICONV), jnp.float32)
    bi = scale * jax.random.normal(ks[1], (N_FILTERS,), jnp.float32)
    wr = scale * jax.random.normal(ks[2], (N_LAYERS, N_FILTERS, N_FILTERS, K_RCONV),
                                   jnp.float32)
    br = scale * jax.random.normal(ks[3], (N_LAYERS, N_FILTERS), jnp.float32)
    wf = scale * jax.random.normal(ks[4], (N_OUTPUTS, N_FILTERS, K_FCONV), jnp.float32)
    bf = scale * jax.random.normal(ks[5], (N_OUTPUTS,), jnp.float32)
    wl = scale * jax.random.normal(ks[6], (1, N_FILTERS), jnp.float32)
    bl = scale * jax.random.normal(ks[7], (1,), jnp.float32)
    params = (wi, bi, wr, br, wf, bf, wl, bl)

    X = jax.random.normal(ks[8], (B, C_IN, L), jnp.float32)

    forward = build_forward(params)
    y_profile, y_counts = forward(X)
    jax.block_until_ready((y_profile, y_counts))

    # correctness check against a pure-JAX reference
    yp_ref, yc_ref = ref_forward(X, params)
    assert y_profile.shape == (B, N_OUTPUTS, OUT_LEN), y_profile.shape
    assert y_counts.shape == (B, 1), y_counts.shape
    assert jnp.allclose(y_profile, yp_ref, rtol=2e-3, atol=2e-3), (
        float(jnp.max(jnp.abs(y_profile - yp_ref))))
    assert jnp.allclose(y_counts, yc_ref, rtol=2e-3, atol=2e-3), (
        float(jnp.max(jnp.abs(y_counts - yc_ref))))

    print("KERNEL_OK")
</pallas_src>

<mosaic_0001>
module attributes {stable_mosaic.version = 11 : i64} {
  func.func @procapnet_kernel(%arg0: i32, %arg1: memref<1x84x256xf32, #tpu.memory_space<vmem>>, %arg2: memref<64x84xf32, #tpu.memory_space<vmem>>, %arg3: memref<64x1xf32, #tpu.memory_space<vmem>>, %arg4: memref<4x3x64x64xf32, #tpu.memory_space<vmem>>, %arg5: memref<4x64x1xf32, #tpu.memory_space<vmem>>, %arg6: memref<152x64xf32, #tpu.memory_space<vmem>>, %arg7: memref<2x1xf32, #tpu.memory_space<vmem>>, %arg8: memref<64x1xf32, #tpu.memory_space<vmem>>, %arg9: memref<1x1xf32, #tpu.memory_space<vmem>>, %arg10: memref<1x2x128xf32, #tpu.memory_space<vmem>>, %arg11: memref<1x1x1xf32, #tpu.memory_space<vmem>>, %arg12: memref<64x512xf32, #tpu.memory_space<vmem>>, %arg13: memref<152x256xf32, #tpu.memory_space<vmem>>) attributes {dimension_semantics = [#tpu.dimension_semantics<parallel>], iteration_bounds = array<i64: 2>, scalar_prefetch = 0 : i64, scratch_operands = 2 : i64, tpu.core_type = #tpu.core_type<tc>, window_params = [{transform_indices = @transform_0, window_bounds = array<i64: 1, 84, 256>}, {pipeline_mode = #tpu.pipeline_mode<synchronous>, transform_indices = @transform_1, window_bounds = array<i64: 64, 84>}, {pipeline_mode = #tpu.pipeline_mode<synchronous>, transform_indices = @transform_2, window_bounds = array<i64: 64, 1>}, {pipeline_mode = #tpu.pipeline_mode<synchronous>, transform_indices = @transform_3, window_bounds = array<i64: 4, 3, 64, 64>}, {pipeline_mode = #tpu.pipeline_mode<synchronous>, transform_indices = @transform_4, window_bounds = array<i64: 4, 64, 1>}, {pipeline_mode = #tpu.pipeline_mode<synchronous>, transform_indices = @transform_5, window_bounds = array<i64: 152, 64>}, {pipeline_mode = #tpu.pipeline_mode<synchronous>, transform_indices = @transform_6, window_bounds = array<i64: 2, 1>}, {pipeline_mode = #tpu.pipeline_mode<synchronous>, transform_indices = @transform_7, window_bounds = array<i64: 64, 1>}, {pipeline_mode = #tpu.pipeline_mode<synchronous>, transform_indices = @transform_8, window_bounds = array<i64: 1, 1>}, {transform_indices = @transform_9, window_bounds = array<i64: 1, 2, 128>}, {transform_indices = @transform_10, window_bounds = array<i64: 1, 1, 1>}]} {
    %c0 = arith.constant 0 : index
    %c0_0 = arith.constant 0 : index
    %0 = vector.load %arg2[%c0, %c0_0] : memref<64x84xf32, #tpu.memory_space<vmem>>, vector<64x84xf32>
    %c0_1 = arith.constant 0 : index
    %c0_2 = arith.constant 0 : index
    %c0_3 = arith.constant 0 : index
    %1 = vector.load %arg1[%c0_1, %c0_2, %c0_3] : memref<1x84x256xf32, #tpu.memory_space<vmem>>, vector<1x84x256xf32>
    %2 = vector.shape_cast %1 : vector<1x84x256xf32> to vector<84x256xf32>
    %cst = arith.constant dense<0.000000e+00> : vector<64x256xf32>
    %3 = tpu.matmul %0, %2, %cst {dimension_numbers = #tpu.dot_dimension_numbers<[1], [0], [0], [1], [0, 0, 1, 1], [], []>} : vector<64x84xf32>, vector<84x256xf32>, vector<64x256xf32> -> vector<64x256xf32>
    %c0_4 = arith.constant 0 : index
    %c0_5 = arith.constant 0 : index
    %4 = vector.load %arg3[%c0_4, %c0_5] : memref<64x1xf32, #tpu.memory_space<vmem>>, vector<64x1xf32>
    %5 = vector.broadcast %4 : vector<64x1xf32> to vector<64x256xf32>
    %6 = arith.addf %3, %5 : vector<64x256xf32>
    %cst_6 = arith.constant 0.000000e+00 : f32
    %7 = vector.broadcast %cst_6 : f32 to vector<64x256xf32>
    %8 = arith.maximumf %6, %7 : vector<64x256xf32>
    %c0_i32 = arith.constant 0 : i32
    %9 = arith.cmpi eq, %arg0, %c0_i32 : i32
    %10 = arith.extui %9 : i1 to i32
    %c0_i32_7 = arith.constant 0 : i32
    %11 = arith.cmpi ne, %10, %c0_i32_7 : i32
    scf.if %11 {
      %cst_169 = arith.constant 0.000000e+00 : f32
      %278 = vector.broadcast %cst_169 : f32 to vector<64x128xf32>
      %c0_170 = arith.constant 0 : index
      %c0_171 = arith.constant 0 : index
      %279 = vector.load %arg12[%c0_170, %c0_171] : memref<64x512xf32, #tpu.memory_space<vmem>>, vector<64x128xf32>
      tpu.vector_store %arg12[%c0_170, %c0_171], %278 {strides = array<i32>} : memref<64x512xf32, #tpu.memory_space<vmem>>, vector<64x128xf32>,
      %cst_172 = arith.constant 0.000000e+00 : f32
      %280 = vector.broadcast %cst_172 : f32 to vector<64x128xf32>
      %c0_173 = arith.constant 0 : index
      %c384 = arith.constant 384 : index
      %281 = vector.load %arg12[%c0_173, %c384] : memref<64x512xf32, #tpu.memory_space<vmem>>, vector<64x128xf32>
      tpu.vector_store %arg12[%c0_173, %c384], %280 {strides = array<i32>} : memref<64x512xf32, #tpu.memory_space<vmem>>, vector<64x128xf32>,
    } else {
    }
    %c0_8 = arith.constant 0 : index
    %c128 = arith.constant 128 : index
    %12 = vector.load %arg12[%c0_8, %c128] : memref<64x512xf32, #tpu.memory_space<vmem>>, vector<64x256xf32>
    tpu.vector_store %arg12[%c0_8, %c128], %8 {strides = array<i32>} : memref<64x512xf32, #tpu.memory_space<vmem>>, vector<64x256xf32>,
    %c0_9 = arith.constant 0 : index
    %c126 = arith.constant 126 : index
    %13 = vector.load %arg12[%c0_9, %c126] : memref<64x512xf32, #tpu.memory_space<vmem>>, vector<64x256xf32>
    %c0_10 = arith.constant 0 : index
    %c130 = arith.constant 130 : index
    %14 = vector.load %arg12[%c0_10, %c130] : memref<64x512xf32, #tpu.memory_space<vmem>>, vector<64x256xf32>
    %c0_11 = arith.constant 0 : index
    %c0_12 = arith.constant 0 : index
    %c0_13 = arith.constant 0 : index
    %c0_14 = arith.constant 0 : index
    %15 = vector.load %arg4[%c0_11, %c0_12, %c0_13, %c0_14] : memref<4x3x64x64xf32, #tpu.memory_space<vmem>>, vector<1x1x64x64xf32>
    %16 = vector.shape_cast %15 : vector<1x1x64x64xf32> to vector<64x64xf32>
    %cst_15 = arith.constant dense<0.000000e+00> : vector<64x256xf32>
    %17 = tpu.matmul %16, %13, %cst_15 {dimension_numbers = #tpu.dot_dimension_numbers<[1], [0], [0], [1], [0, 0, 1, 1], [], []>} : vector<64x64xf32>, vector<64x256xf32>, vector<64x256xf32> -> vector<64x256xf32>
    %c0_16 = arith.constant 0 : index
    %c1 = arith.constant 1 : index
    %c0_17 = arith.constant 0 : index
    %c0_18 = arith.constant 0 : index
    %18 = vector.load %arg4[%c0_16, %c1, %c0_17, %c0_18] : memref<4x3x64x64xf32, #tpu.memory_space<vmem>>, vector<1x1x64x64xf32>
    %19 = vector.shape_cast %18 : vector<1x1x64x64xf32> to vector<64x64xf32>
    %cst_19 = arith.constant dense<0.000000e+00> : vector<64x256xf32>
    %20 = tpu.matmul %19, %8, %cst_19 {dimension_numbers = #tpu.dot_dimension_numbers<[1], [0], [0], [1], [0, 0, 1, 1], [], []>} : vector<64x64xf32>, vector<64x256xf32>, vector<64x256xf32> -> vector<64x256xf32>
    %21 = arith.addf %17, %20 : vector<64x256xf32>
    %c0_20 = arith.constant 0 : index
    %c2 = arith.constant 2 : index
    %c0_21 = arith.constant 0 : index
    %c0_22 = arith.constant 0 : index
    %22 = vector.load %arg4[%c0_20, %c2, %c0_21, %c0_22] : memref<4x3x64x64xf32, #tpu.memory_space<vmem>>, vector<1x1x64x64xf32>
    %23 = vector.shape_cast %22 : vector<1x1x64x64xf32> to vector<64x64xf32>
    %cst_23 = arith.constant dense<0.000000e+00> : vector<64x256xf32>
    %24 = tpu.matmul %23, %14, %cst_23 {dimension_numbers = #tpu.dot_dimension_numbers<[1], [0], [0], [1], [0, 0, 1, 1], [], []>} : vector<64x64xf32>, vector<64x256xf32>, vector<64x256xf32> -> vector<64x256xf32>
    %25 = arith.addf %21, %24 : vector<64x256xf32>
    %c0_24 = arith.constant 0 : index
    %c0_25 = arith.constant 0 : index
    %c0_26 = arith.constant 0 : index
    %26 = vector.load %arg5[%c0_24, %c0_25, %c0_26] : memref<4x64x1xf32, #tpu.memory_space<vmem>>, vector<1x64x1xf32>
    %27 = vector.shape_cast %26 : vector<1x64x1xf32> to vector<64x1xf32>
    %28 = vector.broadcast %27 : vector<64x1xf32> to vector<64x256xf32>
    %29 = arith.addf %25, %28 : vector<64x256xf32>
    %cst_27 = arith.constant 0.000000e+00 : f32
    %30 = vector.broadcast %cst_27 : f32 to vector<64x256xf32>
    %31 = arith.maximumf %29, %30 : vector<64x256xf32>
    %32 = arith.addf %8, %31 : vector<64x256xf32>
    %c0_28 = arith.constant 0 : index
    %c128_29 = arith.constant 128 : index
    %33 = vector.load %arg12[%c0_28, %c128_29] : memref<64x512xf32, #tpu.memory_space<vmem>>, vector<64x256xf32>
    tpu.vector_store %arg12[%c0_28, %c128_29], %32 {strides = array<i32>} : memref<64x512xf32, #tpu.memory_space<vmem>>, vector<64x256xf32>,
    %c0_30 = arith.constant 0 : index
    %c124 = arith.constant 124 : index
    %34 = vector.load %arg12[%c0_30, %c124] : memref<64x512xf32, #tpu.memory_space<vmem>>, vector<64x256xf32>
    %c0_31 = arith.constant 0 : index
    %c132 = arith.constant 132 : index
    %35 = vector.load %arg12[%c0_31, %c132] : memref<64x512xf32, #tpu.memory_space<vmem>>, vector<64x256xf32>
    %c1_32 = arith.constant 1 : index
    %c0_33 = arith.constant 0 : index
    %c0_34 = arith.constant 0 : index
    %c0_35 = arith.constant 0 : index
    %36 = vector.load %arg4[%c1_32, %c0_33, %c0_34, %c0_35] : memref<4x3x64x64xf32, #tpu.memory_space<vmem>>, vector<1x1x64x64xf32>
    %37 = vector.shape_cast %36 : vector<1x1x64x64xf32> to vector<64x64xf32>
    %cst_36 = arith.constant dense<0.000000e+00> : vector<64x256xf32>
    %38 = tpu.matmul %37, %34, %cst_36 {dimension_numbers = #tpu.dot_dimension_numbers<[1], [0], [0], [1], [0, 0, 1, 1], [], []>} : vector<64x64xf32>, vector<64x256xf32>, vector<64x256xf32> -> vector<64x256xf32>
    %c1_37 = arith.constant 1 : index
    %c1_38 = arith.constant 1 : index
    %c0_39 = arith.constant 0 : index
    %c0_40 = arith.constant 0 : index
    %39 = vector.load %arg4[%c1_37, %c1_38, %c0_39, %c0_40] : memref<4x3x64x64xf32, #tpu.memory_space<vmem>>, vector<1x1x64x64xf32>
    %40 = vector.shape_cast %39 : vector<1x1x64x64xf32> to vector<64x64xf32>
    %cst_41 = arith.constant dense<0.000000e+00> : vector<64x256xf32>
    %41 = tpu.matmul %40, %32, %cst_41 {dimension_numbers = #tpu.dot_dimension_numbers<[1], [0], [0], [1], [0, 0, 1, 1], [], []>} : vector<64x64xf32>, vector<64x256xf32>, vector<64x256xf32> -> vector<64x256xf32>
    %42 = arith.addf %38, %41 : vector<64x256xf32>
    %c1_42 = arith.constant 1 : index
    %c2_43 = arith.constant 2 : index
    %c0_44 = arith.constant 0 : index
    %c0_45 = arith.constant 0 : index
    %43 = vector.load %arg4[%c1_42, %c2_43, %c0_44, %c0_45] : memref<4x3x64x64xf32, #tpu.memory_space<vmem>>, vector<1x1x64x64xf32>
    %44 = vector.shape_cast %43 : vector<1x1x64x64xf32> to vector<64x64xf32>
    %cst_46 = arith.constant dense<0.000000e+00> : vector<64x256xf32>
    %45 = tpu.matmul %44, %35, %cst_46 {dimension_numbers = #tpu.dot_dimension_numbers<[1], [0], [0], [1], [0, 0, 1, 1], [], []>} : vector<64x64xf32>, vector<64x256xf32>, vector<64x256xf32> -> vector<64x256xf32>
    %46 = arith.addf %42, %45 : vector<64x256xf32>
    %c1_47 = arith.constant 1 : index
    %c0_48 = arith.constant 0 : index
    %c0_49 = arith.constant 0 : index
    %47 = vector.load %arg5[%c1_47, %c0_48, %c0_49] : memref<4x64x1xf32, #tpu.memory_space<vmem>>, vector<1x64x1xf32>
    %48 = vector.shape_cast %47 : vector<1x64x1xf32> to vector<64x1xf32>
    %49 = vector.broadcast %48 : vector<64x1xf32> to vector<64x256xf32>
    %50 = arith.addf %46, %49 : vector<64x256xf32>
    %cst_50 = arith.constant 0.000000e+00 : f32
    %51 = vector.broadcast %cst_50 : f32 to vector<64x256xf32>
    %52 = arith.maximumf %50, %51 : vector<64x256xf32>
    %53 = arith.addf %32, %52 : vector<64x256xf32>
    %c0_51 = arith.constant 0 : index
    %c128_52 = arith.constant 128 : index
    %54 = vector.load %arg12[%c0_51, %c128_52] : memref<64x512xf32, #tpu.memory_space<vmem>>, vector<64x256xf32>
    tpu.vector_store %arg12[%c0_51, %c128_52], %53 {strides = array<i32>} : memref<64x512xf32, #tpu.memory_space<vmem>>, vector<64x256xf32>,
    %c0_53 = arith.constant 0 : index
    %c120 = arith.constant 120 : index
    %55 = vector.load %arg12[%c0_53, %c120] : memref<64x512xf32, #tpu.memory_space<vmem>>, vector<64x256xf32>
    %c0_54 = arith.constant 0 : index
    %c136 = arith.constant 136 : index
    %56 = vector.load %arg12[%c0_54, %c136] : memref<64x512xf32, #tpu.memory_space<vmem>>, vector<64x256xf32>
    %c2_55 = arith.constant 2 : index
    %c0_56 = arith.constant 0 : index
    %c0_57 = arith.constant 0 : index
    %c0_58 = arith.constant 0 : index
    %57 = vector.load %arg4[%c2_55, %c0_56, %c0_57, %c0_58] : memref<4x3x64x64xf32, #tpu.memory_space<vmem>>, vector<1x1x64x64xf32>
    %58 = vector.shape_cast %57 : vector<1x1x64x64xf32> to vector<64x64xf32>
    %cst_59 = arith.constant dense<0.000000e+00> : vector<64x256xf32>
    %59 = tpu.matmul %58, %55, %cst_59 {dimension_numbers = #tpu.dot_dimension_numbers<[1], [0], [0], [1], [0, 0, 1, 1], [], []>} : vector<64x64xf32>, vector<64x256xf32>, vector<64x256xf32> -> vector<64x256xf32>
    %c2_60 = arith.constant 2 : index
    %c1_61 = arith.constant 1 : index
    %c0_62 = arith.constant 0 : index
    %c0_63 = arith.constant 0 : index
    %60 = vector.load %arg4[%c2_60, %c1_61, %c0_62, %c0_63] : memref<4x3x64x64xf32, #tpu.memory_space<vmem>>, vector<1x1x64x64xf32>
    %61 = vector.shape_cast %60 : vector<1x1x64x64xf32> to vector<64x64xf32>
    %cst_64 = arith.constant dense<0.000000e+00> : vector<64x256xf32>
    %62 = tpu.matmul %61, %53, %cst_64 {dimension_numbers = #tpu.dot_dimension_numbers<[1], [0], [0], [1], [0, 0, 1, 1], [], []>} : vector<64x64xf32>, vector<64x256xf32>, vector<64x256xf32> -> vector<64x256xf32>
    %63 = arith.addf %59, %62 : vector<64x256xf32>
    %c2_65 = arith.constant 2 : index
    %c2_66 = arith.constant 2 : index
    %c0_67 = arith.constant 0 : index
    %c0_68 = arith.constant 0 : index
    %64 = vector.load %arg4[%c2_65, %c2_66, %c0_67, %c0_68] : memref<4x3x64x64xf32, #tpu.memory_space<vmem>>, vector<1x1x64x64xf32>
    %65 = vector.shape_cast %64 : vector<1x1x64x64xf32> to vector<64x64xf32>
    %cst_69 = arith.constant dense<0.000000e+00> : vector<64x256xf32>
    %66 = tpu.matmul %65, %56, %cst_69 {dimension_numbers = #tpu.dot_dimension_numbers<[1], [0], [0], [1], [0, 0, 1, 1], [], []>} : vector<64x64xf32>, vector<64x256xf32>, vector<64x256xf32> -> vector<64x256xf32>
    %67 = arith.addf %63, %66 : vector<64x256xf32>
    %c2_70 = arith.constant 2 : index
    %c0_71 = arith.constant 0 : index
    %c0_72 = arith.constant 0 : index
    %68 = vector.load %arg5[%c2_70, %c0_71, %c0_72] : memref<4x64x1xf32, #tpu.memory_space<vmem>>, vector<1x64x1xf32>
    %69 = vector.shape_cast %68 : vector<1x64x1xf32> to vector<64x1xf32>
    %70 = vector.broadcast %69 : vector<64x1xf32> to vector<64x256xf32>
    %71 = arith.addf %67, %70 : vector<64x256xf32>
    %cst_73 = arith.constant 0.000000e+00 : f32
    %72 = vector.broadcast %cst_73 : f32 to vector<64x256xf32>
    %73 = arith.maximumf %71, %72 : vector<64x256xf32>
    %74 = arith.addf %53, %73 : vector<64x256xf32>
    %c0_74 = arith.constant 0 : index
    %c128_75 = arith.constant 128 : index
    %75 = vector.load %arg12[%c0_74, %c128_75] : memref<64x512xf32, #tpu.memory_space<vmem>>, vector<64x256xf32>
    tpu.vector_store %arg12[%c0_74, %c128_75], %74 {strides = array<i32>} : memref<64x512xf32, #tpu.memory_space<vmem>>, vector<64x256xf32>,
    %c0_76 = arith.constant 0 : index
    %c112 = arith.constant 112 : index
    %76 = vector.load %arg12[%c0_76, %c112] : memref<64x512xf32, #tpu.memory_space<vmem>>, vector<64x256xf32>
    %c0_77 = arith.constant 0 : index
    %c144 = arith.constant 144 : index
    %77 = vector.load %arg12[%c0_77, %c144] : memref<64x512xf32, #tpu.memory_space<vmem>>, vector<64x256xf32>
    %c3 = arith.constant 3 : index
    %c0_78 = arith.constant 0 : index
    %c0_79 = arith.constant 0 : index
    %c0_80 = arith.constant 0 : index
    %78 = vector.load %arg4[%c3, %c0_78, %c0_79, %c0_80] : memref<4x3x64x64xf32, #tpu.memory_space<vmem>>, vector<1x1x64x64xf32>
    %79 = vector.shape_cast %78 : vector<1x1x64x64xf32> to vector<64x64xf32>
    %cst_81 = arith.constant dense<0.000000e+00> : vector<64x256xf32>
    %80 = tpu.matmul %79, %76, %cst_81 {dimension_numbers = #tpu.dot_dimension_numbers<[1], [0], [0], [1], [0, 0, 1, 1], [], []>} : vector<64x64xf32>, vector<64x256xf32>, vector<64x256xf32> -> vector<64x256xf32>
    %c3_82 = arith.constant 3 : index
    %c1_83 = arith.constant 1 : index
    %c0_84 = arith.constant 0 : index
    %c0_85 = arith.constant 0 : index
    %81 = vector.load %arg4[%c3_82, %c1_83, %c0_84, %c0_85] : memref<4x3x64x64xf32, #tpu.memory_space<vmem>>, vector<1x1x64x64xf32>
    %82 = vector.shape_cast %81 : vector<1x1x64x64xf32> to vector<64x64xf32>
    %cst_86 = arith.constant dense<0.000000e+00> : vector<64x256xf32>
    %83 = tpu.matmul %82, %74, %cst_86 {dimension_numbers = #tpu.dot_dimension_numbers<[1], [0], [0], [1], [0, 0, 1, 1], [], []>} : vector<64x64xf32>, vector<64x256xf32>, vector<64x256xf32> -> vector<64x256xf32>
    %84 = arith.addf %80, %83 : vector<64x256xf32>
    %c3_87 = arith.constant 3 : index
    %c2_88 = arith.constant 2 : index
    %c0_89 = arith.constant 0 : index
    %c0_90 = arith.constant 0 : index
    %85 = vector.load %arg4[%c3_87, %c2_88, %c0_89, %c0_90] : memref<4x3x64x64xf32, #tpu.memory_space<vmem>>, vector<1x1x64x64xf32>
    %86 = vector.shape_cast %85 : vector<1x1x64x64xf32> to vector<64x64xf32>
    %cst_91 = arith.constant dense<0.000000e+00> : vector<64x256xf32>
    %87 = tpu.matmul %86, %77, %cst_91 {dimension_numbers = #tpu.dot_dimension_numbers<[1], [0], [0], [1], [0, 0, 1, 1], [], []>} : vector<64x64xf32>, vector<64x256xf32>, vector<64x256xf32> -> vector<64x256xf32>
    %88 = arith.addf %84, %87 : vector<64x256xf32>
    %c3_92 = arith.constant 3 : index
    %c0_93 = arith.constant 0 : index
    %c0_94 = arith.constant 0 : index
    %89 = vector.load %arg5[%c3_92, %c0_93, %c0_94] : memref<4x64x1xf32, #tpu.memory_space<vmem>>, vector<1x64x1xf32>
    %90 = vector.shape_cast %89 : vector<1x64x1xf32> to vector<64x1xf32>
    %91 = vector.broadcast %90 : vector<64x1xf32> to vector<64x256xf32>
    %92 = arith.addf %88, %91 : vector<64x256xf32>
    %cst_95 = arith.constant 0.000000e+00 : f32
    %93 = vector.broadcast %cst_95 : f32 to vector<64x256xf32>
    %94 = arith.maximumf %92, %93 : vector<64x256xf32>
    %95 = arith.addf %74, %94 : vector<64x256xf32>
    %c0_96 = arith.constant 0 : index
    %c0_97 = arith.constant 0 : index
    %96 = vector.load %arg6[%c0_96, %c0_97] : memref<152x64xf32, #tpu.memory_space<vmem>>, vector<152x64xf32>
    %cst_98 = arith.constant dense<0.000000e+00> : vector<152x256xf32>
    %97 = tpu.matmul %96, %95, %cst_98 {dimension_numbers = #tpu.dot_dimension_numbers<[1], [0], [0], [1], [0, 0, 1, 1], [], []>} : vector<152x64xf32>, vector<64x256xf32>, vector<152x256xf32> -> vector<152x256xf32>
    %c0_99 = arith.constant 0 : index
    %c0_100 = arith.constant 0 : index
    %98 = vector.load %arg13[%c0_99, %c0_100] : memref<152x256xf32, #tpu.memory_space<vmem>>, vector<152x256xf32>
    tpu.vector_store %arg13[%c0_99, %c0_100], %97 {strides = array<i32>} : memref<152x256xf32, #tpu.memory_space<vmem>>, vector<152x256xf32>,
    %cst_101 = arith.constant 0.000000e+00 : f32
    %99 = vector.broadcast %cst_101 : f32 to vector<2x128xf32>
    %cst_102 = arith.constant 0.000000e+00 : f32
    %100 = vector.broadcast %cst_102 : f32 to vector<2x128xf32>
    %cst_103 = arith.constant 0.000000e+00 : f32
    %101 = vector.broadcast %cst_103 : f32 to vector<2x128xf32>
    %cst_104 = arith.constant 0.000000e+00 : f32
    %102 = vector.broadcast %cst_104 : f32 to vector<2x128xf32>
    %cst_105 = arith.constant 0.000000e+00 : f32
    %103 = vector.broadcast %cst_105 : f32 to vector<2x128xf32>
    %c0_106 = arith.constant 0 : index
    %c27 = arith.constant 27 : index
    %104 = vector.load %arg13[%c0_106, %c27] : memref<152x256xf32, #tpu.memory_space<vmem>>, vector<2x128xf32>
    %105 = arith.addf %99, %104 : vector<2x128xf32>
    %c2_107 = arith.constant 2 : index
    %c28 = arith.constant 28 : index
    %106 = vector.load %arg13[%c2_107, %c28] : memref<152x256xf32, #tpu.memory_space<vmem>>, vector<2x128xf32>
    %107 = arith.addf %100, %106 : vector<2x128xf32>
    %c4 = arith.constant 4 : index
    %c29 = arith.constant 29 : index
    %108 = vector.load %arg13[%c4, %c29] : memref<152x256xf32, #tpu.memory_space<vmem>>, vector<2x128xf32>
    %109 = arith.addf %101, %108 : vector<2x128xf32>
    %c6 = arith.constant 6 : index
    %c30 = arith.constant 30 : index
    %110 = vector.load %arg13[%c6, %c30] : memref<152x256xf32, #tpu.memory_space<vmem>>, vector<2x128xf32>
    %111 = arith.addf %102, %110 : vector<2x128xf32>
    %c8 = arith.constant 8 : index
    %c31 = arith.constant 31 : index
    %112 = vector.load %arg13[%c8, %c31] : memref<152x256xf32, #tpu.memory_space<vmem>>, vector<2x128xf32>
    %113 = arith.addf %103, %112 : vector<2x128xf32>
    %c10 = arith.constant 10 : index
    %c32 = arith.constant 32 : index
    %114 = vector.load %arg13[%c10, %c32] : memref<152x256xf32, #tpu.memory_space<vmem>>, vector<2x128xf32>
    %115 = arith.addf %105, %114 : vector<2x128xf32>
    %c12 = arith.constant 12 : index
    %c33 = arith.constant 33 : index
    %116 = vector.load %arg13[%c12, %c33] : memref<152x256xf32, #tpu.memory_space<vmem>>, vector<2x128xf32>
    %117 = arith.addf %107, %116 : vector<2x128xf32>
    %c14 = arith.constant 14 : index
    %c34 = arith.constant 34 : index
    %118 = vector.load %arg13[%c14, %c34] : memref<152x256xf32, #tpu.memory_space<vmem>>, vector<2x128xf32>
    %119 = arith.addf %109, %118 : vector<2x128xf32>
    %c16 = arith.constant 16 : index
    %c35 = arith.constant 35 : index
    %120 = vector.load %arg13[%c16, %c35] : memref<152x256xf32, #tpu.memory_space<vmem>>, vector<2x128xf32>
    %121 = arith.addf %111, %120 : vector<2x128xf32>
    %c18 = arith.constant 18 : index
    %c36 = arith.constant 36 : index
    %122 = vector.load %arg13[%c18, %c36] : memref<152x256xf32, #tpu.memory_space<vmem>>, vector<2x128xf32>
    %123 = arith.addf %113, %122 : vector<2x128xf32>
    %c20 = arith.constant 20 : index
    %c37 = arith.constant 37 : index
    %124 = vector.load %arg13[%c20, %c37] : memref<152x256xf32, #tpu.memory_space<vmem>>, vector<2x128xf32>
    %125 = arith.addf %115, %124 : vector<2x128xf32>
    %c22 = arith.constant 22 : index
    %c38 = arith.constant 38 : index
    %126 = vector.load %arg13[%c22, %c38] : memref<152x256xf32, #tpu.memory_space<vmem>>, vector<2x128xf32>
    %127 = arith.addf %117, %126 : vector<2x128xf32>
    %c24 = arith.constant 24 : index
    %c39 = arith.constant 39 : index
    %128 = vector.load %arg13[%c24, %c39] : memref<152x256xf32, #tpu.memory_space<vmem>>, vector<2x128xf32>
    %129 = arith.addf %119, %128 : vector<2x128xf32>
    %c26 = arith.constant 26 : index
    %c40 = arith.constant 40 : index
    %130 = vector.load %arg13[%c26, %c40] : memref<152x256xf32, #tpu.memory_space<vmem>>, vector<2x128xf32>
    %131 = arith.addf %121, %130 : vector<2x128xf32>
    %c28_108 = arith.constant 28 : index
    %c41 = arith.constant 41 : index
    %132 = vector.load %arg13[%c28_108, %c41] : memref<152x256xf32, #tpu.memory_space<vmem>>, vector<2x128xf32>
    %133 = arith.addf %123, %132 : vector<2x128xf32>
    %c30_109 = arith.constant 30 : index
    %c42 = arith.constant 42 : index
    %134 = vector.load %arg13[%c30_109, %c42] : memref<152x256xf32, #tpu.memory_space<vmem>>, vector<2x128xf32>
    %135 = arith.addf %125, %134 : vector<2x128xf32>
    %c32_110 = arith.constant 32 : index
    %c43 = arith.constant 43 : index
    %136 = vector.load %arg13[%c32_110, %c43] : memref<152x256xf32, #tpu.memory_space<vmem>>, vector<2x128xf32>
    %137 = arith.addf %127, %136 : vector<2x128xf32>
    %c34_111 = arith.constant 34 : index
    %c44 = arith.constant 44 : index
    %138 = vector.load %arg13[%c34_111, %c44] : memref<152x256xf32, #tpu.memory_space<vmem>>, vector<2x128xf32>
    %139 = arith.addf %129, %138 : vector<2x128xf32>
    %c36_112 = arith.constant 36 : index
    %c45 = arith.constant 45 : index
    %140 = vector.load %arg13[%c36_112, %c45] : memref<152x256xf32, #tpu.memory_space<vmem>>, vector<2x128xf32>
    %141 = arith.addf %131, %140 : vector<2x128xf32>
    %c38_113 = arith.constant 38 : index
    %c46 = arith.constant 46 : index
    %142 = vector.load %arg13[%c38_113, %c46] : memref<152x256xf32, #tpu.memory_space<vmem>>, vector<2x128xf32>
    %143 = arith.addf %133, %142 : vector<2x128xf32>
    %c40_114 = arith.constant 40 : index
    %c47 = arith.constant 47 : index
    %144 = vector.load %arg13[%c40_114, %c47] : memref<152x256xf32, #tpu.memory_space<vmem>>, vector<2x128xf32>
    %145 = arith.addf %135, %144 : vector<2x128xf32>
    %c42_115 = arith.constant 42 : index
    %c48 = arith.constant 48 : index
    %146 = vector.load %arg13[%c42_115, %c48] : memref<152x256xf32, #tpu.memory_space<vmem>>, vector<2x128xf32>
    %147 = arith.addf %137, %146 : vector<2x128xf32>
    %c44_116 = arith.constant 44 : index
    %c49 = arith.constant 49 : index
    %148 = vector.load %arg13[%c44_116, %c49] : memref<152x256xf32, #tpu.memory_space<vmem>>, vector<2x128xf32>
    %149 = arith.addf %139, %148 : vector<2x128xf32>
    %c46_117 = arith.constant 46 : index
    %c50 = arith.constant 50 : index
    %150 = vector.load %arg13[%c46_117, %c50] : memref<152x256xf32, #tpu.memory_space<vmem>>, vector<2x128xf32>
    %151 = arith.addf %141, %150 : vector<2x128xf32>
    %c48_118 = arith.constant 48 : index
    %c51 = arith.constant 51 : index
    %152 = vector.load %arg13[%c48_118, %c51] : memref<152x256xf32, #tpu.memory_space<vmem>>, vector<2x128xf32>
    %153 = arith.addf %143, %152 : vector<2x128xf32>
    %c50_119 = arith.constant 50 : index
    %c52 = arith.constant 52 : index
    %154 = vector.load %arg13[%c50_119, %c52] : memref<152x256xf32, #tpu.memory_space<vmem>>, vector<2x128xf32>
    %155 = arith.addf %145, %154 : vector<2x128xf32>
    %c52_120 = arith.constant 52 : index
    %c53 = arith.constant 53 : index
    %156 = vector.load %arg13[%c52_120, %c53] : memref<152x256xf32, #tpu.memory_space<vmem>>, vector<2x128xf32>
    %157 = arith.addf %147, %156 : vector<2x128xf32>
    %c54 = arith.constant 54 : index
    %c54_121 = arith.constant 54 : index
    %158 = vector.load %arg13[%c54, %c54_121] : memref<152x256xf32, #tpu.memory_space<vmem>>, vector<2x128xf32>
    %159 = arith.addf %149, %158 : vector<2x128xf32>
    %c56 = arith.constant 56 : index
    %c55 = arith.constant 55 : index
    %160 = vector.load %arg13[%c56, %c55] : memref<152x256xf32, #tpu.memory_space<vmem>>, vector<2x128xf32>
    %161 = arith.addf %151, %160 : vector<2x128xf32>
    %c58 = arith.constant 58 : index
    %c56_122 = arith.constant 56 : index
    %162 = vector.load %arg13[%c58, %c56_122] : memref<152x256xf32, #tpu.memory_space<vmem>>, vector<2x128xf32>
    %163 = arith.addf %153, %162 : vector<2x128xf32>
    %c60 = arith.constant 60 : index
    %c57 = arith.constant 57 : index
    %164 = vector.load %arg13[%c60, %c57] : memref<152x256xf32, #tpu.memory_space<vmem>>, vector<2x128xf32>
    %165 = arith.addf %155, %164 : vector<2x128xf32>
    %c62 = arith.constant 62 : index
    %c58_123 = arith.constant 58 : index
    %166 = vector.load %arg13[%c62, %c58_123] : memref<152x256xf32, #tpu.memory_space<vmem>>, vector<2x128xf32>
    %167 = arith.addf %157, %166 : vector<2x128xf32>
    %c64 = arith.constant 64 : index
    %c59 = arith.constant 59 : index
    %168 = vector.load %arg13[%c64, %c59] : memref<152x256xf32, #tpu.memory_space<vmem>>, vector<2x128xf32>
    %169 = arith.addf %159, %168 : vector<2x128xf32>
    %c66 = arith.constant 66 : index
    %c60_124 = arith.constant 60 : index
    %170 = vector.load %arg13[%c66, %c60_124] : memref<152x256xf32, #tpu.memory_space<vmem>>, vector<2x128xf32>
    %171 = arith.addf %161, %170 : vector<2x128xf32>
    %c68 = arith.constant 68 : index
    %c61 = arith.constant 61 : index
    %172 = vector.load %arg13[%c68, %c61] : memref<152x256xf32, #tpu.memory_space<vmem>>, vector<2x128xf32>
    %173 = arith.addf %163, %172 : vector<2x128xf32>
    %c70 = arith.constant 70 : index
    %c62_125 = arith.constant 62 : index
    %174 = vector.load %arg13[%c70, %c62_125] : memref<152x256xf32, #tpu.memory_space<vmem>>, vector<2x128xf32>
    %175 = arith.addf %165, %174 : vector<2x128xf32>
    %c72 = arith.constant 72 : index
    %c63 = arith.constant 63 : index
    %176 = vector.load %arg13[%c72, %c63] : memref<152x256xf32, #tpu.memory_space<vmem>>, vector<2x128xf32>
    %177 = arith.addf %167, %176 : vector<2x128xf32>
    %c74 = arith.constant 74 : index
    %c64_126 = arith.constant 64 : index
    %178 = vector.load %arg13[%c74, %c64_126] : memref<152x256xf32, #tpu.memory_space<vmem>>, vector<2x128xf32>
    %179 = arith.addf %169, %178 : vector<2x128xf32>
    %c76 = arith.constant 76 : index
    %c65 = arith.constant 65 : index
    %180 = vector.load %arg13[%c76, %c65] : memref<152x256xf32, #tpu.memory_space<vmem>>, vector<2x128xf32>
    %181 = arith.addf %171, %180 : vector<2x128xf32>
    %c78 = arith.constant 78 : index
    %c66_127 = arith.constant 66 : index
    %182 = vector.load %arg13[%c78, %c66_127] : memref<152x256xf32, #tpu.memory_space<vmem>>, vector<2x128xf32>
    %183 = arith.addf %173, %182 : vector<2x128xf32>
    %c80 = arith.constant 80 : index
    %c67 = arith.constant 67 : index
    %184 = vector.load %arg13[%c80, %c67] : memref<152x256xf32, #tpu.memory_space<vmem>>, vector<2x128xf32>
    %185 = arith.addf %175, %184 : vector<2x128xf32>
    %c82 = arith.constant 82 : index
    %c68_128 = arith.constant 68 : index
    %186 = vector.load %arg13[%c82, %c68_128] : memref<152x256xf32, #tpu.memory_space<vmem>>, vector<2x128xf32>
    %187 = arith.addf %177, %186 : vector<2x128xf32>
    %c84 = arith.constant 84 : index
    %c69 = arith.constant 69 : index
    %188 = vector.load %arg13[%c84, %c69] : memref<152x256xf32, #tpu.memory_space<vmem>>, vector<2x128xf32>
    %189 = arith.addf %179, %188 : vector<2x128xf32>
    %c86 = arith.constant 86 : index
    %c70_129 = arith.constant 70 : index
    %190 = vector.load %arg13[%c86, %c70_129] : memref<152x256xf32, #tpu.memory_space<vmem>>, vector<2x128xf32>
    %191 = arith.addf %181, %190 : vector<2x128xf32>
    %c88 = arith.constant 88 : index
    %c71 = arith.constant 71 : index
    %192 = vector.load %arg13[%c88, %c71] : memref<152x256xf32, #tpu.memory_space<vmem>>, vector<2x128xf32>
    %193 = arith.addf %183, %192 : vector<2x128xf32>
    %c90 = arith.constant 90 : index
    %c72_130 = arith.constant 72 : index
    %194 = vector.load %arg13[%c90, %c72_130] : memref<152x256xf32, #tpu.memory_space<vmem>>, vector<2x128xf32>
    %195 = arith.addf %185, %194 : vector<2x128xf32>
    %c92 = arith.constant 92 : index
    %c73 = arith.constant 73 : index
    %196 = vector.load %arg13[%c92, %c73] : memref<152x256xf32, #tpu.memory_space<vmem>>, vector<2x128xf32>
    %197 = arith.addf %187, %196 : vector<2x128xf32>
    %c94 = arith.constant 94 : index
    %c74_131 = arith.constant 74 : index
    %198 = vector.load %arg13[%c94, %c74_131] : memref<152x256xf32, #tpu.memory_space<vmem>>, vector<2x128xf32>
    %199 = arith.addf %189, %198 : vector<2x128xf32>
    %c96 = arith.constant 96 : index
    %c75 = arith.constant 75 : index
    %200 = vector.load %arg13[%c96, %c75] : memref<152x256xf32, #tpu.memory_space<vmem>>, vector<2x128xf32>
    %201 = arith.addf %191, %200 : vector<2x128xf32>
    %c98 = arith.constant 98 : index
    %c76_132 = arith.constant 76 : index
    %202 = vector.load %arg13[%c98, %c76_132] : memref<152x256xf32, #tpu.memory_space<vmem>>, vector<2x128xf32>
    %203 = arith.addf %193, %202 : vector<2x128xf32>
    %c100 = arith.constant 100 : index
    %c77 = arith.constant 77 : index
    %204 = vector.load %arg13[%c100, %c77] : memref<152x256xf32, #tpu.memory_space<vmem>>, vector<2x128xf32>
    %205 = arith.addf %195, %204 : vector<2x128xf32>
    %c102 = arith.constant 102 : index
    %c78_133 = arith.constant 78 : index
    %206 = vector.load %arg13[%c102, %c78_133] : memref<152x256xf32, #tpu.memory_space<vmem>>, vector<2x128xf32>
    %207 = arith.addf %197, %206 : vector<2x128xf32>
    %c104 = arith.constant 104 : index
    %c79 = arith.constant 79 : index
    %208 = vector.load %arg13[%c104, %c79] : memref<152x256xf32, #tpu.memory_space<vmem>>, vector<2x128xf32>
    %209 = arith.addf %199, %208 : vector<2x128xf32>
    %c106 = arith.constant 106 : index
    %c80_134 = arith.constant 80 : index
    %210 = vector.load %arg13[%c106, %c80_134] : memref<152x256xf32, #tpu.memory_space<vmem>>, vector<2x128xf32>
    %211 = arith.addf %201, %210 : vector<2x128xf32>
    %c108 = arith.constant 108 : index
    %c81 = arith.constant 81 : index
    %212 = vector.load %arg13[%c108, %c81] : memref<152x256xf32, #tpu.memory_space<vmem>>, vector<2x128xf32>
    %213 = arith.addf %203, %212 : vector<2x128xf32>
    %c110 = arith.constant 110 : index
    %c82_135 = arith.constant 82 : index
    %214 = vector.load %arg13[%c110, %c82_135] : memref<152x256xf32, #tpu.memory_space<vmem>>, vector<2x128xf32>
    %215 = arith.addf %205, %214 : vector<2x128xf32>
    %c112_136 = arith.constant 112 : index
    %c83 = arith.constant 83 : index
    %216 = vector.load %arg13[%c112_136, %c83] : memref<152x256xf32, #tpu.memory_space<vmem>>, vector<2x128xf32>
    %217 = arith.addf %207, %216 : vector<2x128xf32>
    %c114 = arith.constant 114 : index
    %c84_137 = arith.constant 84 : index
    %218 = vector.load %arg13[%c114, %c84_137] : memref<152x256xf32, #tpu.memory_space<vmem>>, vector<2x128xf32>
    %219 = arith.addf %209, %218 : vector<2x128xf32>
    %c116 = arith.constant 116 : index
    %c85 = arith.constant 85 : index
    %220 = vector.load %arg13[%c116, %c85] : memref<152x256xf32, #tpu.memory_space<vmem>>, vector<2x128xf32>
    %221 = arith.addf %211, %220 : vector<2x128xf32>
    %c118 = arith.constant 118 : index
    %c86_138 = arith.constant 86 : index
    %222 = vector.load %arg13[%c118, %c86_138] : memref<152x256xf32, #tpu.memory_space<vmem>>, vector<2x128xf32>
    %223 = arith.addf %213, %222 : vector<2x128xf32>
    %c120_139 = arith.constant 120 : index
    %c87 = arith.constant 87 : index
    %224 = vector.load %arg13[%c120_139, %c87] : memref<152x256xf32, #tpu.memory_space<vmem>>, vector<2x128xf32>
    %225 = arith.addf %215, %224 : vector<2x128xf32>
    %c122 = arith.constant 122 : index
    %c88_140 = arith.constant 88 : index
    %226 = vector.load %arg13[%c122, %c88_140] : memref<152x256xf32, #tpu.memory_space<vmem>>, vector<2x128xf32>
    %227 = arith.addf %217, %226 : vector<2x128xf32>
    %c124_141 = arith.constant 124 : index
    %c89 = arith.constant 89 : index
    %228 = vector.load %arg13[%c124_141, %c89] : memref<152x256xf32, #tpu.memory_space<vmem>>, vector<2x128xf32>
    %229 = arith.addf %219, %228 : vector<2x128xf32>
    %c126_142 = arith.constant 126 : index
    %c90_143 = arith.constant 90 : index
    %230 = vector.load %arg13[%c126_142, %c90_143] : memref<152x256xf32, #tpu.memory_space<vmem>>, vector<2x128xf32>
    %231 = arith.addf %221, %230 : vector<2x128xf32>
    %c128_144 = arith.constant 128 : index
    %c91 = arith.constant 91 : index
    %232 = vector.load %arg13[%c128_144, %c91] : memref<152x256xf32, #tpu.memory_space<vmem>>, vector<2x128xf32>
    %233 = arith.addf %223, %232 : vector<2x128xf32>
    %c130_145 = arith.constant 130 : index
    %c92_146 = arith.constant 92 : index
    %234 = vector.load %arg13[%c130_145, %c92_146] : memref<152x256xf32, #tpu.memory_space<vmem>>, vector<2x128xf32>
    %235 = arith.addf %225, %234 : vector<2x128xf32>
    %c132_147 = arith.constant 132 : index
    %c93 = arith.constant 93 : index
    %236 = vector.load %arg13[%c132_147, %c93] : memref<152x256xf32, #tpu.memory_space<vmem>>, vector<2x128xf32>
    %237 = arith.addf %227, %236 : vector<2x128xf32>
    %c134 = arith.constant 134 : index
    %c94_148 = arith.constant 94 : index
    %238 = vector.load %arg13[%c134, %c94_148] : memref<152x256xf32, #tpu.memory_space<vmem>>, vector<2x128xf32>
    %239 = arith.addf %229, %238 : vector<2x128xf32>
    %c136_149 = arith.constant 136 : index
    %c95 = arith.constant 95 : index
    %240 = vector.load %arg13[%c136_149, %c95] : memref<152x256xf32, #tpu.memory_space<vmem>>, vector<2x128xf32>
    %241 = arith.addf %231, %240 : vector<2x128xf32>
    %c138 = arith.constant 138 : index
    %c96_150 = arith.constant 96 : index
    %242 = vector.load %arg13[%c138, %c96_150] : memref<152x256xf32, #tpu.memory_space<vmem>>, vector<2x128xf32>
    %243 = arith.addf %233, %242 : vector<2x128xf32>
    %c140 = arith.constant 140 : index
    %c97 = arith.constant 97 : index
    %244 = vector.load %arg13[%c140, %c97] : memref<152x256xf32, #tpu.memory_space<vmem>>, vector<2x128xf32>
    %245 = arith.addf %235, %244 : vector<2x128xf32>
    %c142 = arith.constant 142 : index
    %c98_151 = arith.constant 98 : index
    %246 = vector.load %arg13[%c142, %c98_151] : memref<152x256xf32, #tpu.memory_space<vmem>>, vector<2x128xf32>
    %247 = arith.addf %237, %246 : vector<2x128xf32>
    %c144_152 = arith.constant 144 : index
    %c99 = arith.constant 99 : index
    %248 = vector.load %arg13[%c144_152, %c99] : memref<152x256xf32, #tpu.memory_space<vmem>>, vector<2x128xf32>
    %249 = arith.addf %239, %248 : vector<2x128xf32>
    %c146 = arith.constant 146 : index
    %c100_153 = arith.constant 100 : index
    %250 = vector.load %arg13[%c146, %c100_153] : memref<152x256xf32, #tpu.memory_space<vmem>>, vector<2x128xf32>
    %251 = arith.addf %241, %250 : vector<2x128xf32>
    %c148 = arith.constant 148 : index
    %c101 = arith.constant 101 : index
    %252 = vector.load %arg13[%c148, %c101] : memref<152x256xf32, #tpu.memory_space<vmem>>, vector<2x128xf32>
    %253 = arith.addf %243, %252 : vector<2x128xf32>
    %254 = arith.addf %245, %247 : vector<2x128xf32>
    %255 = arith.addf %254, %249 : vector<2x128xf32>
    %256 = arith.addf %255, %251 : vector<2x128xf32>
    %257 = arith.addf %256, %253 : vector<2x128xf32>
    %c0_154 = arith.constant 0 : index
    %c0_155 = arith.constant 0 : index
    %258 = vector.load %arg7[%c0_154, %c0_155] : memref<2x1xf32, #tpu.memory_space<vmem>>, vector<2x1xf32>
    %259 = vector.broadcast %258 : vector<2x1xf32> to vector<2x128xf32>
    %260 = arith.addf %257, %259 : vector<2x128xf32>
    %c0_156 = arith.constant 0 : index
    %c0_157 = arith.constant 0 : index
    %c0_158 = arith.constant 0 : index
    %261 = vector.load %arg10[%c0_156, %c0_157, %c0_158] : memref<1x2x128xf32, #tpu.memory_space<vmem>>, vector<1x2x128xf32>
    %262 = vector.shape_cast %261 : vector<1x2x128xf32> to vector<2x128xf32>
    %263 = vector.shape_cast %260 : vector<2x128xf32> to vector<1x2x128xf32>
    tpu.vector_store %arg10[%c0_156, %c0_157, %c0_158], %263 {strides = array<i32>} : memref<1x2x128xf32, #tpu.memory_space<vmem>>, vector<1x2x128xf32>,
    %264 = vector.extract_strided_slice %95 {offsets = [0, 27], sizes = [64, 202], strides = [1, 1]} : vector<64x256xf32> to vector<64x202xf32>
    %cst_159 = arith.constant dense<0.000000e+00> : vector<64xf32>
    %265 = vector.multi_reduction <add>, %264, %cst_159 [1] : vector<64x202xf32> to vector<64xf32>
    %266 = vector.shape_cast %265 : vector<64xf32> to vector<64x1xf32>
    %cst_160 = arith.constant 0.00495049497 : f32
    %267 = vector.broadcast %cst_160 : f32 to vector<64x1xf32>
    %268 = arith.mulf %266, %267 : vector<64x1xf32>
    %c0_161 = arith.constant 0 : index
    %c0_162 = arith.constant 0 : index
    %269 = vector.load %arg8[%c0_161, %c0_162] : memref<64x1xf32, #tpu.memory_space<vmem>>, vector<64x1xf32>
    %270 = arith.mulf %269, %268 : vector<64x1xf32>
    %cst_163 = arith.constant dense<0.000000e+00> : vector<1xf32>
    %271 = vector.multi_reduction <add>, %270, %cst_163 [0] : vector<64x1xf32> to vector<1xf32>
    %272 = vector.shape_cast %271 : vector<1xf32> to vector<1x1xf32>
    %c0_164 = arith.constant 0 : index
    %c0_165 = arith.constant 0 : index
    %273 = vector.load %arg9[%c0_164, %c0_165] : memref<1x1xf32, #tpu.memory_space<vmem>>, vector<1x1xf32>
    %274 = arith.addf %272, %273 : vector<1x1xf32>
    %c0_166 = arith.constant 0 : index
    %c0_167 = arith.constant 0 : index
    %c0_168 = arith.constant 0 : index
    %275 = vector.load %arg11[%c0_166, %c0_167, %c0_168] : memref<1x1x1xf32, #tpu.memory_space<vmem>>, vector<1x1x1xf32>
    %276 = vector.shape_cast %275 : vector<1x1x1xf32> to vector<1x1xf32>
    %277 = vector.shape_cast %274 : vector<1x1xf32> to vector<1x1x1xf32>
    tpu.vector_store %arg11[%c0_166, %c0_167, %c0_168], %277 {strides = array<i32>} : memref<1x1x1xf32, #tpu.memory_space<vmem>>, vector<1x1x1xf32>,
    return
  }
  func.func @transform_0(%arg0: i32) -> (i32, i32, i32) {
    %c0_i32 = arith.constant 0 : i32
    %c0_i32_0 = arith.constant 0 : i32
    %c0_i32_1 = arith.constant 0 : i32
    return %arg0, %c0_i32, %c0_i32_0 : i32, i32, i32
  }
  func.func @transform_1(%arg0: i32) -> (i32, i32) {
    %c0_i32 = arith.constant 0 : i32
    %c0_i32_0 = arith.constant 0 : i32
    %c0_i32_1 = arith.constant 0 : i32
    return %c0_i32, %c0_i32_0 : i32, i32
  }
  func.func @transform_2(%arg0: i32) -> (i32, i32) {
    %c0_i32 = arith.constant 0 : i32
    %c0_i32_0 = arith.constant 0 : i32
    %c0_i32_1 = arith.constant 0 : i32
    return %c0_i32, %c0_i32_0 : i32, i32
  }
  func.func @transform_3(%arg0: i32) -> (i32, i32, i32, i32) {
    %c0_i32 = arith.constant 0 : i32
    %c0_i32_0 = arith.constant 0 : i32
    %c0_i32_1 = arith.constant 0 : i32
    %c0_i32_2 = arith.constant 0 : i32
    %c0_i32_3 = arith.constant 0 : i32
    return %c0_i32, %c0_i32_0, %c0_i32_1, %c0_i32_2 : i32, i32, i32, i32
  }
  func.func @transform_4(%arg0: i32) -> (i32, i32, i32) {
    %c0_i32 = arith.constant 0 : i32
    %c0_i32_0 = arith.constant 0 : i32
    %c0_i32_1 = arith.constant 0 : i32
    %c0_i32_2 = arith.constant 0 : i32
    return %c0_i32, %c0_i32_0, %c0_i32_1 : i32, i32, i32
  }
  func.func @transform_5(%arg0: i32) -> (i32, i32) {
    %c0_i32 = arith.constant 0 : i32
    %c0_i32_0 = arith.constant 0 : i32
    %c0_i32_1 = arith.constant 0 : i32
    return %c0_i32, %c0_i32_0 : i32, i32
  }
  func.func @transform_6(%arg0: i32) -> (i32, i32) {
    %c0_i32 = arith.constant 0 : i32
    %c0_i32_0 = arith.constant 0 : i32
    %c0_i32_1 = arith.constant 0 : i32
    return %c0_i32, %c0_i32_0 : i32, i32
  }
  func.func @transform_7(%arg0: i32) -> (i32, i32) {
    %c0_i32 = arith.constant 0 : i32
    %c0_i32_0 = arith.constant 0 : i32
    %c0_i32_1 = arith.constant 0 : i32
    return %c0_i32, %c0_i32_0 : i32, i32
  }
  func.func @transform_8(%arg0: i32) -> (i32, i32) {
    %c0_i32 = arith.constant 0 : i32
    %c0_i32_0 = arith.constant 0 : i32
    %c0_i32_1 = arith.constant 0 : i32
    return %c0_i32, %c0_i32_0 : i32, i32
  }
  func.func @transform_9(%arg0: i32) -> (i32, i32, i32) {
    %c0_i32 = arith.constant 0 : i32
    %c0_i32_0 = arith.constant 0 : i32
    %c0_i32_1 = arith.constant 0 : i32
    return %arg0, %c0_i32, %c0_i32_0 : i32, i32, i32
  }
  func.func @transform_10(%arg0: i32) -> (i32, i32, i32) {
    %c0_i32 = arith.constant 0 : i32
    %c0_i32_0 = arith.constant 0 : i32
    %c0_i32_1 = arith.constant 0 : i32
    return %arg0, %c0_i32, %c0_i32_0 : i32, i32, i32
  }
}

</mosaic_0001>

<bundles_post_ra>
// kernel: forward.1
= control target key start
LH: loop header
LB: loop body
LE: loop exit
PB: predicated region body
PF: predicated region fallthrough
CT: control target
= control target key end

     0   :  { %s8926_s0 = inlined_call_operand.vmem [shape: f32[2,84,256], index: 0, kind: input, shape index: {}]   ;;  %s8927_s1 = inlined_call_operand.vmem [shape: f32[64,84], index: 1, kind: input, shape index: {}]   ;;  %s8928_s2 = inlined_call_operand.vmem [shape: f32[64,1], index: 2, kind: input, shape index: {}]   ;;  %s8929_s3 = inlined_call_operand.vmem [shape: f32[4,3,64,64], index: 3, kind: input, shape index: {}]   ;;  %s8930_s4 = inlined_call_operand.vmem [shape: f32[4,64,1], index: 4, kind: input, shape index: {}]   ;;  %s8931_s5 = inlined_call_operand.vmem [shape: f32[152,64], index: 5, kind: input, shape index: {}]   ;;  %s8932_s6 = inlined_call_operand.vmem [shape: f32[2,1], index: 6, kind: input, shape index: {}]   ;;  %s8933_s7 = inlined_call_operand.vmem [shape: f32[64,1], index: 7, kind: input, shape index: {}]   ;;  %s8934_s8 = inlined_call_operand.<no memory space> [shape: f32[1,1], index: 8, kind: input, shape index: {}]   ;;  %s8935_s9 = inlined_call_operand.hbm [shape: f32[2,2,128], index: 9, kind: output, shape index: {0}]   ;;  %s8936_s10 = inlined_call_operand.vmem [shape: f32[2,1,1], index: 10, kind: output, shape index: {1}]  }
   0x1   :  { %v16_v0 = vstv %s8934_s8 }
   0x2   :  { %17 = vst [vmem:[#allocation4] sm:$0x1] %v16_v0 }
   0x3   :  { %18 = vsyncpa [#allocation6], 0 }
   0x4   :  { %20 = vsyncpa [#allocation6 + $0x1], 0  ;;  %s6083_s15 = smov 0   ;;  %s6085_s16 = smov 0  }
   0x5   :  { %s6087_s17 = smov 0   ;;  %s6089_s18 = smov 0  }
   0x6 LB: > { %8994 = sst [smem:[#allocation8_spill]] %s5990_s17  ;;  %s6104_s8 = sadd.s32 4294967295, %s5994_s18   ;;  %s5994_s18 = sphi %s6089_s18, %s9179_s18   ;;  %s5990_s17 = sphi %s6087_s17, %s9178_s17   ;;  %s5986_s16 = sphi %s6085_s16, %s9177_s16   ;;  %s5982_s15 = sphi %s6083_s15, %s9176_s15  }
   0x7   : > { %s5597_s19 = sadd.s32 4294967294, %s5994_s18   ;;  %s6108_s20 = sadd.s32 1, %s5994_s18  }
   0x8   : > { %s227_s21 = sadd.s32 1, %s5990_s17  ;;  %s224_s22 = ssub.s32 %s5994_s18, %s6108_s20 }
   0x9   : > { %p237_p0 = scmp.ne.s32.totalorder %s5990_s17, %s5986_s16  ;;  %p225_p1 = scmp.eq.s32.totalorder %s224_s22, 0 }
   0xa   : > { %p238_p2 = scmp.eq.s32.totalorder %s6104_s8, 1  ;;  %p243_p3 = scmp.ne.s32.totalorder %s5986_s16, %s5982_s15 }
   0xb   : > { %p244_p4 = scmp.eq.s32.totalorder %s5597_s19, 1  ;;  %p5600_p7 = scmp.ge.s32.totalorder %s5994_s18, 1 }
   0xc   : > { %s6119_s23 = scalar_select %p225_p1, %s5990_s17, %s227_s21  }
   0xd   : > { %p6121_p5 = por %p238_p2, %p237_p0  ;;  %p6125_p6 = por %p244_p4, %p243_p3 }
   0xe   : > { %8995 = sst [smem:[#allocation9_spill]] %s6119_s23  ;;  %p320_p8 = scmp.lt.s32.totalorder %s5994_s18, 3 }
  0x10   : > { %p321_p9 = pnand %p5600_p7, %p320_p8 }
  0x12   : > { %324 = sbr.rel (%p321_p9) target bundleno = 2758 (0xac6), region = 56 }
  0x17   : > { %s8937_s26 = sand.u32 1, %s5986_s16   ;;  %p361_p10 = scmp.lt.s32.totalorder %s6104_s8, 1  ;;  %v8939_v1 = vmov 0.0   ;;  %v5997_v2 = vmov 0   ;;  %v399_v3 = vld [vmem:[%s8928_s2] sm:$0xff]  ;;  %v401_v4 = vld [vmem:[%s8928_s2 + $0x10] sm:$0xff] }
  0x18   : > { %s6135_s27 = sshll.u32 %s8937_s26, 1  ;;  %543 = vmatprep.mubr.f32.mxu0 %v8939_v1  ;;  %5929 = vset.pattern.permute.xlu0 %v5997_v2  ;;  %v400_v5 = vld [vmem:[%s8928_s2 + $0x8] sm:$0xff]  ;;  %vm472_vm0 = vcmask 1043456   ;;  %v402_v6 = vld [vmem:[%s8928_s2 + $0x18] sm:$0xff]  ;;  %v403_v11 = vld [vmem:[%s8928_s2 + $0x20] sm:$0xff]  ;;  %vm447_vm1 = vcmask 687104  }
  0x19   : > { %5930 = vset.pattern.permute.xlu1 %v5997_v2  ;;  %s6141_s28 = scalar_select %p361_p10, %s6104_s8, 1  ;;  %409 = vperm.xlu0 %5929, %v399_v3   ;;  %v404_v13 = vld [vmem:[%s8928_s2 + $0x28] sm:$0xff]  ;;  %v405_v17 = vld [vmem:[%s8928_s2 + $0x30] sm:$0xff]  ;;  %v406_v19 = vld [vmem:[%s8928_s2 + $0x38] sm:$0xff] }
  0x1a   : > { %419 = vperm.xlu1 %5930, %v401_v4   ;;  %v369_v33 = vld [vmem:[%s8927_s1] sm:$0xff]  ;;  %v370_v34 = vld [vmem:[%s8927_s1 + $0x8] sm:$0xff]  ;;  %v371_v35 = vld [vmem:[%s8927_s1 + $0x10] sm:$0xff]  ;;  %p5613_p11 = scmp.ne.s32.totalorder %s6104_s8, 0 }
  0x1b   : > { %s5861_s13 = smul.u32 176, %s6141_s28  ;;  %s368_s21 = scalar_lea.vmem %s8936_s10, %s6141_s28  ;;  %v372_v36 = vld [vmem:[%s8927_s1 + $0x18] sm:$0xff]  ;;  %v373_v37 = vld [vmem:[%s8927_s1 + $0x20] sm:$0xff]  ;;  %v374_v38 = vld [vmem:[%s8927_s1 + $0x28] sm:$0xff] }
  0x1c   : > { %v375_v39 = vld [vmem:[%s8927_s1 + $0x30] sm:$0xff]  ;;  %v376_v40 = vld [vmem:[%s8927_s1 + $0x38] sm:$0xff] }
  0x1d   : > { %s6163_s11 = scalar_lea.vmem %s8926_s0, %s5861_s13  ;;  %414 = vperm.xlu0 %5929, %v400_v5  }
  0x1e   : > { %v398_v7 = vld [vmem:[%s6163_s11 + $0xa8] sm:$0xf]  ;;  %v397_v8 = vld [vmem:[%s6163_s11 + $0xa0] sm:$0xf]  ;;  %v396_v9 = vld [vmem:[%s6163_s11 + $0x98] sm:$0xff]  ;;  %424 = vperm.xlu1 %5930, %v402_v6  }
  0x1f   : > { %5603 = vmatprep.subr.msk.mxu0 %vm472_vm0, %v398_v7  ;;  %v395_v10 = vld [vmem:[%s6163_s11 + $0x90] sm:$0xff]  ;;  %v394_v12 = vld [vmem:[%s6163_s11 + $0x88] sm:$0xff]  ;;  %v393_v14 = vld [vmem:[%s6163_s11 + $0x80] sm:$0xff] }
  0x20   : > { %5604 = vmatpush1.msk.msra.mxu0 %vm472_vm0, %v397_v8  ;;  %v392_v15 = vld [vmem:[%s6163_s11 + $0x78] sm:$0xff]  ;;  %v391_v16 = vld [vmem:[%s6163_s11 + $0x70] sm:$0xff]  ;;  %v390_v18 = vld [vmem:[%s6163_s11 + $0x68] sm:$0xff] }
  0x21   : > { %491 = vmatprep.subr.mxu0 %v396_v9  ;;  %429 = vperm.xlu0 %5929, %v403_v11   ;;  %v389_v20 = vld [vmem:[%s6163_s11 + $0x60] sm:$0xff]  ;;  %v388_v21 = vld [vmem:[%s6163_s11 + $0x58] sm:$0xff]  ;;  %v387_v22 = vld [vmem:[%s6163_s11 + $0x50] sm:$0xff] }
  0x22   : > { %492 = vmatpush1.msra.mxu0 %v395_v10  ;;  %434 = vperm.xlu1 %5930, %v404_v13   ;;  %v386_v23 = vld [vmem:[%s6163_s11 + $0x48] sm:$0xff]  ;;  %v385_v24 = vld [vmem:[%s6163_s11 + $0x40] sm:$0xff]  ;;  %v384_v25 = vld [vmem:[%s6163_s11 + $0x38] sm:$0xff] }
  0x23   : > { %493 = vmatprep.subr.mxu0 %v394_v12  ;;  %v383_v26 = vld [vmem:[%s6163_s11 + $0x30] sm:$0xff]  ;;  %v382_v27 = vld [vmem:[%s6163_s11 + $0x28] sm:$0xff]  ;;  %v381_v28 = vld [vmem:[%s6163_s11 + $0x20] sm:$0xff] }
  0x24   : > { %494 = vmatpush1.msra.mxu0 %v393_v14  ;;  %v380_v29 = vld [vmem:[%s6163_s11 + $0x18] sm:$0xff]  ;;  %v379_v30 = vld [vmem:[%s6163_s11 + $0x10] sm:$0xff]  ;;  %v378_v31 = vld [vmem:[%s6163_s11 + $0x8] sm:$0xff] }
  0x25   : > { %495 = vmatprep.subr.mxu0 %v392_v15  ;;  %439 = vperm.xlu0 %5929, %v405_v17   ;;  %v377_v32 = vld [vmem:[%s6163_s11] sm:$0xff] }
  0x26   : > { %496 = vmatpush1.msra.mxu0 %v391_v16  ;;  %444 = vperm.xlu1 %5930, %v406_v19  }
  0x27   : > { %497 = vmatprep.subr.mxu0 %v390_v18 }
  0x28   : > { %498 = vmatpush1.msra.mxu0 %v389_v20 }
  0x29   : > { %499 = vmatprep.subr.mxu0 %v388_v21 }
  0x2a   : > { %500 = vmatpush1.msra.mxu0 %v387_v22 }
  0x2b   : > { %501 = vmatprep.subr.mxu0 %v386_v23 }
  0x2c   : > { %502 = vmatpush1.msra.mxu0 %v385_v24 }
  0x2d   : > { %503 = vmatprep.subr.mxu0 %v384_v25 }
  0x2e   : > { %504 = vmatpush1.msra.mxu0 %v383_v26 }
  0x2f   : > { %505 = vmatprep.subr.mxu0 %v382_v27 }
  0x30   : > { %506 = vmatpush1.msra.mxu0 %v381_v28 }
  0x31   : > { %507 = vmatprep.subr.mxu0 %v380_v29 }
  0x32   : > { %508 = vmatpush1.msra.mxu0 %v379_v30 }
  0x33   : > { %509 = vmatprep.subr.mxu0 %v378_v31 }
  0x34   : > { %510 = vmatpush1.msra.mxu0 %v377_v32 }
  0x35   : > { %5605 = vmatmul.mubr.msk.f32.vlgmr.msra.gmra.mxu0 %vm447_vm1, %v369_v33 }
  0x36   : > { %549 = vmatprep.mubr.f32.mxu0 %v8939_v1 }
  0x39   : > { %5606 = vmatmul.mubr.msk.f32.gmra.mxu0 %vm447_vm1, %v370_v34 }
  0x3a   : > { %555 = vmatprep.mubr.f32.mxu0 %v8939_v1 }
  0x3d   : > { %5607 = vmatmul.mubr.msk.f32.gmra.mxu0 %vm447_vm1, %v371_v35 }
  0x3e   : > { %561 = vmatprep.mubr.f32.mxu0 %v8939_v1 }
  0x41   : > { %5608 = vmatmul.mubr.msk.f32.gmra.mxu0 %vm447_vm1, %v372_v36 }
  0x42   : > { %567 = vmatprep.mubr.f32.mxu0 %v8939_v1 }
  0x45   : > { %5609 = vmatmul.mubr.msk.f32.gmra.mxu0 %vm447_vm1, %v373_v37 }
  0x46   : > { %573 = vmatprep.mubr.f32.mxu0 %v8939_v1 }
  0x49   : > { %5610 = vmatmul.mubr.msk.f32.gmra.mxu0 %vm447_vm1, %v374_v38 }
  0x4a   : > { %579 = vmatprep.mubr.f32.mxu0 %v8939_v1 }
  0x4d   : > { %5611 = vmatmul.mubr.msk.f32.gmra.mxu0 %vm447_vm1, %v375_v39 }
  0x4e   : > { %585 = vmatprep.mubr.f32.mxu0 %v8939_v1 }
  0x51   : > { %5612 = vmatmul.mubr.msk.f32.gmra.mxu0 %vm447_vm1, %v376_v40 }
  0x94   : > { %v410_v41 = vpop.permute.xlu0 %409 }
  0x95   : > { %v420_v51 = vpop.permute.xlu1 %419 }
  0x98   : > { %v415_v45 = vpop.permute.xlu0 %414 }
  0x99   : > { %v425_v61 = vpop.permute.xlu1 %424 }
  0x9c   : > { %v430_v6 = vpop.permute.xlu0 %429 }
  0x9d   : > { %v435_v13 = vpop.permute.xlu1 %434 }
  0xa0   : > { %v440_v20 = vpop.permute.xlu0 %439 }
  0xa1   : > { %v445_v27 = vpop.permute.xlu1 %444 }
  0xf5   : > { %v545_v42 = vpop.f32.mrf.mxu0 }
  0xf6   : > { %v546_v43 = vadd.f32 %v545_v42, %v410_v41 }
  0xf7   : > { %v547_v44 = vpop.f32.mrf.mxu0 }
  0xf8   : > { %v6238_v46 = vmax.f32 %v546_v43, 0.0  ;;  %v548_v47 = vadd.f32 %v547_v44, %v410_v41 }
  0xf9   : > { %v551_v48 = vpop.f32.mrf.mxu0 }
  0xfa   : > { %v6240_v49 = vmax.f32 %v548_v47, 0.0  ;;  %v552_v50 = vadd.f32 %v551_v48, %v415_v45 }
  0xfb   : > { %v553_v52 = vpop.f32.mrf.mxu0 }
  0xfc   : > { %v6242_v53 = vmax.f32 %v552_v50, 0.0  ;;  %v554_v54 = vadd.f32 %v553_v52, %v415_v45 }
  0xfd   : > { %v557_v55 = vpop.f32.mrf.mxu0 }
  0xfe   : > { %v6244_v56 = vmax.f32 %v554_v54, 0.0  ;;  %v558_v57 = vadd.f32 %v557_v55, %v420_v51 }
  0xff   : > { %v559_v58 = vpop.f32.mrf.mxu0 }
 0x100   : > { %v6246_v59 = vmax.f32 %v558_v57, 0.0  ;;  %v560_v60 = vadd.f32 %v559_v58, %v420_v51 }
 0x101   : > { %v563_v62 = vpop.f32.mrf.mxu0 }
 0x102   : > { %v6248_v63 = vmax.f32 %v560_v60, 0.0  ;;  %v564_v0 = vadd.f32 %v563_v62, %v425_v61 }
 0x103   : > { %v565_v3 = vpop.f32.mrf.mxu0 }
 0x104   : > { %v6250_v4 = vmax.f32 %v564_v0, 0.0  ;;  %v566_v5 = vadd.f32 %v565_v3, %v425_v61 }
 0x105   : > { %v569_v7 = vpop.f32.mrf.mxu0 }
 0x106   : > { %v6252_v8 = vmax.f32 %v566_v5, 0.0  ;;  %v570_v9 = vadd.f32 %v569_v7, %v430_v6 }
 0x107   : > { %v571_v10 = vpop.f32.mrf.mxu0 }
 0x108   : > { %v6254_v11 = vmax.f32 %v570_v9, 0.0  ;;  %v572_v12 = vadd.f32 %v571_v10, %v430_v6 }
 0x109   : > { %v575_v14 = vpop.f32.mrf.mxu0 }
 0x10a   : > { %v6256_v15 = vmax.f32 %v572_v12, 0.0  ;;  %v576_v16 = vadd.f32 %v575_v14, %v435_v13 }
 0x10b   : > { %v577_v17 = vpop.f32.mrf.mxu0 }
 0x10c   : > { %v6258_v18 = vmax.f32 %v576_v16, 0.0  ;;  %v578_v19 = vadd.f32 %v577_v17, %v435_v13 }
 0x10d   : > { %v581_v21 = vpop.f32.mrf.mxu0 }
 0x10e   : > { %v6260_v22 = vmax.f32 %v578_v19, 0.0  ;;  %v582_v23 = vadd.f32 %v581_v21, %v440_v20 }
 0x10f   : > { %v583_v24 = vpop.f32.mrf.mxu0 }
 0x110   : > { %v6262_v25 = vmax.f32 %v582_v23, 0.0  ;;  %v584_v26 = vadd.f32 %v583_v24, %v440_v20 }
 0x111   : > { %v587_v28 = vpop.f32.mrf.mxu0 }
 0x112   : > { %v6264_v29 = vmax.f32 %v584_v26, 0.0  ;;  %v588_v30 = vadd.f32 %v587_v28, %v445_v27  ;;  %611 = sbr.rel (%p5613_p11) target bundleno = 288 (0x120), region = 60 }
 0x113   : > { %v589_v31 = vpop.f32.mrf.mxu0 }
 0x114   : > { %v6266_v32 = vmax.f32 %v588_v30, 0.0  ;;  %v590_v33 = vadd.f32 %v589_v31, %v445_v27 }
 0x116   : > { %v6268_v34 = vmax.f32 %v590_v33, 0.0 }
 0x117   : > { %v5998_v35 = vmov 0.0  }
 0x118   : > { %612 = vst [vmem:[#allocation2 + $0x68] sm:$0xff] %v5998_v35  ;;  %613 = vst [vmem:[#allocation2] sm:$0xff] %v5998_v35 }
 0x119   : > { %614 = vst [vmem:[#allocation2 + $0xb0] sm:$0xff] %v5998_v35  ;;  %615 = vst [vmem:[#allocation2 + $0x60] sm:$0xff] %v5998_v35 }
 0x11a   : > { %616 = vst [vmem:[#allocation2 + $0x58] sm:$0xff] %v5998_v35  ;;  %617 = vst [vmem:[#allocation2 + $0xb8] sm:$0xff] %v5998_v35 }
 0x11b   : > { %618 = vst [vmem:[#allocation2 + $0xc0] sm:$0xff] %v5998_v35  ;;  %619 = vst [vmem:[#allocation2 + $0x38] sm:$0xff] %v5998_v35 }
 0x11c   : > { %620 = vst [vmem:[#allocation2 + $0x8] sm:$0xff] %v5998_v35  ;;  %621 = vst [vmem:[#allocation2 + $0x10] sm:$0xff] %v5998_v35 }
 0x11d   : > { %622 = vst [vmem:[#allocation2 + $0xd0] sm:$0xff] %v5998_v35  ;;  %623 = vst [vmem:[#allocation2 + $0x70] sm:$0xff] %v5998_v35 }
 0x11e   : > { %624 = vst [vmem:[#allocation2 + $0x98] sm:$0xff] %v5998_v35  ;;  %625 = vst [vmem:[#allocation2 + $0xe8] sm:$0xff] %v5998_v35 }
 0x11f   : > { %626 = vst [vmem:[#allocation2 + $0x20] sm:$0xff] %v5998_v35  ;;  %627 = vst [vmem:[#allocation2 + $0xf8] sm:$0xff] %v5998_v35 }
 0x120 PF: > { %750 = vmatprep.subr.mxu1 %v6268_v34  ;;  %798 = vmatprep.mubr.f32.mxu1 %v8939_v1  ;;  %s5999_s12 = smov 2   ;;  %s6000_s13 = smov 126   ;;  %v5614_v38 = vld [vmem:[%s8929_s3 + $0x40] sm:$0xff]  ;;  %vm709_vm2 = vcmask 523264   ;;  %v5615_v43 = vld [vmem:[%s8929_s3 + $0x48] sm:$0xff]  ;;  %v5616_v47 = vld [vmem:[%s8929_s3 + $0x50] sm:$0xff] }
 0x121   : > { %915 = vrot.lane.b32.xlu0 %v6266_v32, %s5999_s12  ;;  %751 = vmatpush1.msra.mxu1 %v6266_v32  ;;  %v6325_v39 = vld [vmem:[#allocation2 + $0xb8] sm:$0xff]  ;;  %v6363_v44 = vld [vmem:[#allocation2 + $0x60] sm:$0xff]  ;;  %v6393_v51 = vld [vmem:[#allocation2 + $0xb0] sm:$0xff]  ;;  %vm919_vm3 = vcmask 15360   ;;  %vm1170_vm4 = vcmask 1031168   ;;  %s6001_s22 = smov 4  }
 0x122   : > { %v6272_v36 = vld [vmem:[#allocation2 + $0x38] sm:$0xff]  ;;  %1291 = vmatprep.mubr.f32.mxu0 %v8939_v1  ;;  %752 = vmatprep.subr.mxu1 %v6264_v29  ;;  %v5618_v50 = vld [vmem:[%s8929_s3 + $0x60] sm:$0xff]  ;;  %v5619_v54 = vld [vmem:[%s8929_s3 + $0x68] sm:$0xff]  ;;  %s6002_s29 = smov 124   ;;  %s6003_s26 = smov 8   ;;  %vm1743_vm5 = vcmask 31744  }
 0x123   : > { %913 = vrot.lane.b32.xlu1 %v6272_v36, %s5999_s12  ;;  %5931 = vset.pattern.permute.xlu0 %v5997_v2  ;;  %v6343_v41 = vld [vmem:[#allocation2 + $0x58] sm:$0xff]  ;;  %v5620_v55 = vld [vmem:[%s8929_s3 + $0x70] sm:$0xff]  ;;  %v6424_v58 = vld [vmem:[#allocation2] sm:$0xff]  ;;  %vm1994_vm6 = vcmask 1014784   ;;  %s6004_s19 = smov 120   ;;  %s6005_s30 = smov 16  }
 0x124   : > { %753 = vmatpush1.msra.mxu1 %v6262_v25  ;;  %5932 = vset.pattern.permute.xlu1 %v5997_v2  ;;  %v6297_v2 = vld [vmem:[#allocation2 + $0xc0] sm:$0xff]  ;;  %v5617_v48 = vld [vmem:[%s8929_s3 + $0x58] sm:$0xff]  ;;  %v6395_v52 = vld [vmem:[#allocation2 + $0x70] sm:$0xff]  ;;  %vm2568_vm7 = vcmask 64512   ;;  %vm2819_vm8 = vcmask 982016   ;;  %s6006_s17 = smov 112  }
 0x125   : > { %917 = vrot.lane.b32.xlu0 %v6268_v34, %s5999_s12  ;;  %754 = vmatprep.subr.mxu1 %v6260_v22  ;;  %v6345_v42 = vld [vmem:[#allocation2 + $0xe8] sm:$0xff]  ;;  %v6365_v45 = vld [vmem:[#allocation2 + $0x98] sm:$0xff]  ;;  %v6426_v60 = vld [vmem:[#allocation2 + $0xd0] sm:$0xff]  ;;  %vm3393_vm9 = vcmask 130048   ;;  %vm3644_vm10 = vcmask 916480   ;;  %s6010_s11 = smov 68  }
 0x126   : > { %755 = vmatpush1.msra.mxu1 %v6258_v18  ;;  %v6299_v37 = vld [vmem:[#allocation2 + $0xf8] sm:$0xff]  ;;  %v6327_v40 = vld [vmem:[#allocation2 + $0x20] sm:$0xff]  ;;  %v6442_v61 = vld [vmem:[#allocation2 + $0x68] sm:$0xff]  ;;  %s6011_s23 = smov 118   ;;  %s6012_s14 = smov 113   ;;  %vm4250_vm11 = vcmask 1006592  }
 0x127   : > { %909 = vrot.lane.b32.xlu1 %v6262_v25, %s5999_s12  ;;  %756 = vmatprep.subr.mxu1 %v6256_v15  ;;  %v5621_v57 = vld [vmem:[%s8929_s3 + $0x78] sm:$0xff]  ;;  %v6444_v62 = vld [vmem:[#allocation2 + $0x10] sm:$0xff]  ;;  %v6454_v0 = vld [vmem:[#allocation2 + $0x8] sm:$0xff]  ;;  %vm4326_vm12 = vcmask 965632   ;;  %vm4402_vm13 = vcmask 924672   ;;  %vm4476_vm14 = vcmask 883712  }
 0x128   : > { %757 = vmatpush1.msra.mxu1 %v6254_v11  ;;  %8998 = vst [vmem:[#allocation10_spill] sm:$0xff] %v6444_v62  ;;  %8999 = vst [vmem:[#allocation11_spill] sm:$0xff] %v6454_v0  ;;  %v1363_v3 = vld [vmem:[%s8930_s4 + $0x38] sm:$0xff]  ;;  %v1362_v5 = vld [vmem:[%s8930_s4 + $0x30] sm:$0xff]  ;;  %vm4544_vm15 = vcmask 842752   ;;  %vm4620_vm0 = vcmask 801792  }
 0x129   : > { %911 = vrot.lane.b32.xlu0 %v6264_v29, %s5999_s12  ;;  %758 = vmatprep.subr.mxu1 %v6252_v8  ;;  %v1360_v6 = vld [vmem:[%s8930_s4 + $0x20] sm:$0xff]  ;;  %v1361_v7 = vld [vmem:[%s8930_s4 + $0x28] sm:$0xff]  ;;  %v1358_v12 = vld [vmem:[%s8930_s4 + $0x10] sm:$0xff]  ;;  %vm4696_vm1 = vcmask 760832  }
 0x12a   : > { %759 = vmatpush1.msra.mxu1 %v6250_v4  ;;  %v1359_v13 = vld [vmem:[%s8930_s4 + $0x18] sm:$0xff]  ;;  %v1356_v20 = vld [vmem:[%s8930_s4] sm:$0xff]  ;;  %v1357_v21 = vld [vmem:[%s8930_s4 + $0x8] sm:$0xff] }
 0x12b   : > { %1166 = vrot.lane.b32.xlu1 %v6268_v34, %s6000_s13  ;;  %760 = vmatprep.subr.mxu1 %v6248_v63 }
 0x12c   : > { %761 = vmatpush1.msra.mxu1 %v6246_v59 }
 0x12d   : > { %1168 = vrot.lane.b32.xlu0 %v6299_v37, %s6000_s13  ;;  %762 = vmatprep.subr.mxu1 %v6244_v56 }
 0x12e   : > { %763 = vmatpush1.msra.mxu1 %v6242_v53 }
 0x12f   : > { %907 = vrot.lane.b32.xlu1 %v6297_v2, %s5999_s12  ;;  %764 = vmatprep.subr.mxu1 %v6240_v49 }
 0x130   : > { %765 = vmatpush1.msra.mxu1 %v6238_v46 }
 0x131   : > { %1164 = vrot.lane.b32.xlu0 %v6266_v32, %s6000_s13  ;;  %5622 = vmatmul.mubr.msk.f32.vlgmr.msra.gmra.mxu1 %vm709_vm2, %v5614_v38 }
 0x132   : > { %804 = vmatprep.mubr.f32.mxu1 %v8939_v1 }
 0x133   : > { %903 = vrot.lane.b32.xlu1 %v6258_v18, %s5999_s12 }
 0x135   : > { %905 = vrot.lane.b32.xlu0 %v6260_v22, %s5999_s12  ;;  %5623 = vmatmul.mubr.msk.f32.gmra.mxu1 %vm709_vm2, %v5615_v43 }
 0x136   : > { %810 = vmatprep.mubr.f32.mxu1 %v8939_v1 }
 0x137   : > { %1160 = vrot.lane.b32.xlu1 %v6264_v29, %s6000_s13 }
 0x139   : > { %1162 = vrot.lane.b32.xlu0 %v6327_v40, %s6000_s13  ;;  %5624 = vmatmul.mubr.msk.f32.gmra.mxu1 %vm709_vm2, %v5616_v47 }
 0x13a   : > { %816 = vmatprep.mubr.f32.mxu1 %v8939_v1 }
 0x13b   : > { %901 = vrot.lane.b32.xlu1 %v6325_v39, %s5999_s12 }
 0x13d   : > { %1158 = vrot.lane.b32.xlu0 %v6262_v25, %s6000_s13  ;;  %5625 = vmatmul.mubr.msk.f32.gmra.mxu1 %vm709_vm2, %v5617_v48 }
 0x13e   : > { %822 = vmatprep.mubr.f32.mxu1 %v8939_v1 }
 0x13f   : > { %897 = vrot.lane.b32.xlu1 %v6254_v11, %s5999_s12 }
 0x141   : > { %899 = vrot.lane.b32.xlu0 %v6256_v15, %s5999_s12  ;;  %5626 = vmatmul.mubr.msk.f32.gmra.mxu1 %vm709_vm2, %v5618_v50 }
 0x142   : > { %828 = vmatprep.mubr.f32.mxu1 %v8939_v1 }
 0x143   : > { %1154 = vrot.lane.b32.xlu1 %v6260_v22, %s6000_s13 }
 0x145   : > { %1156 = vrot.lane.b32.xlu0 %v6345_v42, %s6000_s13  ;;  %5627 = vmatmul.mubr.msk.f32.gmra.mxu1 %vm709_vm2, %v5619_v54 }
 0x146   : > { %834 = vmatprep.mubr.f32.mxu1 %v8939_v1 }
 0x147   : > { %895 = vrot.lane.b32.xlu1 %v6343_v41, %s5999_s12 }
 0x149   : > { %1152 = vrot.lane.b32.xlu0 %v6258_v18, %s6000_s13  ;;  %5628 = vmatmul.mubr.msk.f32.gmra.mxu1 %vm709_vm2, %v5620_v55 }
 0x14a   : > { %840 = vmatprep.mubr.f32.mxu1 %v8939_v1 }
 0x14b   : > { %891 = vrot.lane.b32.xlu1 %v6250_v4, %s5999_s12 }
 0x14d   : > { %893 = vrot.lane.b32.xlu0 %v6252_v8, %s5999_s12  ;;  %5629 = vmatmul.mubr.msk.f32.gmra.mxu1 %vm709_vm2, %v5621_v57 }
 0x14e   : > { %1040 = vmatprep.mubr.f32.mxu1 %v8939_v1 }
 0x14f   : > { %1148 = vrot.lane.b32.xlu1 %v6256_v15, %s6000_s13 }
 0x151   : > { %1150 = vrot.lane.b32.xlu0 %v6365_v45, %s6000_s13 }
 0x153   : > { %889 = vrot.lane.b32.xlu1 %v6363_v44, %s5999_s12 }
 0x155   : > { %1146 = vrot.lane.b32.xlu0 %v6254_v11, %s6000_s13 }
 0x157   : > { %885 = vrot.lane.b32.xlu1 %v6246_v59, %s5999_s12 }
 0x159   : > { %887 = vrot.lane.b32.xlu0 %v6248_v63, %s5999_s12 }
 0x15b   : > { %1142 = vrot.lane.b32.xlu1 %v6252_v8, %s6000_s13 }
 0x15d   : > { %1144 = vrot.lane.b32.xlu0 %v6395_v52, %s6000_s13 }
 0x15f   : > { %883 = vrot.lane.b32.xlu1 %v6393_v51, %s5999_s12 }
 0x161   : > { %1140 = vrot.lane.b32.xlu0 %v6250_v4, %s6000_s13 }
 0x163   : > { %879 = vrot.lane.b32.xlu1 %v6242_v53, %s5999_s12 }
 0x165   : > { %881 = vrot.lane.b32.xlu0 %v6244_v56, %s5999_s12 }
 0x167   : > { %1136 = vrot.lane.b32.xlu1 %v6248_v63, %s6000_s13 }
 0x169   : > { %1138 = vrot.lane.b32.xlu0 %v6426_v60, %s6000_s13 }
 0x16b   : > { %877 = vrot.lane.b32.xlu1 %v6424_v58, %s5999_s12 }
 0x16d   : > { %1134 = vrot.lane.b32.xlu0 %v6246_v59, %s6000_s13 }
 0x16f   : > { %873 = vrot.lane.b32.xlu1 %v6238_v46, %s5999_s12 }
 0x171   : > { %875 = vrot.lane.b32.xlu0 %v6240_v49, %s5999_s12 }
 0x173   : > { %1130 = vrot.lane.b32.xlu1 %v6244_v56, %s6000_s13 }
 0x175   : > { %1132 = vrot.lane.b32.xlu0 %v6444_v62, %s6000_s13 }
 0x177   : > { %871 = vrot.lane.b32.xlu1 %v6442_v61, %s5999_s12  ;;  %s6007_s12 = smov 78  }
 0x179   : > { %1128 = vrot.lane.b32.xlu0 %v6242_v53, %s6000_s13 }
 0x17b   : > { %1124 = vrot.lane.b32.xlu1 %v6240_v49, %s6000_s13 }
 0x17d   : > { %1126 = vrot.lane.b32.xlu0 %v6454_v0, %s6000_s13 }
 0x17f   : > { %1122 = vrot.lane.b32.xlu1 %v6238_v46, %s6000_s13 }
 0x181   : > { %1401 = vperm.xlu0 %5931, %v1363_v3  }
 0x183   : > { %1396 = vperm.xlu1 %5932, %v1362_v5  }
 0x185   : > { %1386 = vperm.xlu0 %5931, %v1360_v6  }
 0x187   : > { %1391 = vperm.xlu1 %5932, %v1361_v7  }
 0x189   : > { %1376 = vperm.xlu0 %5931, %v1358_v12  }
 0x18b   : > { %1381 = vperm.xlu1 %5932, %v1359_v13  }
 0x18d   : > { %1366 = vperm.xlu0 %5931, %v1356_v20  }
 0x18f   : > { %1371 = vperm.xlu1 %5932, %v1357_v21  }
 0x191   : > { %1731 = vrot.lane.b32.xlu0 %v6297_v2, %s6001_s22 }
 0x193   : > { %v916_v10 = vpop.permute.xlu0 %915  ;;  %1737 = vrot.lane.b32.xlu1 %v6272_v36, %s6001_s22 }
 0x195   : > { %v914_v9 = vpop.permute.xlu1 %913  ;;  %1725 = vrot.lane.b32.xlu0 %v6325_v39, %s6001_s22 }
 0x196   : > { %v934_v19 = vsel %vm919_vm3, %v914_v9, %v916_v10 }
 0x197   : > { %v918_v16 = vpop.permute.xlu0 %917  ;;  %1992 = vrot.lane.b32.xlu1 %v6299_v37, %s6002_s29 }
 0x198   : > { %v935_v17 = vsel %vm919_vm3, %v916_v10, %v918_v16 }
 0x199   : > { %v910_v14 = vpop.permute.xlu1 %909  ;;  %992 = vmatprep.subr.mxu1 %v935_v17  ;;  %1719 = vrot.lane.b32.xlu0 %v6343_v41, %s6001_s22 }
 0x19a   : > { %993 = vmatpush1.msra.mxu1 %v934_v19 }
 0x19b   : > { %v912_v24 = vpop.permute.xlu0 %911  ;;  %1986 = vrot.lane.b32.xlu1 %v6327_v40, %s6002_s29 }
 0x19c   : > { %v933_v26 = vsel %vm919_vm3, %v910_v14, %v912_v24 }
 0x19d   : > { %v1167_v23 = vpop.permute.xlu1 %1166  ;;  %994 = vmatprep.subr.mxu1 %v933_v26  ;;  %1713 = vrot.lane.b32.xlu0 %v6363_v44, %s6001_s22 }
 0x19f   : > { %v1169_v28 = vpop.permute.xlu0 %1168  ;;  %1980 = vrot.lane.b32.xlu1 %v6345_v42, %s6002_s29 }
 0x1a0   : > { %v1186_v31 = vsel %vm1170_vm4, %v1167_v23, %v1169_v28 }
 0x1a1   : > { %v908_v27 = vpop.permute.xlu1 %907  ;;  %1243 = vmatprep.subr.mxu0 %v1186_v31  ;;  %1707 = vrot.lane.b32.xlu0 %v6393_v51, %s6001_s22 }
 0x1a2   : > { %v932_v30 = vsel %vm919_vm3, %v908_v27, %v910_v14 }
 0x1a3   : > { %995 = vmatpush1.msra.mxu1 %v932_v30  ;;  %v1165_v35 = vpop.permute.xlu0 %1164  ;;  %1974 = vrot.lane.b32.xlu1 %v6365_v45, %s6002_s29 }
 0x1a4   : > { %v1185_v38 = vsel %vm1170_vm4, %v1165_v35, %v1167_v23 }
 0x1a5   : > { %v904_v33 = vpop.permute.xlu1 %903  ;;  %1244 = vmatpush1.msra.mxu0 %v1185_v38  ;;  %1701 = vrot.lane.b32.xlu0 %v6424_v58, %s6001_s22 }
 0x1a7   : > { %v906_v47 = vpop.permute.xlu0 %905  ;;  %1968 = vrot.lane.b32.xlu1 %v6395_v52, %s6002_s29 }
 0x1a8   : > { %v931_v48 = vsel %vm919_vm3, %v904_v33, %v906_v47 }
 0x1a9   : > { %v1161_v43 = vpop.permute.xlu1 %1160  ;;  %996 = vmatprep.subr.mxu1 %v931_v48 }
 0x1ab   : > { %v1163_v54 = vpop.permute.xlu0 %1162  ;;  %1962 = vrot.lane.b32.xlu1 %v6426_v60, %s6002_s29 }
 0x1ac   : > { %v1184_v57 = vsel %vm1170_vm4, %v1161_v43, %v1163_v54 }
 0x1ad   : > { %v902_v50 = vpop.permute.xlu1 %901  ;;  %1245 = vmatprep.subr.mxu0 %v1184_v57 }
 0x1ae   : > { %v930_v55 = vsel %vm919_vm3, %v902_v50, %v904_v33 }
 0x1af   : > { %997 = vmatpush1.msra.mxu1 %v930_v55  ;;  %v1159_v5 = vpop.permute.xlu0 %1158 }
 0x1b0   : > { %v1183_v6 = vsel %vm1170_vm4, %v1159_v5, %v1161_v43 }
 0x1b1   : > { %v898_v3 = vpop.permute.xlu1 %897  ;;  %1246 = vmatpush1.msra.mxu0 %v1183_v6 }
 0x1b3   : > { %v900_v9 = vpop.permute.xlu0 %899 }
 0x1b4   : > { %v929_v10 = vsel %vm919_vm3, %v898_v3, %v900_v9 }
 0x1b5   : > { %v1155_v7 = vpop.permute.xlu1 %1154  ;;  %998 = vmatprep.subr.mxu1 %v929_v10 }
 0x1b7   : > { %v1157_v13 = vpop.permute.xlu0 %1156 }
 0x1b8   : > { %v1182_v16 = vsel %vm1170_vm4, %v1155_v7, %v1157_v13 }
 0x1b9   : > { %v896_v12 = vpop.permute.xlu1 %895  ;;  %1247 = vmatprep.subr.mxu0 %v1182_v16 }
 0x1ba   : > { %v928_v14 = vsel %vm919_vm3, %v896_v12, %v898_v3 }
 0x1bb   : > { %999 = vmatpush1.msra.mxu1 %v928_v14  ;;  %v1153_v19 = vpop.permute.xlu0 %1152 }
 0x1bc   : > { %v1181_v20 = vsel %vm1170_vm4, %v1153_v19, %v1155_v7 }
 0x1bd   : > { %v892_v17 = vpop.permute.xlu1 %891  ;;  %1248 = vmatpush1.msra.mxu0 %v1181_v20 }
 0x1bf   : > { %v894_v23 = vpop.permute.xlu0 %893 }
 0x1c0   : > { %v927_v24 = vsel %vm919_vm3, %v892_v17, %v894_v23 }
 0x1c1   : > { %v1149_v21 = vpop.permute.xlu1 %1148  ;;  %1000 = vmatprep.subr.mxu1 %v927_v24 }
 0x1c3   : > { %v1151_v27 = vpop.permute.xlu0 %1150 }
 0x1c4   : > { %v1180_v30 = vsel %vm1170_vm4, %v1149_v21, %v1151_v27  ;;  %v692_v27 = vld [vmem:[%s8929_s3] sm:$0xff] }
 0x1c5   : > { %v890_v26 = vpop.permute.xlu1 %889  ;;  %1249 = vmatprep.subr.mxu0 %v1180_v30 }
 0x1c6   : > { %v926_v28 = vsel %vm919_vm3, %v890_v26, %v892_v17 }
 0x1c7   : > { %1001 = vmatpush1.msra.mxu1 %v926_v28  ;;  %v1147_v33 = vpop.permute.xlu0 %1146 }
 0x1c8   : > { %v1179_v35 = vsel %vm1170_vm4, %v1147_v33, %v1149_v21 }
 0x1c9   : > { %v886_v31 = vpop.permute.xlu1 %885  ;;  %1250 = vmatpush1.msra.mxu0 %v1179_v35  ;;  %v693_v35 = vld [vmem:[%s8929_s3 + $0x8] sm:$0xff] }
 0x1cb   : > { %v888_v43 = vpop.permute.xlu0 %887 }
 0x1cc   : > { %v925_v47 = vsel %vm919_vm3, %v886_v31, %v888_v43 }
 0x1cd   : > { %v1143_v38 = vpop.permute.xlu1 %1142  ;;  %1002 = vmatprep.subr.mxu1 %v925_v47 }
 0x1cf   : > { %v1145_v50 = vpop.permute.xlu0 %1144 }
 0x1d0   : > { %v1178_v55 = vsel %vm1170_vm4, %v1143_v38, %v1145_v50 }
 0x1d1   : > { %v884_v48 = vpop.permute.xlu1 %883  ;;  %1251 = vmatprep.subr.mxu0 %v1178_v55  ;;  %v5638_v55 = vld [vmem:[%s8929_s3 + $0x80] sm:$0xff] }
 0x1d2   : > { %v924_v54 = vsel %vm919_vm3, %v884_v48, %v886_v31  ;;  %v694_v48 = vld [vmem:[%s8929_s3 + $0x10] sm:$0xff] }
 0x1d3   : > { %1003 = vmatpush1.msra.mxu1 %v924_v54  ;;  %v1141_v3 = vpop.permute.xlu0 %1140 }
 0x1d4   : > { %v1177_v5 = vsel %vm1170_vm4, %v1141_v3, %v1143_v38  ;;  %v5639_v3 = vld [vmem:[%s8929_s3 + $0x88] sm:$0xff] }
 0x1d5   : > { %v880_v57 = vpop.permute.xlu1 %879  ;;  %1252 = vmatpush1.msra.mxu0 %v1177_v5  ;;  %v696_v5 = vld [vmem:[%s8929_s3 + $0x20] sm:$0xff] }
 0x1d7   : > { %v882_v7 = vpop.permute.xlu0 %881 }
 0x1d8   : > { %v923_v9 = vsel %vm919_vm3, %v880_v57, %v882_v7  ;;  %v697_v7 = vld [vmem:[%s8929_s3 + $0x28] sm:$0xff] }
 0x1d9   : > { %v1137_v6 = vpop.permute.xlu1 %1136  ;;  %1004 = vmatprep.subr.mxu1 %v923_v9  ;;  %v5641_v9 = vld [vmem:[%s8929_s3 + $0x98] sm:$0xff] }
 0x1db   : > { %v1139_v12 = vpop.permute.xlu0 %1138 }
 0x1dc   : > { %v1176_v14 = vsel %vm1170_vm4, %v1137_v6, %v1139_v12  ;;  %v5642_v12 = vld [vmem:[%s8929_s3 + $0xa0] sm:$0xff] }
 0x1dd   : > { %v878_v10 = vpop.permute.xlu1 %877  ;;  %1253 = vmatprep.subr.mxu0 %v1176_v14  ;;  %v5643_v14 = vld [vmem:[%s8929_s3 + $0xa8] sm:$0xff] }
 0x1de   : > { %v922_v13 = vsel %vm919_vm3, %v878_v10, %v880_v57  ;;  %v695_v57 = vld [vmem:[%s8929_s3 + $0x18] sm:$0xff]  ;;  %v698_v10 = vld [vmem:[%s8929_s3 + $0x30] sm:$0xff] }
 0x1df   : > { %1005 = vmatpush1.msra.mxu1 %v922_v13  ;;  %v1135_v17 = vpop.permute.xlu0 %1134  ;;  %v699_v13 = vld [vmem:[%s8929_s3 + $0x38] sm:$0xff] }
 0x1e0   : > { %v1175_v19 = vsel %vm1170_vm4, %v1135_v17, %v1137_v6  ;;  %v5640_v6 = vld [vmem:[%s8929_s3 + $0x90] sm:$0xff]  ;;  %v5645_v17 = vld [vmem:[%s8929_s3 + $0xb8] sm:$0xff] }
 0x1e1   : > { %v874_v16 = vpop.permute.xlu1 %873  ;;  %1254 = vmatpush1.msra.mxu0 %v1175_v19 }
 0x1e3   : > { %v876_v21 = vpop.permute.xlu0 %875 }
 0x1e4   : > { %v921_v23 = vsel %vm919_vm3, %v874_v16, %v876_v21 }
 0x1e5   : > { %v1131_v20 = vpop.permute.xlu1 %1130  ;;  %1006 = vmatprep.subr.mxu1 %v921_v23 }
 0x1e7   : > { %v1133_v26 = vpop.permute.xlu0 %1132 }
 0x1e8   : > { %v1174_v30 = vsel %vm1170_vm4, %v1131_v20, %v1133_v26 }
 0x1e9   : > { %v872_v24 = vpop.permute.xlu1 %871  ;;  %1255 = vmatprep.subr.mxu0 %v1174_v30 }
 0x1ea   : > { %v920_v28 = vsel %vm919_vm3, %v872_v24, %v874_v16  ;;  %v5644_v16 = vld [vmem:[%s8929_s3 + $0xb0] sm:$0xff]  ;;  %vm4914_vm3 = vcmask 637952  }
 0x1eb   : > { %1007 = vmatpush1.msra.mxu1 %v920_v28  ;;  %v1129_v33 = vpop.permute.xlu0 %1128 }
 0x1ec   : > { %5630 = vmatmul.mubr.msk.f32.vlgmr.msra.gmra.mxu1 %vm709_vm2, %v692_v27  ;;  %v1173_v38 = vsel %vm1170_vm4, %v1129_v33, %v1131_v20 }
 0x1ed   : > { %v1125_v31 = vpop.permute.xlu1 %1124  ;;  %1046 = vmatprep.mubr.f32.mxu1 %v8939_v1  ;;  %1256 = vmatpush1.msra.mxu0 %v1173_v38 }
 0x1ef   : > { %v1127_v47 = vpop.permute.xlu0 %1126 }
 0x1f0   : > { %5631 = vmatmul.mubr.msk.f32.gmra.mxu1 %vm709_vm2, %v693_v35  ;;  %v1172_v50 = vsel %vm1170_vm4, %v1125_v31, %v1127_v47 }
 0x1f1   : > { %v1123_v43 = vpop.permute.xlu1 %1122  ;;  %1052 = vmatprep.mubr.f32.mxu1 %v8939_v1  ;;  %1257 = vmatprep.subr.mxu0 %v1172_v50  ;;  %v800_v36 = vpop.f32.mrf.mxu1 }
 0x1f2   : > { %v1171_v54 = vsel %vm1170_vm4, %v1123_v43, %v1125_v31 }
 0x1f3   : > { %1258 = vmatpush1.msra.mxu0 %v1171_v54  ;;  %v6622_v2 = vpop.f32.mrf.mxu1 }
 0x1f4   : > { %5632 = vmatmul.mubr.msk.f32.gmra.mxu1 %vm709_vm2, %v694_v48  ;;  %5646 = vmatmul.mubr.msk.f32.vlgmr.msra.gmra.mxu0 %vm709_vm2, %v5638_v55 }
 0x1f5   : > { %1058 = vmatprep.mubr.f32.mxu1 %v8939_v1  ;;  %1297 = vmatprep.mubr.f32.mxu0 %v8939_v1  ;;  %v806_v37 = vpop.f32.mrf.mxu1 }
 0x1f7   : > { %v808_v39 = vpop.f32.mrf.mxu1 }
 0x1f8   : > { %5633 = vmatmul.mubr.msk.f32.gmra.mxu1 %vm709_vm2, %v695_v57  ;;  %5647 = vmatmul.mubr.msk.f32.gmra.mxu0 %vm709_vm2, %v5639_v3 }
 0x1f9   : > { %1064 = vmatprep.mubr.f32.mxu1 %v8939_v1  ;;  %1303 = vmatprep.mubr.f32.mxu0 %v8939_v1  ;;  %v812_v40 = vpop.f32.mrf.mxu1 }
 0x1fb   : > { %v814_v41 = vpop.f32.mrf.mxu1 }
 0x1fc   : > { %5634 = vmatmul.mubr.msk.f32.gmra.mxu1 %vm709_vm2, %v696_v5  ;;  %5648 = vmatmul.mubr.msk.f32.gmra.mxu0 %vm709_vm2, %v5640_v6  ;;  %v6638_v21 = vpop.permute.xlu0 %1401 }
 0x1fd   : > { %1070 = vmatprep.mubr.f32.mxu1 %v8939_v1  ;;  %1309 = vmatprep.mubr.f32.mxu0 %v8939_v1  ;;  %v818_v42 = vpop.f32.mrf.mxu1 }
 0x1fe   : > { %v6642_v24 = vpop.permute.xlu1 %1396 }
 0x1ff   : > { %v820_v44 = vpop.f32.mrf.mxu1 }
 0x200   : > { %5635 = vmatmul.mubr.msk.f32.gmra.mxu1 %vm709_vm2, %v697_v7  ;;  %5649 = vmatmul.mubr.msk.f32.gmra.mxu0 %vm709_vm2, %v5641_v9  ;;  %v6644_v26 = vpop.permute.xlu0 %1386 }
 0x201   : > { %1076 = vmatprep.mubr.f32.mxu1 %v8939_v1  ;;  %1315 = vmatprep.mubr.f32.mxu0 %v8939_v1  ;;  %v6624_v51 = vpop.f32.mrf.mxu1 }
 0x202   : > { %v6648_v30 = vpop.permute.xlu1 %1391 }
 0x203   : > { %v6626_v45 = vpop.f32.mrf.mxu1 }
 0x204   : > { %5636 = vmatmul.mubr.msk.f32.gmra.mxu1 %vm709_vm2, %v698_v10  ;;  %5650 = vmatmul.mubr.msk.f32.gmra.mxu0 %vm709_vm2, %v5642_v12  ;;  %v1377_v33 = vpop.permute.xlu0 %1376 }
 0x205   : > { %1082 = vmatprep.mubr.f32.mxu1 %v8939_v1  ;;  %1321 = vmatprep.mubr.f32.mxu0 %v8939_v1  ;;  %v6628_v58 = vpop.f32.mrf.mxu1 }
 0x206   : > { %v1382_v47 = vpop.permute.xlu1 %1381 }
 0x207   : > { %v6630_v19 = vpop.f32.mrf.mxu1 }
 0x208   : > { %5637 = vmatmul.mubr.msk.f32.gmra.mxu1 %vm709_vm2, %v699_v13  ;;  %5651 = vmatmul.mubr.msk.f32.gmra.mxu0 %vm709_vm2, %v5643_v14  ;;  %v6650_v55 = vpop.permute.xlu0 %1366 }
 0x209   : > { %1622 = vmatprep.mubr.f32.mxu1 %v8939_v1  ;;  %1327 = vmatprep.mubr.f32.mxu0 %v8939_v1  ;;  %v6632_v52 = vpop.f32.mrf.mxu1 }
 0x20a   : > { %v1372_v14 = vpop.permute.xlu1 %1371 }
 0x20b   : > { %v6634_v60 = vpop.f32.mrf.mxu1 }
 0x20c   : > { %5652 = vmatmul.mubr.msk.f32.gmra.mxu0 %vm709_vm2, %v5644_v16 }
 0x20d   : > { %1333 = vmatprep.mubr.f32.mxu0 %v8939_v1  ;;  %v6636_v20 = vpop.f32.mrf.mxu1 }
 0x20f   : > { %v6640_v23 = vpop.f32.mrf.mxu1 }
 0x210   : > { %5653 = vmatmul.mubr.msk.f32.gmra.mxu0 %vm709_vm2, %v5645_v17 }
 0x211   : > { %1864 = vmatprep.mubr.f32.mxu0 %v8939_v1 }
 0x2ac   : > { %v1042_v27 = vpop.f32.mrf.mxu1 }
 0x2ad   : > { %v1043_v38 = vadd.f32 %v1042_v27, %v800_v36 }
 0x2ae   : > { %v6646_v28 = vpop.f32.mrf.mxu1 }
 0x2b0   : > { %v1048_v31 = vpop.f32.mrf.mxu1 }
 0x2b1   : > { %v1049_v3 = vadd.f32 %v1048_v31, %v806_v37 }
 0x2b2   : > { %v1050_v35 = vpop.f32.mrf.mxu1 }
 0x2b3   : > { %v1051_v9 = vadd.f32 %v1050_v35, %v808_v39 }
 0x2b4   : > { %v1054_v43 = vpop.f32.mrf.mxu1  ;;  %v1293_v48 = vpop.f32.mrf.mxu0 }
 0x2b5   : > { %v1340_v54 = vadd.f32 %v1293_v48, %v1043_v38  ;;  %v1055_v17 = vadd.f32 %v1054_v43, %v812_v40 }
 0x2b6   : > { %v1056_v50 = vpop.f32.mrf.mxu1  ;;  %v6652_v57 = vpop.f32.mrf.mxu0 }
 0x2b7   : > { %v1404_v6 = vadd.f32 %v6650_v55, %v1340_v54  ;;  %v1057_v0 = vadd.f32 %v1056_v50, %v814_v41 }
 0x2b8   : > { %v1060_v5 = vpop.f32.mrf.mxu1  ;;  %v1299_v7 = vpop.f32.mrf.mxu0 }
 0x2b9   : > { %v1420_v10 = vmax.f32 %v1404_v6, 0.0  ;;  %v1342_v13 = vadd.f32 %v1299_v7, %v1049_v3  ;;  %v1061_v39 = vadd.f32 %v1060_v5, %v818_v42 }
 0x2ba   : > { %v1062_v12 = vpop.f32.mrf.mxu1  ;;  %v1301_v16 = vpop.f32.mrf.mxu0 }
 0x2bb   : > { %v6656_v36 = vadd.f32 %v1420_v10, %v6238_v46  ;;  %v1406_v38 = vadd.f32 %v1372_v14, %v1342_v13  ;;  %v1343_v48 = vadd.f32 %v1301_v16, %v1051_v9  ;;  %v1063_v7 = vadd.f32 %v1062_v12, %v820_v44 }
 0x2bc   : > { %v1066_v27 = vpop.f32.mrf.mxu1  ;;  %v1305_v1 = vpop.f32.mrf.mxu0 }
 0x2bd   : > { %v1422_v37 = vmax.f32 %v1406_v38, 0.0  ;;  %v1407_v62 = vadd.f32 %v1372_v14, %v1343_v48  ;;  %v1344_v54 = vadd.f32 %v1305_v1, %v1055_v17  ;;  %1697 = vrot.lane.b32.xlu0 %v6656_v36, %s6001_s22 }
 0x2be   : > { %v1068_v31 = vpop.f32.mrf.mxu1  ;;  %v1307_v35 = vpop.f32.mrf.mxu0 }
 0x2bf   : > { %v6661_v3 = vadd.f32 %v1422_v37, %v6242_v53  ;;  %v1423_v40 = vmax.f32 %v1407_v62, 0.0  ;;  %v1408_v43 = vadd.f32 %v1377_v33, %v1344_v54  ;;  %v1345_v6 = vadd.f32 %v1307_v35, %v1057_v0 }
 0x2c0   : > { %v1072_v46 = vpop.f32.mrf.mxu1  ;;  %v1311_v9 = vpop.f32.mrf.mxu0  ;;  %v1069_v48 = vadd.f32 %v1068_v31, %v6626_v45 }
 0x2c1   : > { %v6664_v41 = vadd.f32 %v1423_v40, %v6244_v56  ;;  %v1424_v50 = vmax.f32 %v1408_v43, 0.0  ;;  %v1409_v1 = vadd.f32 %v1377_v33, %v1345_v6  ;;  %v1346_v13 = vadd.f32 %v1311_v9, %v1061_v39  ;;  %1703 = vrot.lane.b32.xlu0 %v6661_v3, %s6001_s22 }
 0x2c2   : > { %v1074_v10 = vpop.f32.mrf.mxu1  ;;  %v1313_v42 = vpop.f32.mrf.mxu0  ;;  %v1067_v56 = vadd.f32 %v1066_v27, %v6624_v51  ;;  %v1073_v40 = vadd.f32 %v1072_v46, %v6628_v58 }
 0x2c3   : > { %v6669_v53 = vadd.f32 %v1424_v50, %v6246_v59  ;;  %v1425_v62 = vmax.f32 %v1409_v1, 0.0  ;;  %v1410_v14 = vadd.f32 %v1382_v47, %v1346_v13  ;;  %v1347_v0 = vadd.f32 %v1313_v42, %v1063_v7  ;;  %1705 = vrot.lane.b32.xlu1 %v6664_v41, %s6001_s22 }
 0x2c4   : > { %v1078_v5 = vpop.f32.mrf.mxu1  ;;  %v1317_v44 = vpop.f32.mrf.mxu0  ;;  %v1075_v31 = vadd.f32 %v1074_v10, %v6630_v19 }
 0x2c5   : > { %1709 = vrot.lane.b32.xlu0 %v6669_v53, %s6001_s22  ;;  %v1348_v12 = vadd.f32 %v1317_v44, %v1067_v56  ;;  %v6677_v17 = vadd.f32 %v1425_v62, %v6248_v63  ;;  %v1426_v59 = vmax.f32 %v1410_v14, 0.0  ;;  %v1411_v38 = vadd.f32 %v1382_v47, %v1347_v0 }
 0x2c6   : > { %v1080_v33 = vpop.f32.mrf.mxu1  ;;  %v1319_v16 = vpop.f32.mrf.mxu0  ;;  %v1079_v43 = vadd.f32 %v1078_v5, %v6632_v52 }
 0x2c7   : > { %1958 = vrot.lane.b32.xlu1 %v6669_v53, %s6002_s29  ;;  %v1412_v27 = vadd.f32 %v6644_v26, %v1348_v12  ;;  %v1349_v54 = vadd.f32 %v1319_v16, %v1069_v48  ;;  %v6686_v35 = vadd.f32 %v1426_v59, %v6250_v4  ;;  %v1427_v63 = vmax.f32 %v1411_v38, 0.0 }
 0x2c8   : > { %v1323_v37 = vpop.f32.mrf.mxu0  ;;  %v1084_v51 = vpop.f32.mrf.mxu1  ;;  %v1081_v45 = vadd.f32 %v1080_v33, %v6634_v60 }
 0x2c9   : > { %1960 = vrot.lane.b32.xlu0 %v6677_v17, %s6002_s29  ;;  %v1428_v6 = vmax.f32 %v1412_v27, 0.0  ;;  %v1413_v4 = vadd.f32 %v6644_v26, %v1349_v54  ;;  %v6698_v50 = vadd.f32 %v1427_v63, %v6252_v8  ;;  %v1085_v1 = vadd.f32 %v1084_v51, %v6636_v20  ;;  %v9001_v51 = vld [vmem:[#allocation10_spill] sm:$0xff]  ;;  %v5667_v27 = vld [vmem:[%s8929_s3 + $0x128] sm:$0xff] }
 0x2ca   : > { %v1325_v39 = vpop.f32.mrf.mxu0  ;;  %v1086_v7 = vpop.f32.mrf.mxu1  ;;  %v1350_v58 = vadd.f32 %v1323_v37, %v1073_v40  ;;  %v5708_v54 = vld [vmem:[%s8930_s4 + $0x70] sm:$0xff]  ;;  %v5709_v63 = vld [vmem:[%s8930_s4 + $0x78] sm:$0xff]  ;;  %v5706_v40 = vld [vmem:[%s8930_s4 + $0x60] sm:$0xff] }
 0x2cb   : > { %1711 = vrot.lane.b32.xlu1 %v6677_v17, %s6001_s22  ;;  %v1087_v19 = vadd.f32 %v1086_v7, %v6640_v23  ;;  %v1351_v52 = vadd.f32 %v1325_v39, %v1075_v31  ;;  %v6707_v26 = vadd.f32 %v1428_v6, %v6254_v11  ;;  %v1429_v8 = vmax.f32 %v1413_v4, 0.0  ;;  %v9002_v39 = vld [vmem:[#allocation11_spill] sm:$0xff]  ;;  %v5704_v31 = vld [vmem:[%s8930_s4 + $0x50] sm:$0xff]  ;;  %v1738_v6 = vpop.permute.xlu1 %1737 }
 0x2cc   : > { %v1329_v47 = vpop.f32.mrf.mxu0  ;;  %v1414_v20 = vadd.f32 %v6648_v30, %v1350_v58  ;;  %v5705_v7 = vld [vmem:[%s8930_s4 + $0x58] sm:$0xff]  ;;  %v5702_v4 = vld [vmem:[%s8930_s4 + $0x40] sm:$0xff] }
 0x2cd   : > { %1715 = vrot.lane.b32.xlu0 %v6686_v35, %s6001_s22  ;;  %v1352_v60 = vadd.f32 %v1329_v47, %v1079_v43  ;;  %v1415_v0 = vadd.f32 %v6648_v30, %v1351_v52  ;;  %v6720_v44 = vadd.f32 %v1429_v8, %v6256_v15  ;;  %v5669_v47 = vld [vmem:[%s8929_s3 + $0x138] sm:$0xff]  ;;  %v1732_v43 = vpop.permute.xlu0 %1731 }
 0x2ce   : > { %v1331_v9 = vpop.f32.mrf.mxu0  ;;  %v1430_v33 = vmax.f32 %v1414_v20, 0.0 }
 0x2cf   : > { %v1353_v46 = vadd.f32 %v1331_v9, %v1081_v45  ;;  %1964 = vrot.lane.b32.xlu1 %v6686_v35, %s6002_s29  ;;  %v1416_v23 = vadd.f32 %v6642_v24, %v1352_v60  ;;  %v1431_v30 = vmax.f32 %v1415_v0, 0.0  ;;  %v5707_v45 = vld [vmem:[%s8930_s4 + $0x68] sm:$0xff]  ;;  %v1993_v58 = vpop.permute.xlu1 %1992 }
 0x2d0   : > { %v1335_v13 = vpop.f32.mrf.mxu0  ;;  %v6736_v48 = vadd.f32 %v1430_v33, %v6258_v18  ;;  %v5703_v9 = vld [vmem:[%s8930_s4 + $0x48] sm:$0xff] }
 0x2d1   : > { %v1354_v10 = vadd.f32 %v1335_v13, %v1085_v1  ;;  %1966 = vrot.lane.b32.xlu0 %v6698_v50, %s6002_s29  ;;  %v1417_v62 = vadd.f32 %v6642_v24, %v1353_v46  ;;  %v1432_v59 = vmax.f32 %v1416_v23, 0.0  ;;  %v1045_v24 = vadd.f32 %v6646_v28, %v6622_v2  ;;  %v5663_v2 = vld [vmem:[%s8929_s3 + $0x108] sm:$0xff]  ;;  %v5664_v28 = vld [vmem:[%s8929_s3 + $0x110] sm:$0xff]  ;;  %v1726_v1 = vpop.permute.xlu0 %1725 }
 0x2d2   : > { %v1337_v42 = vpop.f32.mrf.mxu0 }
 0x2d3   : > { %v1418_v5 = vadd.f32 %v6638_v21, %v1354_v10  ;;  %v1355_v14 = vadd.f32 %v1337_v42, %v1087_v19  ;;  %1717 = vrot.lane.b32.xlu1 %v6698_v50, %s6001_s22  ;;  %v1433_v12 = vmax.f32 %v1417_v62, 0.0  ;;  %v1341_v38 = vadd.f32 %v6652_v57, %v1045_v24  ;;  %v5666_v57 = vld [vmem:[%s8929_s3 + $0x120] sm:$0xff]  ;;  %v1987_v60 = vpop.permute.xlu1 %1986 }
 0x2d4   : > { %v6907_v24 = vld [vmem:[#allocation2 + $0xc0] sm:$0xff] }
 0x2d5   : > { %v1419_v56 = vadd.f32 %v6638_v21, %v1355_v14  ;;  %1721 = vrot.lane.b32.xlu0 %v6707_v26, %s6001_s22  ;;  %v1434_v11 = vmax.f32 %v1418_v5, 0.0  ;;  %v6739_v37 = vadd.f32 %v1433_v12, %v6264_v29  ;;  %v1405_v18 = vadd.f32 %v6650_v55, %v1341_v38  ;;  %v5662_v29 = vld [vmem:[%s8929_s3 + $0x100] sm:$0xff]  ;;  %v5665_v55 = vld [vmem:[%s8929_s3 + $0x118] sm:$0xff]  ;;  %v6873_v46 = vpop.permute.xlu0 %1719  ;;  %9003 = vst [vmem:[#allocation10_spill] sm:$0xff] %v6907_v24 }
 0x2d7   : > { %v1435_v16 = vmax.f32 %v1419_v56, 0.0  ;;  %1970 = vrot.lane.b32.xlu1 %v6707_v26, %s6002_s29  ;;  %v6732_v15 = vadd.f32 %v1434_v11, %v6266_v32  ;;  %v6749_v32 = vadd.f32 %v1431_v30, %v6260_v22  ;;  %v1421_v22 = vmax.f32 %v1405_v18, 0.0  ;;  %v6877_v19 = vpop.permute.xlu1 %1980 }
 0x2d9   : > { %v6727_v21 = vadd.f32 %v1435_v16, %v6268_v34  ;;  %1972 = vrot.lane.b32.xlu0 %v6720_v44, %s6002_s29  ;;  %v6745_v34 = vadd.f32 %v1432_v59, %v6262_v25  ;;  %v6773_v25 = vadd.f32 %v1421_v22, %v6240_v49  ;;  %v9000_v49 = vmov 0.0   ;;  %v6875_v13 = vpop.permute.xlu0 %1713 }
 0x2db   : > { %1574 = vmatprep.subr.mxu1 %v6727_v21  ;;  %1723 = vrot.lane.b32.xlu1 %v6720_v44, %s6001_s22  ;;  %v6881_v10 = vpop.permute.xlu1 %1974 }
 0x2dc   : > { %1575 = vmatpush1.msra.mxu1 %v6732_v15 }
 0x2dd   : > { %1576 = vmatprep.subr.mxu1 %v6739_v37  ;;  %1727 = vrot.lane.b32.xlu0 %v6736_v48, %s6001_s22  ;;  %v6879_v52 = vpop.permute.xlu0 %1707 }
 0x2de   : > { %1577 = vmatpush1.msra.mxu1 %v6745_v34 }
 0x2df   : > { %1578 = vmatprep.subr.mxu1 %v6749_v32  ;;  %1976 = vrot.lane.b32.xlu1 %v6736_v48, %s6002_s29  ;;  %v6885_v42 = vpop.permute.xlu1 %1968 }
 0x2e0   : > { %1579 = vmatpush1.msra.mxu1 %v6736_v48 }
 0x2e1   : > { %1580 = vmatprep.subr.mxu1 %v6720_v44  ;;  %1978 = vrot.lane.b32.xlu0 %v6749_v32, %s6002_s29  ;;  %v6883_v8 = vpop.permute.xlu0 %1701 }
 0x2e2   : > { %1581 = vmatpush1.msra.mxu1 %v6707_v26 }
 0x2e3   : > { %1582 = vmatprep.subr.mxu1 %v6698_v50  ;;  %1729 = vrot.lane.b32.xlu1 %v6749_v32, %s6001_s22  ;;  %v6889_v62 = vpop.permute.xlu1 %1962 }
 0x2e4   : > { %1583 = vmatpush1.msra.mxu1 %v6686_v35 }
 0x2e5   : > { %1584 = vmatprep.subr.mxu1 %v6677_v17  ;;  %1733 = vrot.lane.b32.xlu0 %v6745_v34, %s6001_s22 }
 0x2e6   : > { %1585 = vmatpush1.msra.mxu1 %v6669_v53 }
 0x2e7   : > { %1586 = vmatprep.subr.mxu1 %v6664_v41  ;;  %1982 = vrot.lane.b32.xlu1 %v6745_v34, %s6002_s29 }
 0x2e8   : > { %1587 = vmatpush1.msra.mxu1 %v6661_v3 }
 0x2e9   : > { %1588 = vmatprep.subr.mxu1 %v6773_v25  ;;  %1984 = vrot.lane.b32.xlu0 %v6739_v37, %s6002_s29 }
 0x2ea   : > { %1589 = vmatpush1.msra.mxu1 %v6656_v36 }
 0x2eb   : > { %1735 = vrot.lane.b32.xlu1 %v6739_v37, %s6001_s22  ;;  %5670 = vmatmul.mubr.msk.f32.vlgmr.msra.gmra.mxu1 %vm709_vm2, %v5662_v29 }
 0x2ec   : > { %1628 = vmatprep.mubr.f32.mxu1 %v9000_v49 }
 0x2ed   : > { %1741 = vrot.lane.b32.xlu0 %v6727_v21, %s6001_s22 }
 0x2ef   : > { %1739 = vrot.lane.b32.xlu1 %v6732_v15, %s6001_s22  ;;  %5671 = vmatmul.mubr.msk.f32.gmra.mxu1 %vm709_vm2, %v5663_v2 }
 0x2f0   : > { %1634 = vmatprep.mubr.f32.mxu1 %v9000_v49 }
 0x2f1   : > { %1990 = vrot.lane.b32.xlu0 %v6727_v21, %s6002_s29 }
 0x2f3   : > { %1988 = vrot.lane.b32.xlu1 %v6732_v15, %s6002_s29  ;;  %5672 = vmatmul.mubr.msk.f32.gmra.mxu1 %vm709_vm2, %v5664_v28 }
 0x2f4   : > { %1640 = vmatprep.mubr.f32.mxu1 %v9000_v49 }
 0x2f5   : > { %1954 = vrot.lane.b32.xlu0 %v6664_v41, %s6002_s29 }
 0x2f7   : > { %1699 = vrot.lane.b32.xlu1 %v6773_v25, %s6001_s22  ;;  %5673 = vmatmul.mubr.msk.f32.gmra.mxu1 %vm709_vm2, %v5665_v55 }
 0x2f8   : > { %1646 = vmatprep.mubr.f32.mxu1 %v9000_v49 }
 0x2f9   : > { %1695 = vrot.lane.b32.xlu0 %v6442_v61, %s6001_s22  ;;  %v5668_v61 = vld [vmem:[%s8929_s3 + $0x130] sm:$0xff]  ;;  %s6013_s22 = smov 63  }
 0x2fb   : > { %1956 = vrot.lane.b32.xlu1 %v9001_v51, %s6002_s29  ;;  %5674 = vmatmul.mubr.msk.f32.gmra.mxu1 %vm709_vm2, %v5666_v57 }
 0x2fc   : > { %1652 = vmatprep.mubr.f32.mxu1 %v9000_v49 }
 0x2fd   : > { %1948 = vrot.lane.b32.xlu0 %v6773_v25, %s6002_s29 }
 0x2ff   : > { %1952 = vrot.lane.b32.xlu1 %v6661_v3, %s6002_s29  ;;  %5675 = vmatmul.mubr.msk.f32.gmra.mxu1 %vm709_vm2, %v5667_v27 }
 0x300   : > { %1658 = vmatprep.mubr.f32.mxu1 %v9000_v49 }
 0x301   : > { %1946 = vrot.lane.b32.xlu0 %v6656_v36, %s6002_s29 }
 0x303   : > { %1950 = vrot.lane.b32.xlu1 %v9002_v39, %s6002_s29  ;;  %5676 = vmatmul.mubr.msk.f32.gmra.mxu1 %vm709_vm2, %v5668_v61 }
 0x304   : > { %1664 = vmatprep.mubr.f32.mxu1 %v9000_v49 }
 0x305   : > { %2221 = vperm.xlu0 %5931, %v5708_v54  }
 0x307   : > { %2226 = vperm.xlu1 %5932, %v5709_v63   ;;  %5677 = vmatmul.mubr.msk.f32.gmra.mxu1 %vm709_vm2, %v5669_v47 }
 0x308   : > { %2115 = vmatprep.mubr.f32.mxu1 %v9000_v49 }
 0x309   : > { %2211 = vperm.xlu0 %5931, %v5706_v40  }
 0x30b   : > { %2216 = vperm.xlu1 %5932, %v5707_v45  }
 0x30d   : > { %2201 = vperm.xlu0 %5931, %v5704_v31  }
 0x30f   : > { %2206 = vperm.xlu1 %5932, %v5705_v7  }
 0x311   : > { %2191 = vperm.xlu0 %5931, %v5702_v4  }
 0x313   : > { %2196 = vperm.xlu1 %5932, %v5703_v9  }
 0x315   : > { %2556 = vrot.lane.b32.xlu0 %v6907_v24, %s6003_s26 }
 0x32f   : > { %v6887_v20 = vpop.permute.xlu0 %1697 }
 0x333   : > { %v6891_v5 = vpop.permute.xlu0 %1703 }
 0x335   : > { %v6893_v14 = vpop.permute.xlu1 %1705 }
 0x337   : > { %v6895_v23 = vpop.permute.xlu0 %1709 }
 0x339   : > { %v6897_v0 = vpop.permute.xlu1 %1958 }
 0x33b   : > { %v6899_v56 = vpop.permute.xlu0 %1960 }
 0x33d   : > { %v6901_v11 = vpop.permute.xlu1 %1711 }
 0x33f   : > { %v1716_v33 = vpop.permute.xlu0 %1715 }
 0x341   : > { %v6903_v12 = vpop.permute.xlu1 %1964 }
 0x343   : > { %v6905_v16 = vpop.permute.xlu0 %1966 }
 0x345   : > { %v1718_v59 = vpop.permute.xlu1 %1717 }
 0x347   : > { %v1722_v30 = vpop.permute.xlu0 %1721 }
 0x349   : > { %v1971_v38 = vpop.permute.xlu1 %1970 }
 0x34b   : > { %v1973_v18 = vpop.permute.xlu0 %1972 }
 0x34d   : > { %v1724_v22 = vpop.permute.xlu1 %1723 }
 0x34f   : > { %v1728_v29 = vpop.permute.xlu0 %1727 }
 0x351   : > { %v1977_v2 = vpop.permute.xlu1 %1976 }
 0x353   : > { %v1979_v28 = vpop.permute.xlu0 %1978 }
 0x355   : > { %v1730_v55 = vpop.permute.xlu1 %1729 }
 0x357   : > { %v1734_v57 = vpop.permute.xlu0 %1733 }
 0x358   : > { %v1756_v4 = vsel %vm1743_vm5, %v1732_v43, %v1734_v57 }
 0x359   : > { %v1983_v51 = vpop.permute.xlu1 %1982 }
 0x35b   : > { %v1985_v27 = vpop.permute.xlu0 %1984 }
 0x35d   : > { %v1736_v61 = vpop.permute.xlu1 %1735 }
 0x35e   : > { %v1757_v45 = vsel %vm1743_vm5, %v1734_v57, %v1736_v61  ;;  %v2007_v61 = vsel %vm1994_vm6, %v1983_v51, %v1985_v27  ;;  %v1752_v57 = vsel %vm1743_vm5, %v6873_v46, %v1722_v30  ;;  %v2004_v51 = vsel %vm1994_vm6, %v1973_v18, %v6881_v10 }
 0x35f   : > { %v1742_v54 = vpop.permute.xlu0 %1741  ;;  %v1749_v46 = vsel %vm1743_vm5, %v6895_v23, %v6901_v11  ;;  %v1747_v10 = vsel %vm1743_vm5, %v6891_v5, %v6893_v14  ;;  %v2001_v11 = vsel %vm1994_vm6, %v6903_v12, %v6905_v16  ;;  %v5654_v12 = vld [vmem:[%s8929_s3 + $0xc0] sm:$0xff] }
 0x361   : > { %v1740_v39 = vpop.permute.xlu1 %1739 }
 0x362   : > { %v1759_v63 = vsel %vm1743_vm5, %v1740_v39, %v1742_v54  ;;  %v1758_v47 = vsel %vm1743_vm5, %v1738_v6, %v1740_v39  ;;  %v1755_v54 = vsel %vm1743_vm5, %v1728_v29, %v1730_v55  ;;  %v1754_v6 = vsel %vm1743_vm5, %v1726_v1, %v1728_v29 }
 0x363   : > { %v1991_v40 = vpop.permute.xlu0 %1990  ;;  %1816 = vmatprep.subr.mxu0 %v1759_v63  ;;  %v2008_v39 = vsel %vm1994_vm6, %v1985_v27, %v1987_v60  ;;  %v2006_v55 = vsel %vm1994_vm6, %v1979_v28, %v6877_v19  ;;  %v1751_v1 = vsel %vm1743_vm5, %v1716_v33, %v1718_v59  ;;  %v2005_v60 = vsel %vm1994_vm6, %v1977_v2, %v1979_v28  ;;  %v5656_v2 = vld [vmem:[%s8929_s3 + $0xd0] sm:$0xff]  ;;  %v5687_v28 = vld [vmem:[%s8929_s3 + $0x148] sm:$0xff]  ;;  %v5657_v27 = vld [vmem:[%s8929_s3 + $0xd8] sm:$0xff] }
 0x364   : > { %1817 = vmatpush1.msra.mxu0 %v1758_v47  ;;  %v2010_v31 = vsel %vm1994_vm6, %v1991_v40, %v1993_v58  ;;  %v1753_v58 = vsel %vm1743_vm5, %v1722_v30, %v1724_v22  ;;  %v1750_v22 = vsel %vm1743_vm5, %v6875_v13, %v1716_v33  ;;  %v2003_v19 = vsel %vm1994_vm6, %v1971_v38, %v1973_v18  ;;  %v5686_v18 = vld [vmem:[%s8929_s3 + $0x140] sm:$0xff]  ;;  %v5688_v63 = vld [vmem:[%s8929_s3 + $0x150] sm:$0xff] }
 0x365   : > { %1818 = vmatprep.subr.mxu0 %v1757_v45  ;;  %2067 = vmatprep.subr.mxu1 %v2010_v31  ;;  %v1989_v7 = vpop.permute.xlu1 %1988  ;;  %v1748_v30 = vsel %vm1743_vm5, %v6879_v52, %v6895_v23  ;;  %v2002_v13 = vsel %vm1994_vm6, %v6905_v16, %v6885_v42  ;;  %v1746_v52 = vsel %vm1743_vm5, %v6883_v8, %v6891_v5  ;;  %v5658_v47 = vld [vmem:[%s8929_s3 + $0xe0] sm:$0xff]  ;;  %v5659_v45 = vld [vmem:[%s8929_s3 + $0xe8] sm:$0xff] }
 0x366   : > { %v2009_v9 = vsel %vm1994_vm6, %v1989_v7, %v1991_v40  ;;  %1819 = vmatpush1.msra.mxu0 %v1756_v4  ;;  %v2000_v42 = vsel %vm1994_vm6, %v6899_v56, %v6889_v62  ;;  %v1999_v23 = vsel %vm1994_vm6, %v6897_v0, %v6899_v56  ;;  %v5655_v56 = vld [vmem:[%s8929_s3 + $0xc8] sm:$0xff]  ;;  %v5689_v40 = vld [vmem:[%s8929_s3 + $0x158] sm:$0xff]  ;;  %v5690_v31 = vld [vmem:[%s8929_s3 + $0x160] sm:$0xff] }
 0x367   : > { %v1955_v24 = vpop.permute.xlu0 %1954  ;;  %1820 = vmatprep.subr.mxu0 %v1755_v54  ;;  %2068 = vmatpush1.msra.mxu1 %v2009_v9  ;;  %v5660_v7 = vld [vmem:[%s8929_s3 + $0xf0] sm:$0xff]  ;;  %v5691_v4 = vld [vmem:[%s8929_s3 + $0x168] sm:$0xff]  ;;  %v5661_v9 = vld [vmem:[%s8929_s3 + $0xf8] sm:$0xff] }
 0x368   : > { %1821 = vmatpush1.msra.mxu0 %v1754_v6  ;;  %2069 = vmatprep.subr.mxu1 %v2008_v39  ;;  %v5692_v54 = vld [vmem:[%s8929_s3 + $0x170] sm:$0xff]  ;;  %v5693_v6 = vld [vmem:[%s8929_s3 + $0x178] sm:$0xff] }
 0x369   : > { %1822 = vmatprep.subr.mxu0 %v1753_v58  ;;  %2070 = vmatpush1.msra.mxu1 %v2007_v61  ;;  %v1700_v43 = vpop.permute.xlu1 %1699  ;;  %v7045_v39 = vld [vmem:[#allocation2 + $0x38] sm:$0xff] }
 0x36a   : > { %1823 = vmatpush1.msra.mxu0 %v1752_v57  ;;  %2071 = vmatprep.subr.mxu1 %v2006_v55  ;;  %v1745_v14 = vsel %vm1743_vm5, %v6887_v20, %v1700_v43  ;;  %v7049_v58 = vld [vmem:[#allocation2 + $0xb8] sm:$0xff]  ;;  %v7061_v57 = vld [vmem:[#allocation2 + $0x20] sm:$0xff] }
 0x36b   : > { %v1696_v29 = vpop.permute.xlu0 %1695  ;;  %1824 = vmatprep.subr.mxu0 %v1751_v1  ;;  %2072 = vmatpush1.msra.mxu1 %v2005_v60  ;;  %v7053_v61 = vld [vmem:[#allocation2 + $0xf8] sm:$0xff]  ;;  %9006 = vst [vmem:[#allocation13_spill] sm:$0xff] %v7061_v57  ;;  %v7065_v55 = vld [vmem:[#allocation2 + $0x60] sm:$0xff]  ;;  %v7069_v1 = vld [vmem:[#allocation2 + $0xe8] sm:$0xff] }
 0x36c   : > { %1825 = vmatpush1.msra.mxu0 %v1750_v22  ;;  %2073 = vmatprep.subr.mxu1 %v2004_v51  ;;  %v1744_v8 = vsel %vm1743_vm5, %v1696_v29, %v6887_v20  ;;  %9004 = vst [vmem:[#allocation11_spill] sm:$0xff] %v7053_v61  ;;  %v7057_v43 = vld [vmem:[#allocation2 + $0x58] sm:$0xff]  ;;  %9007 = vst [vmem:[#allocation14_spill] sm:$0xff] %v7065_v55  ;;  %v7073_v60 = vld [vmem:[#allocation2 + $0xb0] sm:$0xff]  ;;  %vm4990_vm5 = vcmask 596992  }
 0x36d   : > { %1826 = vmatprep.subr.mxu0 %v1749_v46  ;;  %2074 = vmatpush1.msra.mxu1 %v2003_v19  ;;  %v1957_v59 = vpop.permute.xlu1 %1956  ;;  %9005 = vst [vmem:[#allocation12_spill] sm:$0xff] %v7057_v43  ;;  %9008 = vst [vmem:[#allocation15_spill] sm:$0xff] %v7069_v1  ;;  %v7077_v29 = vld [vmem:[#allocation2 + $0x98] sm:$0xff]  ;;  %v7081_v22 = vld [vmem:[#allocation2] sm:$0xff] }
 0x36e   : > { %1827 = vmatpush1.msra.mxu0 %v1748_v30  ;;  %2075 = vmatprep.subr.mxu1 %v2002_v13  ;;  %v1998_v62 = vsel %vm1994_vm6, %v1955_v24, %v1957_v59  ;;  %9009 = vst [vmem:[#allocation16_spill] sm:$0xff] %v7073_v60  ;;  %9010 = vst [vmem:[#allocation17_spill] sm:$0xff] %v7077_v29  ;;  %v7085_v51 = vld [vmem:[#allocation2 + $0x70] sm:$0xff] }
 0x36f   : > { %v1949_v33 = vpop.permute.xlu0 %1948  ;;  %1828 = vmatprep.subr.mxu0 %v1747_v10  ;;  %2076 = vmatpush1.msra.mxu1 %v2001_v11  ;;  %9011 = vst [vmem:[#allocation18_spill] sm:$0xff] %v7081_v22  ;;  %9012 = vst [vmem:[#allocation19_spill] sm:$0xff] %v7085_v51  ;;  %v7089_v46 = vld [vmem:[#allocation2 + $0xd0] sm:$0xff] }
 0x370   : > { %1829 = vmatpush1.msra.mxu0 %v1746_v52  ;;  %2077 = vmatprep.subr.mxu1 %v2000_v42  ;;  %9013 = vst [vmem:[#allocation20_spill] sm:$0xff] %v7089_v46 }
 0x371   : > { %1830 = vmatprep.subr.mxu0 %v1745_v14  ;;  %2078 = vmatpush1.msra.mxu1 %v1999_v23  ;;  %v1953_v5 = vpop.permute.xlu1 %1952 }
 0x372   : > { %v1997_v16 = vsel %vm1994_vm6, %v1953_v5, %v1955_v24  ;;  %1831 = vmatpush1.msra.mxu0 %v1744_v8  ;;  %2079 = vmatprep.subr.mxu1 %v1998_v62 }
 0x373   : > { %5678 = vmatmul.mubr.msk.f32.vlgmr.msra.gmra.mxu0 %vm709_vm2, %v5654_v12  ;;  %2080 = vmatpush1.msra.mxu1 %v1997_v16  ;;  %v1947_v0 = vpop.permute.xlu0 %1946 }
 0x374   : > { %1870 = vmatprep.mubr.f32.mxu0 %v9000_v49  ;;  %v1995_v24 = vsel %vm1994_vm6, %v1947_v0, %v1949_v33  ;;  %2562 = vrot.lane.b32.xlu1 %v7045_v39, %s6003_s26 }
 0x375   : > { %v1951_v20 = vpop.permute.xlu1 %1950  ;;  %2550 = vrot.lane.b32.xlu0 %v7049_v58, %s6003_s26 }
 0x376   : > { %v1996_v38 = vsel %vm1994_vm6, %v1949_v33, %v1951_v20 }
 0x377   : > { %5679 = vmatmul.mubr.msk.f32.gmra.mxu0 %vm709_vm2, %v5655_v56  ;;  %2081 = vmatprep.subr.mxu1 %v1996_v38 }
 0x378   : > { %2082 = vmatpush1.msra.mxu1 %v1995_v24  ;;  %1876 = vmatprep.mubr.f32.mxu0 %v9000_v49 }
 0x379   : > { %5694 = vmatmul.mubr.msk.f32.vlgmr.msra.gmra.mxu1 %vm709_vm2, %v5686_v18  ;;  %2817 = vrot.lane.b32.xlu1 %v7053_v61, %s6004_s19 }
 0x37a   : > { %2121 = vmatprep.mubr.f32.mxu1 %v9000_v49  ;;  %2544 = vrot.lane.b32.xlu0 %v7057_v43, %s6003_s26 }
 0x37b   : > { %5680 = vmatmul.mubr.msk.f32.gmra.mxu0 %vm709_vm2, %v5656_v2 }
 0x37c   : > { %1882 = vmatprep.mubr.f32.mxu0 %v9000_v49 }
 0x37d   : > { %5695 = vmatmul.mubr.msk.f32.gmra.mxu1 %vm709_vm2, %v5687_v28  ;;  %2811 = vrot.lane.b32.xlu1 %v7061_v57, %s6004_s19 }
 0x37e   : > { %2127 = vmatprep.mubr.f32.mxu1 %v9000_v49  ;;  %2538 = vrot.lane.b32.xlu0 %v7065_v55, %s6003_s26 }
 0x37f   : > { %5681 = vmatmul.mubr.msk.f32.gmra.mxu0 %vm709_vm2, %v5657_v27 }
 0x380   : > { %1888 = vmatprep.mubr.f32.mxu0 %v9000_v49  ;;  %v7103_v8 = vpop.permute.xlu0 %2221 }
 0x381   : > { %5696 = vmatmul.mubr.msk.f32.gmra.mxu1 %vm709_vm2, %v5688_v63  ;;  %2805 = vrot.lane.b32.xlu1 %v7069_v1, %s6004_s19 }
 0x382   : > { %2133 = vmatprep.mubr.f32.mxu1 %v9000_v49  ;;  %2532 = vrot.lane.b32.xlu0 %v7073_v60, %s6003_s26  ;;  %v7107_v62 = vpop.permute.xlu1 %2226 }
 0x383   : > { %5682 = vmatmul.mubr.msk.f32.gmra.mxu0 %vm709_vm2, %v5658_v47 }
 0x384   : > { %1894 = vmatprep.mubr.f32.mxu0 %v9000_v49  ;;  %v7109_v16 = vpop.permute.xlu0 %2211 }
 0x385   : > { %5697 = vmatmul.mubr.msk.f32.gmra.mxu1 %vm709_vm2, %v5689_v40  ;;  %2799 = vrot.lane.b32.xlu1 %v7077_v29, %s6004_s19 }
 0x386   : > { %2139 = vmatprep.mubr.f32.mxu1 %v9000_v49  ;;  %2526 = vrot.lane.b32.xlu0 %v7081_v22, %s6003_s26  ;;  %v7113_v56 = vpop.permute.xlu1 %2216 }
 0x387   : > { %5683 = vmatmul.mubr.msk.f32.gmra.mxu0 %vm709_vm2, %v5659_v45 }
 0x388   : > { %1900 = vmatprep.mubr.f32.mxu0 %v9000_v49  ;;  %v2202_v18 = vpop.permute.xlu0 %2201 }
 0x389   : > { %5698 = vmatmul.mubr.msk.f32.gmra.mxu1 %vm709_vm2, %v5690_v31  ;;  %2793 = vrot.lane.b32.xlu1 %v7085_v51, %s6004_s19 }
 0x38a   : > { %2145 = vmatprep.mubr.f32.mxu1 %v9000_v49  ;;  %v2207_v27 = vpop.permute.xlu1 %2206 }
 0x38b   : > { %5684 = vmatmul.mubr.msk.f32.gmra.mxu0 %vm709_vm2, %v5660_v7 }
 0x38c   : > { %1906 = vmatprep.mubr.f32.mxu0 %v9000_v49  ;;  %v7121_v45 = vpop.permute.xlu0 %2191 }
 0x38d   : > { %5699 = vmatmul.mubr.msk.f32.gmra.mxu1 %vm709_vm2, %v5691_v4  ;;  %2787 = vrot.lane.b32.xlu1 %v7089_v46, %s6004_s19 }
 0x38e   : > { %2151 = vmatprep.mubr.f32.mxu1 %v9000_v49  ;;  %v2197_v51 = vpop.permute.xlu1 %2196 }
 0x38f   : > { %5685 = vmatmul.mubr.msk.f32.gmra.mxu0 %vm709_vm2, %v5661_v9 }
 0x390   : > { %2447 = vmatprep.mubr.f32.mxu0 %v9000_v49 }
 0x391   : > { %5700 = vmatmul.mubr.msk.f32.gmra.mxu1 %vm709_vm2, %v5692_v54 }
 0x392   : > { %2157 = vmatprep.mubr.f32.mxu1 %v9000_v49 }
 0x395   : > { %5701 = vmatmul.mubr.msk.f32.gmra.mxu1 %vm709_vm2, %v5693_v6 }
 0x396   : > { %2689 = vmatprep.mubr.f32.mxu1 %v9000_v49 }
 0x3ab   : > { %v1624_v19 = vpop.f32.mrf.mxu1 }
 0x3ad   : > { %v7093_v59 = vpop.f32.mrf.mxu1 }
 0x3af   : > { %v1630_v30 = vpop.f32.mrf.mxu1 }
 0x3b1   : > { %v1632_v13 = vpop.f32.mrf.mxu1 }
 0x3b3   : > { %v1636_v10 = vpop.f32.mrf.mxu1 }
 0x3b5   : > { %v1638_v11 = vpop.f32.mrf.mxu1 }
 0x3b7   : > { %v1642_v33 = vpop.f32.mrf.mxu1 }
 0x3b9   : > { %v1644_v52 = vpop.f32.mrf.mxu1 }
 0x3bb   : > { %v7095_v42 = vpop.f32.mrf.mxu1 }
 0x3bd   : > { %v7097_v14 = vpop.f32.mrf.mxu1 }
 0x3bf   : > { %v7099_v23 = vpop.f32.mrf.mxu1 }
 0x3c1   : > { %v7101_v12 = vpop.f32.mrf.mxu1 }
 0x3c3   : > { %v7105_v5 = vpop.f32.mrf.mxu1 }
 0x3c5   : > { %v7111_v0 = vpop.f32.mrf.mxu1 }
 0x3c7   : > { %v7115_v20 = vpop.f32.mrf.mxu1 }
 0x3c9   : > { %v7119_v2 = vpop.f32.mrf.mxu1 }
 0x433   : > { %v1866_v38 = vpop.f32.mrf.mxu0 }
 0x434   : > { %v1867_v63 = vadd.f32 %v1866_v38, %v1624_v19 }
 0x435   : > { %v7117_v24 = vpop.f32.mrf.mxu0 }
 0x437   : > { %v1872_v28 = vpop.f32.mrf.mxu0 }
 0x438   : > { %v1873_v9 = vadd.f32 %v1872_v28, %v1630_v30 }
 0x439   : > { %v1874_v47 = vpop.f32.mrf.mxu0  ;;  %v2117_v40 = vpop.f32.mrf.mxu1 }
 0x43a   : > { %v2164_v31 = vadd.f32 %v2117_v40, %v1867_v63  ;;  %v1875_v57 = vadd.f32 %v1874_v47, %v1632_v13 }
 0x43b   : > { %v1878_v7 = vpop.f32.mrf.mxu0  ;;  %v7123_v4 = vpop.f32.mrf.mxu1 }
 0x43c   : > { %v2229_v54 = vadd.f32 %v7121_v45, %v2164_v31  ;;  %v1879_v38 = vadd.f32 %v1878_v7, %v1636_v10 }
 0x43d   : > { %v1880_v6 = vpop.f32.mrf.mxu0  ;;  %v2123_v46 = vpop.f32.mrf.mxu1 }
 0x43e   : > { %v2245_v29 = vmax.f32 %v2229_v54, 0.0  ;;  %v2166_v1 = vadd.f32 %v2123_v46, %v1873_v9  ;;  %v1881_v43 = vadd.f32 %v1880_v6, %v1638_v11 }
 0x43f   : > { %v1884_v61 = vpop.f32.mrf.mxu0  ;;  %v2125_v22 = vpop.f32.mrf.mxu1 }
 0x440   : > { %v7127_v19 = vadd.f32 %v2245_v29, %v6656_v36  ;;  %v2231_v60 = vadd.f32 %v2197_v51, %v2166_v1  ;;  %v2167_v63 = vadd.f32 %v2125_v22, %v1875_v57  ;;  %v1885_v47 = vadd.f32 %v1884_v61, %v1642_v33 }
 0x441   : > { %v1886_v40 = vpop.f32.mrf.mxu0  ;;  %v2129_v55 = vpop.f32.mrf.mxu1 }
 0x442   : > { %v2247_v30 = vmax.f32 %v2231_v60, 0.0  ;;  %v2168_v28 = vadd.f32 %v2129_v55, %v1879_v38  ;;  %2522 = vrot.lane.b32.xlu0 %v7127_v19, %s6003_s26  ;;  %v2232_v31 = vadd.f32 %v2197_v51, %v2167_v63  ;;  %v1887_v60 = vadd.f32 %v1886_v40, %v1644_v52 }
 0x443   : > { %v1890_v54 = vpop.f32.mrf.mxu0  ;;  %v2131_v46 = vpop.f32.mrf.mxu1 }
 0x444   : > { %v7132_v13 = vadd.f32 %v2247_v30, %v6661_v3  ;;  %v2233_v36 = vadd.f32 %v2202_v18, %v2168_v28  ;;  %v2169_v29 = vadd.f32 %v2131_v46, %v1881_v43  ;;  %v2248_v10 = vmax.f32 %v2232_v31, 0.0 }
 0x445   : > { %v1892_v1 = vpop.f32.mrf.mxu0  ;;  %v2135_v57 = vpop.f32.mrf.mxu1  ;;  %v1891_v33 = vadd.f32 %v1890_v54, %v7095_v42 }
 0x446   : > { %v2249_v22 = vmax.f32 %v2233_v36, 0.0  ;;  %v2234_v7 = vadd.f32 %v2202_v18, %v2169_v29  ;;  %v2170_v11 = vadd.f32 %v2135_v57, %v1885_v47  ;;  %2528 = vrot.lane.b32.xlu0 %v7132_v13, %s6003_s26  ;;  %v7137_v55 = vadd.f32 %v2248_v10, %v6664_v41 }
 0x447   : > { %v1896_v51 = vpop.f32.mrf.mxu0  ;;  %v2137_v9 = vpop.f32.mrf.mxu1  ;;  %v1893_v28 = vadd.f32 %v1892_v1, %v7097_v14 }
 0x448   : > { %v7140_v3 = vadd.f32 %v2249_v22, %v6669_v53  ;;  %v2250_v61 = vmax.f32 %v2234_v7, 0.0  ;;  %v2235_v43 = vadd.f32 %v2207_v27, %v2170_v11  ;;  %v2171_v6 = vadd.f32 %v2137_v9, %v1887_v60  ;;  %2530 = vrot.lane.b32.xlu1 %v7137_v55, %s6003_s26 }
 0x449   : > { %v1898_v38 = vpop.f32.mrf.mxu0  ;;  %v2141_v18 = vpop.f32.mrf.mxu1  ;;  %v1897_v14 = vadd.f32 %v1896_v51, %v7099_v23 }
 0x44a   : > { %2534 = vrot.lane.b32.xlu0 %v7140_v3, %s6003_s26  ;;  %v2172_v41 = vadd.f32 %v2141_v18, %v1891_v33  ;;  %v7148_v40 = vadd.f32 %v2250_v61, %v6677_v17  ;;  %v2251_v53 = vmax.f32 %v2235_v43, 0.0  ;;  %v2236_v30 = vadd.f32 %v2207_v27, %v2171_v6 }
 0x44b   : > { %v1902_v52 = vpop.f32.mrf.mxu0  ;;  %v2143_v63 = vpop.f32.mrf.mxu1  ;;  %v1899_v1 = vadd.f32 %v1898_v38, %v7101_v12 }
 0x44c   : > { %2783 = vrot.lane.b32.xlu1 %v7140_v3, %s6004_s19  ;;  %v2237_v54 = vadd.f32 %v7109_v16, %v2172_v41  ;;  %v2173_v46 = vadd.f32 %v2143_v63, %v1893_v28  ;;  %v7157_v17 = vadd.f32 %v2251_v53, %v6686_v35  ;;  %v2252_v29 = vmax.f32 %v2236_v30, 0.0 }
 0x44d   : > { %v1904_v42 = vpop.f32.mrf.mxu0  ;;  %v2147_v31 = vpop.f32.mrf.mxu1  ;;  %v1903_v22 = vadd.f32 %v1902_v52, %v7105_v5 }
 0x44e   : > { %2785 = vrot.lane.b32.xlu0 %v7148_v40, %s6004_s19  ;;  %v1905_v10 = vadd.f32 %v1904_v42, %v7111_v0  ;;  %v2253_v57 = vmax.f32 %v2237_v54, 0.0  ;;  %v2238_v35 = vadd.f32 %v7109_v16, %v2173_v46  ;;  %v7169_v60 = vadd.f32 %v2252_v29, %v6698_v50  ;;  %v5724_v29 = vld [vmem:[%s8929_s3 + $0x1f0] sm:$0xff] }
 0x44f   : > { %v1908_v47 = vpop.f32.mrf.mxu0  ;;  %v2149_v36 = vpop.f32.mrf.mxu1  ;;  %v2174_v9 = vadd.f32 %v2147_v31, %v1897_v14  ;;  %v5764_v14 = vld [vmem:[%s8930_s4 + $0xb0] sm:$0xff] }
 0x450   : > { %2536 = vrot.lane.b32.xlu1 %v7148_v40, %s6003_s26  ;;  %v1909_v23 = vadd.f32 %v1908_v47, %v7115_v20  ;;  %v2175_v12 = vadd.f32 %v2149_v36, %v1899_v1  ;;  %v7178_v16 = vadd.f32 %v2253_v57, %v6707_v26  ;;  %v2254_v50 = vmax.f32 %v2238_v35, 0.0  ;;  %v7295_v47 = vld [vmem:[#allocation2 + $0x10] sm:$0xff]  ;;  %v5723_v36 = vld [vmem:[%s8929_s3 + $0x1e8] sm:$0xff]  ;;  %v5765_v1 = vld [vmem:[%s8930_s4 + $0xb8] sm:$0xff] }
 0x451   : > { %v2153_v27 = vpop.f32.mrf.mxu1  ;;  %v1910_v7 = vpop.f32.mrf.mxu0  ;;  %v2239_v20 = vadd.f32 %v7113_v56, %v2174_v9  ;;  %9015 = vst [vmem:[#allocation22_spill] sm:$0xff] %v7295_v47  ;;  %v5762_v57 = vld [vmem:[%s8930_s4 + $0xa0] sm:$0xff]  ;;  %v5760_v35 = vld [vmem:[%s8930_s4 + $0x90] sm:$0xff]  ;;  %v5761_v9 = vld [vmem:[%s8930_s4 + $0x98] sm:$0xff] }
 0x452   : > { %2540 = vrot.lane.b32.xlu0 %v7157_v17, %s6003_s26  ;;  %v2176_v0 = vadd.f32 %v2153_v27, %v1903_v22  ;;  %v1911_v43 = vadd.f32 %v1910_v7, %v7119_v2  ;;  %v2240_v2 = vadd.f32 %v7113_v56, %v2175_v12  ;;  %v7191_v28 = vadd.f32 %v2254_v50, %v6720_v44  ;;  %v7315_v27 = vld [vmem:[#allocation2 + $0x8] sm:$0xff]  ;;  %v7341_v7 = vpop.permute.xlu0 %2556 }
 0x453   : > { %v2155_v11 = vpop.f32.mrf.mxu1  ;;  %v2255_v63 = vmax.f32 %v2239_v20, 0.0  ;;  %9016 = vst [vmem:[#allocation23_spill] sm:$0xff] %v7315_v27  ;;  %v5763_v22 = vld [vmem:[%s8930_s4 + $0xa8] sm:$0xff] }
 0x454   : > { %v2177_v51 = vadd.f32 %v2155_v11, %v1905_v10  ;;  %2789 = vrot.lane.b32.xlu1 %v7157_v17, %s6004_s19  ;;  %v2241_v41 = vadd.f32 %v7103_v8, %v2176_v0  ;;  %v2256_v56 = vmax.f32 %v2240_v2, 0.0  ;;  %v5725_v10 = vld [vmem:[%s8929_s3 + $0x1f8] sm:$0xff]  ;;  %v2563_v11 = vpop.permute.xlu1 %2562 }
 0x455   : > { %v2159_v61 = vpop.f32.mrf.mxu1  ;;  %v7207_v54 = vadd.f32 %v2255_v63, %v6736_v48 }
 0x456   : > { %v2178_v5 = vadd.f32 %v2159_v61, %v1909_v23  ;;  %2791 = vrot.lane.b32.xlu0 %v7169_v60, %s6004_s19  ;;  %v2242_v6 = vadd.f32 %v7103_v8, %v2177_v51  ;;  %v2257_v42 = vmax.f32 %v2241_v41, 0.0  ;;  %v1869_v8 = vadd.f32 %v7117_v24, %v7093_v59  ;;  %v5721_v24 = vld [vmem:[%s8929_s3 + $0x1d8] sm:$0xff]  ;;  %v5758_v23 = vld [vmem:[%s8930_s4 + $0x80] sm:$0xff]  ;;  %v5759_v51 = vld [vmem:[%s8930_s4 + $0x88] sm:$0xff]  ;;  %v7352_v0 = vpop.permute.xlu0 %2550 }
 0x457   : > { %v2161_v33 = vpop.f32.mrf.mxu1 }
 0x458   : > { %v2243_v38 = vadd.f32 %v7107_v62, %v2178_v5  ;;  %v2179_v18 = vadd.f32 %v2161_v33, %v1911_v43  ;;  %2542 = vrot.lane.b32.xlu1 %v7169_v60, %s6003_s26  ;;  %v2258_v53 = vmax.f32 %v2242_v6, 0.0  ;;  %v2165_v44 = vadd.f32 %v7123_v4, %v1869_v8  ;;  %v5722_v4 = vld [vmem:[%s8929_s3 + $0x1e0] sm:$0xff]  ;;  %v2818_v61 = vpop.permute.xlu1 %2817 }
 0x459   : > { %v7214_v59 = vadd.f32 %v2257_v42, %v6745_v34  ;;  %v5718_v34 = vld [vmem:[%s8929_s3 + $0x1c0] sm:$0xff] }
 0x45a   : > { %v2244_v52 = vadd.f32 %v7107_v62, %v2179_v18  ;;  %2546 = vrot.lane.b32.xlu0 %v7178_v16, %s6003_s26  ;;  %v2259_v26 = vmax.f32 %v2243_v38, 0.0  ;;  %v7211_v46 = vadd.f32 %v2258_v53, %v6739_v37  ;;  %v7354_v12 = vpop.permute.xlu0 %2544 }
 0x45c   : > { %v2260_v30 = vmax.f32 %v2244_v52, 0.0  ;;  %2795 = vrot.lane.b32.xlu1 %v7178_v16, %s6004_s19  ;;  %v7203_v31 = vadd.f32 %v2259_v26, %v6732_v15  ;;  %v2230_v15 = vadd.f32 %v7121_v45, %v2165_v44  ;;  %v7284_v45 = vld [vmem:[#allocation2 + $0x68] sm:$0xff]  ;;  %v2812_v43 = vpop.permute.xlu1 %2811 }
 0x45d   : > { %9014 = vst [vmem:[#allocation21_spill] sm:$0xff] %v7284_v45 }
 0x45e   : > { %v7198_v62 = vadd.f32 %v2260_v30, %v6727_v21  ;;  %2797 = vrot.lane.b32.xlu0 %v7191_v28, %s6004_s19  ;;  %v7221_v21 = vadd.f32 %v2256_v56, %v6749_v32  ;;  %v2246_v48 = vmax.f32 %v2230_v15, 0.0  ;;  %v5719_v32 = vld [vmem:[%s8929_s3 + $0x1c8] sm:$0xff]  ;;  %v7356_v5 = vpop.permute.xlu0 %2538  ;;  %v9017_v15 = vld [vmem:[#allocation10_spill] sm:$0xff] }
 0x460   : > { %2399 = vmatprep.subr.mxu0 %v7198_v62  ;;  %2548 = vrot.lane.b32.xlu1 %v7191_v28, %s6003_s26  ;;  %v7245_v37 = vadd.f32 %v2246_v48, %v6773_v25  ;;  %v5720_v25 = vld [vmem:[%s8929_s3 + $0x1d0] sm:$0xff]  ;;  %v7358_v50 = vpop.permute.xlu1 %2805 }
 0x461   : > { %2400 = vmatpush1.msra.mxu0 %v7203_v31 }
 0x462   : > { %2401 = vmatprep.subr.mxu0 %v7211_v46  ;;  %2552 = vrot.lane.b32.xlu0 %v7207_v54, %s6003_s26  ;;  %v7360_v33 = vpop.permute.xlu0 %2532 }
 0x463   : > { %2402 = vmatpush1.msra.mxu0 %v7214_v59 }
 0x464   : > { %2403 = vmatprep.subr.mxu0 %v7221_v21  ;;  %2801 = vrot.lane.b32.xlu1 %v7207_v54, %s6004_s19  ;;  %v7362_v20 = vpop.permute.xlu1 %2799 }
 0x465   : > { %2404 = vmatpush1.msra.mxu0 %v7207_v54 }
 0x466   : > { %2405 = vmatprep.subr.mxu0 %v7191_v28  ;;  %2803 = vrot.lane.b32.xlu0 %v7221_v21, %s6004_s19  ;;  %v7364_v6 = vpop.permute.xlu0 %2526 }
 0x467   : > { %2406 = vmatpush1.msra.mxu0 %v7178_v16 }
 0x468   : > { %2407 = vmatprep.subr.mxu0 %v7169_v60  ;;  %2554 = vrot.lane.b32.xlu1 %v7221_v21, %s6003_s26  ;;  %v7366_v38 = vpop.permute.xlu1 %2793 }
 0x469   : > { %2408 = vmatpush1.msra.mxu0 %v7157_v17 }
 0x46a   : > { %2409 = vmatprep.subr.mxu0 %v7148_v40  ;;  %2558 = vrot.lane.b32.xlu0 %v7214_v59, %s6003_s26 }
 0x46b   : > { %2410 = vmatpush1.msra.mxu0 %v7140_v3 }
 0x46c   : > { %2411 = vmatprep.subr.mxu0 %v7137_v55  ;;  %2807 = vrot.lane.b32.xlu1 %v7214_v59, %s6004_s19  ;;  %v7370_v41 = vpop.permute.xlu1 %2787 }
 0x46d   : > { %2412 = vmatpush1.msra.mxu0 %v7132_v13 }
 0x46e   : > { %2413 = vmatprep.subr.mxu0 %v7245_v37  ;;  %2809 = vrot.lane.b32.xlu0 %v7211_v46, %s6004_s19 }
 0x46f   : > { %2414 = vmatpush1.msra.mxu0 %v7127_v19 }
 0x470   : > { %5726 = vmatmul.mubr.msk.f32.vlgmr.msra.gmra.mxu0 %vm709_vm2, %v5718_v34  ;;  %2560 = vrot.lane.b32.xlu1 %v7211_v46, %s6003_s26 }
 0x471   : > { %2453 = vmatprep.mubr.f32.mxu0 %v9000_v49 }
 0x472   : > { %2566 = vrot.lane.b32.xlu0 %v7198_v62, %s6003_s26 }
 0x474   : > { %5727 = vmatmul.mubr.msk.f32.gmra.mxu0 %vm709_vm2, %v5719_v32  ;;  %2564 = vrot.lane.b32.xlu1 %v7203_v31, %s6003_s26 }
 0x475   : > { %2459 = vmatprep.mubr.f32.mxu0 %v9000_v49 }
 0x476   : > { %2815 = vrot.lane.b32.xlu0 %v7198_v62, %s6004_s19 }
 0x478   : > { %5728 = vmatmul.mubr.msk.f32.gmra.mxu0 %vm709_vm2, %v5720_v25  ;;  %2813 = vrot.lane.b32.xlu1 %v7203_v31, %s6004_s19 }
 0x479   : > { %2465 = vmatprep.mubr.f32.mxu0 %v9000_v49 }
 0x47a   : > { %2779 = vrot.lane.b32.xlu0 %v7137_v55, %s6004_s19 }
 0x47c   : > { %5729 = vmatmul.mubr.msk.f32.gmra.mxu0 %vm709_vm2, %v5721_v24  ;;  %2524 = vrot.lane.b32.xlu1 %v7245_v37, %s6003_s26  ;;  %v9018_v24 = vld [vmem:[#allocation12_spill] sm:$0xff] }
 0x47d   : > { %2471 = vmatprep.mubr.f32.mxu0 %v9000_v49 }
 0x47e   : > { %2520 = vrot.lane.b32.xlu0 %v7284_v45, %s6003_s26  ;;  %s6014_s26 = smov 58  }
 0x480   : > { %5730 = vmatmul.mubr.msk.f32.gmra.mxu0 %vm709_vm2, %v5722_v4  ;;  %2781 = vrot.lane.b32.xlu1 %v7295_v47, %s6004_s19 }
 0x481   : > { %2477 = vmatprep.mubr.f32.mxu0 %v9000_v49 }
 0x482   : > { %2773 = vrot.lane.b32.xlu0 %v7245_v37, %s6004_s19 }
 0x484   : > { %5731 = vmatmul.mubr.msk.f32.gmra.mxu0 %vm709_vm2, %v5723_v36  ;;  %2777 = vrot.lane.b32.xlu1 %v7132_v13, %s6004_s19 }
 0x485   : > { %2483 = vmatprep.mubr.f32.mxu0 %v9000_v49 }
 0x486   : > { %2771 = vrot.lane.b32.xlu0 %v7127_v19, %s6004_s19 }
 0x488   : > { %5732 = vmatmul.mubr.msk.f32.gmra.mxu0 %vm709_vm2, %v5724_v29  ;;  %2775 = vrot.lane.b32.xlu1 %v7315_v27, %s6004_s19  ;;  %v9019_v29 = vld [vmem:[#allocation14_spill] sm:$0xff]  ;;  %s6009_s19 = smov 73  }
 0x489   : > { %2489 = vmatprep.mubr.f32.mxu0 %v9000_v49 }
 0x48a   : > { %3046 = vperm.xlu0 %5931, %v5764_v14  }
 0x48c   : > { %5733 = vmatmul.mubr.msk.f32.gmra.mxu0 %vm709_vm2, %v5725_v10  ;;  %3051 = vperm.xlu1 %5932, %v5765_v1   ;;  %v9020_v1 = vld [vmem:[#allocation16_spill] sm:$0xff] }
 0x48d   : > { %2940 = vmatprep.mubr.f32.mxu0 %v9000_v49 }
 0x48e   : > { %3036 = vperm.xlu0 %5931, %v5762_v57  }
 0x490   : > { %3041 = vperm.xlu1 %5932, %v5763_v22   ;;  %v9021_v22 = vld [vmem:[#allocation18_spill] sm:$0xff] }
 0x492   : > { %3026 = vperm.xlu0 %5931, %v5760_v35  }
 0x494   : > { %3031 = vperm.xlu1 %5932, %v5761_v9  }
 0x496   : > { %3016 = vperm.xlu0 %5931, %v5758_v23  }
 0x498   : > { %3021 = vperm.xlu1 %5932, %v5759_v51  }
 0x49a   : > { %3381 = vrot.lane.b32.xlu0 %v9017_v15, %s6005_s30 }
 0x49c   : > { %3387 = vrot.lane.b32.xlu1 %v7045_v39, %s6005_s30 }
 0x49e   : > { %3375 = vrot.lane.b32.xlu0 %v7049_v58, %s6005_s30 }
 0x4a2   : > { %3369 = vrot.lane.b32.xlu0 %v9018_v24, %s6005_s30 }
 0x4a6   : > { %3363 = vrot.lane.b32.xlu0 %v9019_v29, %s6005_s30 }
 0x4aa   : > { %3357 = vrot.lane.b32.xlu0 %v9020_v1, %s6005_s30 }
 0x4ae   : > { %3351 = vrot.lane.b32.xlu0 %v9021_v22, %s6005_s30 }
 0x4b4   : > { %v7368_v18 = vpop.permute.xlu0 %2522 }
 0x4b8   : > { %v7372_v2 = vpop.permute.xlu0 %2528 }
 0x4ba   : > { %v7374_v52 = vpop.permute.xlu1 %2530 }
 0x4bc   : > { %v7376_v26 = vpop.permute.xlu0 %2534 }
 0x4be   : > { %v7378_v63 = vpop.permute.xlu1 %2783 }
 0x4c0   : > { %v7380_v53 = vpop.permute.xlu0 %2785 }
 0x4c2   : > { %v7382_v30 = vpop.permute.xlu1 %2536 }
 0x4c4   : > { %v7384_v42 = vpop.permute.xlu0 %2540 }
 0x4c6   : > { %v7386_v8 = vpop.permute.xlu1 %2789 }
 0x4c8   : > { %v7388_v56 = vpop.permute.xlu0 %2791 }
 0x4ca   : > { %v2543_v44 = vpop.permute.xlu1 %2542 }
 0x4cc   : > { %v2547_v48 = vpop.permute.xlu0 %2546 }
 0x4ce   : > { %v2796_v34 = vpop.permute.xlu1 %2795 }
 0x4d0   : > { %v2798_v32 = vpop.permute.xlu0 %2797 }
 0x4d2   : > { %v2549_v25 = vpop.permute.xlu1 %2548 }
 0x4d4   : > { %v2553_v4 = vpop.permute.xlu0 %2552 }
 0x4d6   : > { %v2802_v36 = vpop.permute.xlu1 %2801 }
 0x4d8   : > { %v2804_v14 = vpop.permute.xlu0 %2803 }
 0x4da   : > { %v2555_v10 = vpop.permute.xlu1 %2554 }
 0x4dc   : > { %v2559_v39 = vpop.permute.xlu0 %2558 }
 0x4dd   : > { %v2581_v27 = vsel %vm2568_vm7, %v7341_v7, %v2559_v39 }
 0x4de   : > { %v2808_v57 = vpop.permute.xlu1 %2807 }
 0x4e0   : > { %v2810_v58 = vpop.permute.xlu0 %2809 }
 0x4e2   : > { %v2561_v35 = vpop.permute.xlu1 %2560 }
 0x4e3   : > { %v2582_v1 = vsel %vm2568_vm7, %v2559_v39, %v2561_v35  ;;  %v2578_v35 = vsel %vm2568_vm7, %v2547_v48, %v2549_v25  ;;  %v2575_v25 = vsel %vm2568_vm7, %v7356_v5, %v7384_v42  ;;  %v2827_v5 = vsel %vm2819_vm8, %v7388_v56, %v7366_v38  ;;  %v5713_v39 = vld [vmem:[%s8929_s3 + $0x198] sm:$0xff] }
 0x4e4   : > { %v2567_v9 = vpop.permute.xlu0 %2566  ;;  %v2825_v38 = vsel %vm2819_vm8, %v7380_v53, %v7370_v41 }
 0x4e6   : > { %v2565_v23 = vpop.permute.xlu1 %2564 }
 0x4e7   : > { %v2584_v15 = vsel %vm2568_vm7, %v2565_v23, %v2567_v9  ;;  %v2583_v24 = vsel %vm2568_vm7, %v2563_v11, %v2565_v23  ;;  %v2580_v9 = vsel %vm2568_vm7, %v2553_v4, %v2555_v10  ;;  %v2579_v11 = vsel %vm2568_vm7, %v7352_v0, %v2553_v4  ;;  %v5743_v10 = vld [vmem:[%s8929_s3 + $0x208] sm:$0xff] }
 0x4e8   : > { %v2816_v51 = vpop.permute.xlu0 %2815  ;;  %2641 = vmatprep.subr.mxu1 %v2584_v15  ;;  %v2832_v23 = vsel %vm2819_vm8, %v2808_v57, %v2810_v58  ;;  %v2830_v4 = vsel %vm2819_vm8, %v2802_v36, %v2804_v14  ;;  %v2573_v36 = vsel %vm2568_vm7, %v7360_v33, %v7376_v26  ;;  %v2571_v33 = vsel %vm2568_vm7, %v7364_v6, %v7372_v2  ;;  %v5744_v57 = vld [vmem:[%s8929_s3 + $0x210] sm:$0xff]  ;;  %v5715_v15 = vld [vmem:[%s8929_s3 + $0x1a8] sm:$0xff] }
 0x4e9   : > { %v2835_v29 = vsel %vm2819_vm8, %v2816_v51, %v2818_v61  ;;  %2642 = vmatpush1.msra.mxu1 %v2583_v24  ;;  %v2833_v61 = vsel %vm2819_vm8, %v2810_v58, %v2812_v43  ;;  %v2576_v43 = vsel %vm2568_vm7, %v7384_v42, %v2543_v44  ;;  %v2826_v42 = vsel %vm2819_vm8, %v7386_v8, %v7388_v56  ;;  %v5710_v8 = vld [vmem:[%s8929_s3 + $0x180] sm:$0xff] }
 0x4ea   : > { %2892 = vmatprep.subr.mxu0 %v2835_v29  ;;  %2643 = vmatprep.subr.mxu1 %v2582_v1  ;;  %v2814_v22 = vpop.permute.xlu1 %2813  ;;  %v5714_v58 = vld [vmem:[%s8929_s3 + $0x1a0] sm:$0xff]  ;;  %v5716_v29 = vld [vmem:[%s8929_s3 + $0x1b0] sm:$0xff]  ;;  %v5747_v1 = vld [vmem:[%s8929_s3 + $0x228] sm:$0xff] }
 0x4eb   : > { %v2834_v47 = vsel %vm2819_vm8, %v2814_v22, %v2816_v51  ;;  %2644 = vmatpush1.msra.mxu1 %v2581_v27  ;;  %v2577_v27 = vsel %vm2568_vm7, %v7354_v12, %v2547_v48  ;;  %v2829_v12 = vsel %vm2819_vm8, %v2798_v32, %v7362_v20  ;;  %v2828_v48 = vsel %vm2819_vm8, %v2796_v34, %v2798_v32  ;;  %v5742_v32 = vld [vmem:[%s8929_s3 + $0x200] sm:$0xff]  ;;  %v5745_v51 = vld [vmem:[%s8929_s3 + $0x218] sm:$0xff] }
 0x4ec   : > { %v2780_v45 = vpop.permute.xlu0 %2779  ;;  %2645 = vmatprep.subr.mxu1 %v2580_v9  ;;  %2893 = vmatpush1.msra.mxu0 %v2834_v47  ;;  %v2831_v47 = vsel %vm2819_vm8, %v2804_v14, %v7358_v50  ;;  %v2574_v50 = vsel %vm2568_vm7, %v7376_v26, %v7382_v30  ;;  %v2572_v30 = vsel %vm2568_vm7, %v7372_v2, %v7374_v52  ;;  %v5712_v14 = vld [vmem:[%s8929_s3 + $0x190] sm:$0xff]  ;;  %v5746_v24 = vld [vmem:[%s8929_s3 + $0x220] sm:$0xff]  ;;  %v5717_v22 = vld [vmem:[%s8929_s3 + $0x1b8] sm:$0xff] }
 0x4ed   : > { %2646 = vmatpush1.msra.mxu1 %v2579_v11  ;;  %2894 = vmatprep.subr.mxu0 %v2833_v61  ;;  %v2824_v52 = vsel %vm2819_vm8, %v7378_v63, %v7380_v53  ;;  %v5711_v53 = vld [vmem:[%s8929_s3 + $0x188] sm:$0xff]  ;;  %v5748_v9 = vld [vmem:[%s8929_s3 + $0x230] sm:$0xff]  ;;  %v5749_v11 = vld [vmem:[%s8929_s3 + $0x238] sm:$0xff] }
 0x4ee   : > { %2647 = vmatprep.subr.mxu1 %v2578_v35  ;;  %2895 = vmatpush1.msra.mxu0 %v2832_v23  ;;  %v2525_v7 = vpop.permute.xlu1 %2524  ;;  %v9022_v61 = vld [vmem:[#allocation11_spill] sm:$0xff]  ;;  %v9023_v35 = vld [vmem:[#allocation13_spill] sm:$0xff] }
 0x4ef   : > { %2648 = vmatpush1.msra.mxu1 %v2577_v27  ;;  %2896 = vmatprep.subr.mxu0 %v2831_v47  ;;  %v2570_v26 = vsel %vm2568_vm7, %v7368_v18, %v2525_v7  ;;  %v9024_v23 = vld [vmem:[#allocation15_spill] sm:$0xff]  ;;  %v9025_v7 = vld [vmem:[#allocation17_spill] sm:$0xff]  ;;  %v9027_v47 = vld [vmem:[#allocation20_spill] sm:$0xff] }
 0x4f0   : > { %v2521_v0 = vpop.permute.xlu0 %2520  ;;  %2649 = vmatprep.subr.mxu1 %v2576_v43  ;;  %2897 = vmatpush1.msra.mxu0 %v2830_v4  ;;  %v9026_v27 = vld [vmem:[#allocation19_spill] sm:$0xff] }
 0x4f1   : > { %2650 = vmatpush1.msra.mxu1 %v2575_v25  ;;  %2898 = vmatprep.subr.mxu0 %v2829_v12  ;;  %v2569_v6 = vsel %vm2568_vm7, %v2521_v0, %v7368_v18  ;;  %vm5064_vm7 = vcmask 556032  }
 0x4f2   : > { %2651 = vmatprep.subr.mxu1 %v2574_v50  ;;  %2899 = vmatpush1.msra.mxu0 %v2828_v48  ;;  %v2782_v44 = vpop.permute.xlu1 %2781 }
 0x4f3   : > { %2652 = vmatpush1.msra.mxu1 %v2573_v36  ;;  %2900 = vmatprep.subr.mxu0 %v2827_v5  ;;  %v2823_v41 = vsel %vm2819_vm8, %v2780_v45, %v2782_v44 }
 0x4f4   : > { %v2774_v20 = vpop.permute.xlu0 %2773  ;;  %2653 = vmatprep.subr.mxu1 %v2572_v30  ;;  %2901 = vmatpush1.msra.mxu0 %v2826_v42 }
 0x4f5   : > { %2654 = vmatpush1.msra.mxu1 %v2571_v33  ;;  %2902 = vmatprep.subr.mxu0 %v2825_v38 }
 0x4f6   : > { %2655 = vmatprep.subr.mxu1 %v2570_v26  ;;  %2903 = vmatpush1.msra.mxu0 %v2824_v52  ;;  %v2778_v2 = vpop.permute.xlu1 %2777 }
 0x4f7   : > { %v2822_v56 = vsel %vm2819_vm8, %v2778_v2, %v2780_v45  ;;  %2656 = vmatpush1.msra.mxu1 %v2569_v6  ;;  %2904 = vmatprep.subr.mxu0 %v2823_v41 }
 0x4f8   : > { %5734 = vmatmul.mubr.msk.f32.vlgmr.msra.gmra.mxu1 %vm709_vm2, %v5710_v8  ;;  %2905 = vmatpush1.msra.mxu0 %v2822_v56  ;;  %v2772_v63 = vpop.permute.xlu0 %2771 }
 0x4f9   : > { %2695 = vmatprep.mubr.f32.mxu1 %v9000_v49  ;;  %v2820_v45 = vsel %vm2819_vm8, %v2772_v63, %v2774_v20  ;;  %3642 = vrot.lane.b32.xlu1 %v9022_v61, %s6006_s17 }
 0x4fa   : > { %v2776_v18 = vpop.permute.xlu1 %2775 }
 0x4fb   : > { %v2821_v34 = vsel %vm2819_vm8, %v2774_v20, %v2776_v18  ;;  %vm5132_vm8 = vcmask 515072  }
 0x4fc   : > { %5735 = vmatmul.mubr.msk.f32.gmra.mxu1 %vm709_vm2, %v5711_v53  ;;  %2906 = vmatprep.subr.mxu0 %v2821_v34 }
 0x4fd   : > { %2907 = vmatpush1.msra.mxu0 %v2820_v45  ;;  %2701 = vmatprep.mubr.f32.mxu1 %v9000_v49 }
 0x4fe   : > { %5750 = vmatmul.mubr.msk.f32.vlgmr.msra.gmra.mxu0 %vm709_vm2, %v5742_v32  ;;  %3636 = vrot.lane.b32.xlu1 %v9023_v35, %s6006_s17 }
 0x4ff   : > { %2946 = vmatprep.mubr.f32.mxu0 %v9000_v49 }
 0x500   : > { %5736 = vmatmul.mubr.msk.f32.gmra.mxu1 %vm709_vm2, %v5712_v14 }
 0x501   : > { %2707 = vmatprep.mubr.f32.mxu1 %v9000_v49 }
 0x502   : > { %5751 = vmatmul.mubr.msk.f32.gmra.mxu0 %vm709_vm2, %v5743_v10  ;;  %3630 = vrot.lane.b32.xlu1 %v9024_v23, %s6006_s17 }
 0x503   : > { %2952 = vmatprep.mubr.f32.mxu0 %v9000_v49 }
 0x504   : > { %5737 = vmatmul.mubr.msk.f32.gmra.mxu1 %vm709_vm2, %v5713_v39 }
 0x505   : > { %2713 = vmatprep.mubr.f32.mxu1 %v9000_v49  ;;  %v7564_v42 = vpop.permute.xlu0 %3046 }
 0x506   : > { %5752 = vmatmul.mubr.msk.f32.gmra.mxu0 %vm709_vm2, %v5744_v57  ;;  %3624 = vrot.lane.b32.xlu1 %v9025_v7, %s6006_s17 }
 0x507   : > { %2958 = vmatprep.mubr.f32.mxu0 %v9000_v49  ;;  %v7568_v38 = vpop.permute.xlu1 %3051 }
 0x508   : > { %5738 = vmatmul.mubr.msk.f32.gmra.mxu1 %vm709_vm2, %v5714_v58 }
 0x509   : > { %2719 = vmatprep.mubr.f32.mxu1 %v9000_v49  ;;  %v7570_v26 = vpop.permute.xlu0 %3036 }
 0x50a   : > { %5753 = vmatmul.mubr.msk.f32.gmra.mxu0 %vm709_vm2, %v5745_v51  ;;  %3618 = vrot.lane.b32.xlu1 %v9026_v27, %s6006_s17 }
 0x50b   : > { %2964 = vmatprep.mubr.f32.mxu0 %v9000_v49  ;;  %v7574_v8 = vpop.permute.xlu1 %3041 }
 0x50c   : > { %5739 = vmatmul.mubr.msk.f32.gmra.mxu1 %vm709_vm2, %v5715_v15 }
 0x50d   : > { %2725 = vmatprep.mubr.f32.mxu1 %v9000_v49  ;;  %v3027_v41 = vpop.permute.xlu0 %3026 }
 0x50e   : > { %5754 = vmatmul.mubr.msk.f32.gmra.mxu0 %vm709_vm2, %v5746_v24  ;;  %3612 = vrot.lane.b32.xlu1 %v9027_v47, %s6006_s17 }
 0x50f   : > { %2970 = vmatprep.mubr.f32.mxu0 %v9000_v49  ;;  %v7580_v18 = vpop.permute.xlu1 %3031 }
 0x510   : > { %5740 = vmatmul.mubr.msk.f32.gmra.mxu1 %vm709_vm2, %v5716_v29 }
 0x511   : > { %2731 = vmatprep.mubr.f32.mxu1 %v9000_v49  ;;  %v3017_v14 = vpop.permute.xlu0 %3016 }
 0x512   : > { %5755 = vmatmul.mubr.msk.f32.gmra.mxu0 %vm709_vm2, %v5747_v1 }
 0x513   : > { %2976 = vmatprep.mubr.f32.mxu0 %v9000_v49 }
 0x514   : > { %5741 = vmatmul.mubr.msk.f32.gmra.mxu1 %vm709_vm2, %v5717_v22  ;;  %v3022_v22 = vpop.permute.xlu1 %3021 }
 0x515   : > { %3272 = vmatprep.mubr.f32.mxu1 %v9000_v49 }
 0x516   : > { %5756 = vmatmul.mubr.msk.f32.gmra.mxu0 %vm709_vm2, %v5748_v9 }
 0x517   : > { %2982 = vmatprep.mubr.f32.mxu0 %v9000_v49 }
 0x51a   : > { %5757 = vmatmul.mubr.msk.f32.gmra.mxu0 %vm709_vm2, %v5749_v11 }
 0x51b   : > { %3514 = vmatprep.mubr.f32.mxu0 %v9000_v49 }
 0x530   : > { %v2449_v0 = vpop.f32.mrf.mxu0 }
 0x532   : > { %v2451_v43 = vpop.f32.mrf.mxu0 }
 0x534   : > { %v2455_v4 = vpop.f32.mrf.mxu0 }
 0x536   : > { %v2457_v25 = vpop.f32.mrf.mxu0 }
 0x538   : > { %v2461_v12 = vpop.f32.mrf.mxu0 }
 0x53a   : > { %v2463_v50 = vpop.f32.mrf.mxu0 }
 0x53c   : > { %v2467_v48 = vpop.f32.mrf.mxu0 }
 0x53e   : > { %v7554_v44 = vpop.f32.mrf.mxu0 }
 0x540   : > { %v7556_v36 = vpop.f32.mrf.mxu0 }
 0x542   : > { %v7558_v5 = vpop.f32.mrf.mxu0 }
 0x544   : > { %v7560_v20 = vpop.f32.mrf.mxu0 }
 0x546   : > { %v7562_v30 = vpop.f32.mrf.mxu0 }
 0x548   : > { %v7566_v33 = vpop.f32.mrf.mxu0 }
 0x54a   : > { %v7572_v52 = vpop.f32.mrf.mxu0 }
 0x54c   : > { %v7576_v6 = vpop.f32.mrf.mxu0 }
 0x54e   : > { %v7578_v63 = vpop.f32.mrf.mxu0 }
 0x5b8   : > { %v2691_v2 = vpop.f32.mrf.mxu1 }
 0x5b9   : > { %v2692_v34 = vadd.f32 %v2691_v2, %v2449_v0 }
 0x5ba   : > { %v2693_v56 = vpop.f32.mrf.mxu1 }
 0x5bb   : > { %v2694_v10 = vadd.f32 %v2693_v56, %v2451_v43 }
 0x5bc   : > { %v2697_v53 = vpop.f32.mrf.mxu1 }
 0x5bd   : > { %v2698_v51 = vadd.f32 %v2697_v53, %v2455_v4 }
 0x5be   : > { %v2699_v32 = vpop.f32.mrf.mxu1  ;;  %v2942_v45 = vpop.f32.mrf.mxu0 }
 0x5bf   : > { %v2989_v39 = vadd.f32 %v2942_v45, %v2692_v34  ;;  %v2700_v35 = vadd.f32 %v2699_v32, %v2457_v25 }
 0x5c0   : > { %v2703_v57 = vpop.f32.mrf.mxu1  ;;  %v2944_v58 = vpop.f32.mrf.mxu0 }
 0x5c1   : > { %v3054_v15 = vadd.f32 %v3017_v14, %v2989_v39  ;;  %v2990_v24 = vadd.f32 %v2944_v58, %v2694_v10  ;;  %v2704_v47 = vadd.f32 %v2703_v57, %v2461_v12 }
 0x5c2   : > { %v2705_v29 = vpop.f32.mrf.mxu1  ;;  %v2948_v1 = vpop.f32.mrf.mxu0 }
 0x5c3   : > { %v3070_v9 = vmax.f32 %v3054_v15, 0.0  ;;  %v3055_v11 = vadd.f32 %v3017_v14, %v2990_v24  ;;  %v2991_v61 = vadd.f32 %v2948_v1, %v2698_v51  ;;  %v2706_v53 = vadd.f32 %v2705_v29, %v2463_v50 }
 0x5c4   : > { %v2709_v23 = vpop.f32.mrf.mxu1  ;;  %v2950_v7 = vpop.f32.mrf.mxu0 }
 0x5c5   : > { %v7583_v27 = vadd.f32 %v3070_v9, %v7127_v19  ;;  %v3071_v0 = vmax.f32 %v3055_v11, 0.0  ;;  %v3056_v43 = vadd.f32 %v3022_v22, %v2991_v61  ;;  %v2992_v2 = vadd.f32 %v2950_v7, %v2700_v35 }
 0x5c6   : > { %v2711_v56 = vpop.f32.mrf.mxu1  ;;  %v2954_v4 = vpop.f32.mrf.mxu0  ;;  %v2710_v10 = vadd.f32 %v2709_v23, %v2467_v48 }
 0x5c7   : > { %3102 = vst [vmem:[#allocation2 + $0xe0] sm:$0xff] %v7583_v27  ;;  %v3072_v34 = vmax.f32 %v3056_v43, 0.0  ;;  %v2993_v45 = vadd.f32 %v2954_v4, %v2704_v47  ;;  %3347 = vrot.lane.b32.xlu0 %v7583_v27, %s6005_s30  ;;  %v7589_v25 = vadd.f32 %v3071_v0, %v7245_v37  ;;  %v3057_v32 = vadd.f32 %v3022_v22, %v2992_v2 }
 0x5c8   : > { %v2715_v19 = vpop.f32.mrf.mxu1  ;;  %v2956_v14 = vpop.f32.mrf.mxu0  ;;  %v2712_v1 = vadd.f32 %v2711_v56, %v7554_v44 }
 0x5c9   : > { %9028 = vst [vmem:[#allocation10_spill] sm:$0xff] %v7589_v25  ;;  %v7592_v12 = vadd.f32 %v3072_v34, %v7132_v13  ;;  %v3058_v39 = vadd.f32 %v3027_v41, %v2993_v45  ;;  %v2994_v57 = vadd.f32 %v2956_v14, %v2706_v53  ;;  %v3073_v58 = vmax.f32 %v3057_v32, 0.0 }
 0x5ca   : > { %v2717_v51 = vpop.f32.mrf.mxu1  ;;  %v2960_v50 = vpop.f32.mrf.mxu0  ;;  %v2716_v9 = vadd.f32 %v2715_v19, %v7556_v36 }
 0x5cb   : > { %9029 = vst [vmem:[#allocation12_spill] sm:$0xff] %v7592_v12  ;;  %v3074_v15 = vmax.f32 %v3058_v39, 0.0  ;;  %v3059_v24 = vadd.f32 %v3027_v41, %v2994_v57  ;;  %v2995_v29 = vadd.f32 %v2960_v50, %v2710_v10  ;;  %3353 = vrot.lane.b32.xlu0 %v7592_v12, %s6005_s30  ;;  %v7597_v37 = vadd.f32 %v3073_v58, %v7137_v55 }
 0x5cc   : > { %v2721_v22 = vpop.f32.mrf.mxu1  ;;  %v2962_v13 = vpop.f32.mrf.mxu0  ;;  %v2718_v44 = vadd.f32 %v2717_v51, %v7558_v5 }
 0x5cd   : > { %9030 = vst [vmem:[#allocation14_spill] sm:$0xff] %v7597_v37  ;;  %v7601_v48 = vadd.f32 %v3074_v15, %v7140_v3  ;;  %v3075_v11 = vmax.f32 %v3059_v24, 0.0  ;;  %v3060_v61 = vadd.f32 %v7580_v18, %v2995_v29  ;;  %v2996_v41 = vadd.f32 %v2962_v13, %v2712_v1  ;;  %3355 = vrot.lane.b32.xlu1 %v7597_v37, %s6005_s30 }
 0x5ce   : > { %v2723_v35 = vpop.f32.mrf.mxu1  ;;  %v2966_v23 = vpop.f32.mrf.mxu0  ;;  %v2722_v2 = vadd.f32 %v2721_v22, %v7560_v20 }
 0x5cf   : > { %9031 = vst [vmem:[#allocation16_spill] sm:$0xff] %v7601_v48  ;;  %v7608_v55 = vadd.f32 %v3075_v11, %v7148_v40  ;;  %v3076_v7 = vmax.f32 %v3060_v61, 0.0  ;;  %v2997_v47 = vadd.f32 %v2966_v23, %v2716_v9  ;;  %3359 = vrot.lane.b32.xlu0 %v7601_v48, %s6005_s30  ;;  %v3061_v3 = vadd.f32 %v7580_v18, %v2996_v41 }
 0x5d0   : > { %v2727_v36 = vpop.f32.mrf.mxu1  ;;  %v2968_v0 = vpop.f32.mrf.mxu0  ;;  %v2724_v20 = vadd.f32 %v2723_v35, %v7562_v30 }
 0x5d1   : > { %9032 = vst [vmem:[#allocation18_spill] sm:$0xff] %v7608_v55  ;;  %v7615_v43 = vadd.f32 %v3076_v7, %v7157_v17  ;;  %v3062_v56 = vadd.f32 %v7570_v26, %v2997_v47  ;;  %v2998_v40 = vadd.f32 %v2968_v0, %v2718_v44  ;;  %v3077_v4 = vmax.f32 %v3061_v3, 0.0  ;;  %3608 = vrot.lane.b32.xlu1 %v7601_v48, %s6006_s17  ;;  %v5778_v47 = vld [vmem:[%s8929_s3 + $0x2a0] sm:$0xff]  ;;  %v9042_v3 = vld [vmem:[#allocation21_spill] sm:$0xff] }
 0x5d2   : > { %v2729_v53 = vpop.f32.mrf.mxu1  ;;  %v2972_v5 = vpop.f32.mrf.mxu0  ;;  %v2728_v10 = vadd.f32 %v2727_v36, %v7566_v33  ;;  %v9043_v36 = vld [vmem:[#allocation22_spill] sm:$0xff]  ;;  %v5779_v0 = vld [vmem:[%s8929_s3 + $0x2a8] sm:$0xff] }
 0x5d3   : > { %9033 = vst [vmem:[#allocation11_spill] sm:$0xff] %v7615_v43  ;;  %v3078_v34 = vmax.f32 %v3062_v56, 0.0  ;;  %v3063_v45 = vadd.f32 %v7570_v26, %v2998_v40  ;;  %v2999_v18 = vadd.f32 %v2972_v5, %v2722_v2  ;;  %3610 = vrot.lane.b32.xlu0 %v7608_v55, %s6006_s17  ;;  %v7625_v17 = vadd.f32 %v3077_v4, %v7169_v60  ;;  %v5780_v2 = vld [vmem:[%s8929_s3 + $0x2b0] sm:$0xff]  ;;  %v9044_v40 = vld [vmem:[#allocation23_spill] sm:$0xff]  ;;  %v5819_v5 = vld [vmem:[%s8930_s4 + $0xe8] sm:$0xff] }
 0x5d4   : > { %v2733_v32 = vpop.f32.mrf.mxu1  ;;  %v2974_v19 = vpop.f32.mrf.mxu0  ;;  %v2730_v60 = vadd.f32 %v2729_v53, %v7572_v52  ;;  %v5820_v56 = vld [vmem:[%s8930_s4 + $0xf0] sm:$0xff]  ;;  %v5781_v4 = vld [vmem:[%s8929_s3 + $0x2b8] sm:$0xff]  ;;  %v5818_v53 = vld [vmem:[%s8930_s4 + $0xe0] sm:$0xff] }
 0x5d5   : > { %9034 = vst [vmem:[#allocation13_spill] sm:$0xff] %v7625_v17  ;;  %v7629_v14 = vadd.f32 %v3078_v34, %v7178_v16  ;;  %v3079_v39 = vmax.f32 %v3063_v45, 0.0  ;;  %v3064_v57 = vadd.f32 %v7574_v8, %v2999_v18  ;;  %v3000_v26 = vadd.f32 %v2974_v19, %v2724_v20  ;;  %3361 = vrot.lane.b32.xlu1 %v7608_v55, %s6005_s30  ;;  %v5816_v34 = vld [vmem:[%s8930_s4 + $0xd0] sm:$0xff]  ;;  %v3382_v45 = vpop.permute.xlu0 %3381  ;;  %v3388_v18 = vpop.permute.xlu1 %3387  ;;  %v5817_v20 = vld [vmem:[%s8930_s4 + $0xd8] sm:$0xff]  ;;  %v5815_v19 = vld [vmem:[%s8930_s4 + $0xc8] sm:$0xff] }
 0x5d6   : > { %v2978_v58 = vpop.f32.mrf.mxu0  ;;  %v2735_v33 = vpop.f32.mrf.mxu1  ;;  %v2734_v29 = vadd.f32 %v2733_v32, %v7576_v6  ;;  %v5814_v32 = vld [vmem:[%s8930_s4 + $0xc0] sm:$0xff] }
 0x5d7   : > { %9035 = vst [vmem:[#allocation15_spill] sm:$0xff] %v7629_v14  ;;  %v3080_v51 = vmax.f32 %v3064_v57, 0.0  ;;  %v3001_v50 = vadd.f32 %v2978_v58, %v2728_v10  ;;  %3365 = vrot.lane.b32.xlu0 %v7615_v43, %s6005_s30  ;;  %v7639_v16 = vadd.f32 %v3079_v39, %v7191_v28  ;;  %v3065_v30 = vadd.f32 %v7574_v8, %v3000_v26 }
 0x5d8   : > { %v2980_v15 = vpop.f32.mrf.mxu0  ;;  %v2736_v28 = vadd.f32 %v2735_v33, %v7578_v63 }
 0x5d9   : > { %9036 = vst [vmem:[#allocation17_spill] sm:$0xff] %v7639_v16  ;;  %v7643_v24 = vadd.f32 %v3080_v51, %v7207_v54  ;;  %v3066_v1 = vadd.f32 %v7564_v42, %v3001_v50  ;;  %v3002_v52 = vadd.f32 %v2980_v15, %v2730_v60  ;;  %v3081_v22 = vmax.f32 %v3065_v30, 0.0  ;;  %3614 = vrot.lane.b32.xlu1 %v7615_v43, %s6006_s17  ;;  %v3376_v10 = vpop.permute.xlu0 %3375  ;;  %v3643_v39 = vpop.permute.xlu1 %3642 }
 0x5da   : > { %v2984_v13 = vpop.f32.mrf.mxu0 }
 0x5db   : > { %9037 = vst [vmem:[#allocation19_spill] sm:$0xff] %v7643_v24  ;;  %v3082_v9 = vmax.f32 %v3066_v1, 0.0  ;;  %v3067_v8 = vadd.f32 %v7564_v42, %v3002_v52  ;;  %v3003_v11 = vadd.f32 %v2984_v13, %v2734_v29  ;;  %3616 = vrot.lane.b32.xlu0 %v7625_v17, %s6006_s17  ;;  %v7654_v6 = vadd.f32 %v3081_v22, %v7221_v21 }
 0x5dc   : > { %v2986_v54 = vpop.f32.mrf.mxu0 }
 0x5dd   : > { %9038 = vst [vmem:[#allocation20_spill] sm:$0xff] %v7654_v6  ;;  %v7657_v61 = vadd.f32 %v3082_v9, %v7214_v59  ;;  %v3083_v41 = vmax.f32 %v3067_v8, 0.0  ;;  %v3068_v35 = vadd.f32 %v7568_v38, %v3003_v11  ;;  %v3004_v23 = vadd.f32 %v2986_v54, %v2736_v28  ;;  %3367 = vrot.lane.b32.xlu1 %v7625_v17, %s6005_s30  ;;  %v7800_v57 = vpop.permute.xlu0 %3369  ;;  %v3637_v26 = vpop.permute.xlu1 %3636 }
 0x5df   : > { %9039 = vst [vmem:[#allocation24_spill] sm:$0xff] %v7657_v61  ;;  %v3084_v63 = vmax.f32 %v3068_v35, 0.0  ;;  %v3069_v42 = vadd.f32 %v7568_v38, %v3004_v23  ;;  %v7664_v44 = vadd.f32 %v3083_v41, %v7211_v46  ;;  %3371 = vrot.lane.b32.xlu0 %v7629_v14, %s6005_s30  ;;  %v5776_v46 = vld [vmem:[%s8929_s3 + $0x290] sm:$0xff]  ;;  %v5777_v38 = vld [vmem:[%s8929_s3 + $0x298] sm:$0xff] }
 0x5e1   : > { %9040 = vst [vmem:[#allocation25_spill] sm:$0xff] %v7664_v44  ;;  %v7669_v21 = vadd.f32 %v3084_v63, %v7203_v31  ;;  %v3085_v59 = vmax.f32 %v3069_v42, 0.0  ;;  %3620 = vrot.lane.b32.xlu1 %v7629_v14, %s6006_s17  ;;  %v5775_v31 = vld [vmem:[%s8929_s3 + $0x288] sm:$0xff]  ;;  %v7802_v58 = vpop.permute.xlu0 %3363  ;;  %v3631_v60 = vpop.permute.xlu1 %3630 }
 0x5e3   : > { %9041 = vst [vmem:[#allocation26_spill] sm:$0xff] %v7669_v21  ;;  %v7674_v7 = vadd.f32 %v3085_v59, %v7198_v62  ;;  %3622 = vrot.lane.b32.xlu0 %v7639_v16, %s6006_s17  ;;  %v5774_v62 = vld [vmem:[%s8929_s3 + $0x280] sm:$0xff] }
 0x5e5   : > { %3224 = vmatprep.subr.mxu1 %v7674_v7  ;;  %3373 = vrot.lane.b32.xlu1 %v7639_v16, %s6005_s30  ;;  %v7804_v51 = vpop.permute.xlu0 %3357  ;;  %v7806_v50 = vpop.permute.xlu1 %3624 }
 0x5e6   : > { %3225 = vmatpush1.msra.mxu1 %v7669_v21 }
 0x5e7   : > { %3226 = vmatprep.subr.mxu1 %v7664_v44  ;;  %3377 = vrot.lane.b32.xlu0 %v7643_v24, %s6005_s30 }
 0x5e8   : > { %3227 = vmatpush1.msra.mxu1 %v7657_v61 }
 0x5e9   : > { %3228 = vmatprep.subr.mxu1 %v7654_v6  ;;  %3626 = vrot.lane.b32.xlu1 %v7643_v24, %s6006_s17  ;;  %v7808_v30 = vpop.permute.xlu0 %3351  ;;  %v7810_v33 = vpop.permute.xlu1 %3618 }
 0x5ea   : > { %3229 = vmatpush1.msra.mxu1 %v7643_v24 }
 0x5eb   : > { %3230 = vmatprep.subr.mxu1 %v7639_v16  ;;  %3628 = vrot.lane.b32.xlu0 %v7654_v6, %s6006_s17 }
 0x5ec   : > { %3231 = vmatpush1.msra.mxu1 %v7629_v14 }
 0x5ed   : > { %3232 = vmatprep.subr.mxu1 %v7625_v17  ;;  %3379 = vrot.lane.b32.xlu1 %v7654_v6, %s6005_s30  ;;  %v7814_v29 = vpop.permute.xlu1 %3612 }
 0x5ee   : > { %3233 = vmatpush1.msra.mxu1 %v7615_v43 }
 0x5ef   : > { %3234 = vmatprep.subr.mxu1 %v7608_v55  ;;  %3383 = vrot.lane.b32.xlu0 %v7657_v61, %s6005_s30 }
 0x5f0   : > { %3235 = vmatpush1.msra.mxu1 %v7601_v48 }
 0x5f1   : > { %3236 = vmatprep.subr.mxu1 %v7597_v37  ;;  %3632 = vrot.lane.b32.xlu1 %v7657_v61, %s6006_s17 }
 0x5f2   : > { %3237 = vmatpush1.msra.mxu1 %v7592_v12 }
 0x5f3   : > { %3238 = vmatprep.subr.mxu1 %v7589_v25  ;;  %3634 = vrot.lane.b32.xlu0 %v7664_v44, %s6006_s17 }
 0x5f4   : > { %3239 = vmatpush1.msra.mxu1 %v7583_v27 }
 0x5f5   : > { %5782 = vmatmul.mubr.msk.f32.vlgmr.msra.gmra.mxu1 %vm709_vm2, %v5774_v62  ;;  %3385 = vrot.lane.b32.xlu1 %v7664_v44, %s6005_s30 }
 0x5f6   : > { %3278 = vmatprep.mubr.f32.mxu1 %v9000_v49 }
 0x5f7   : > { %3391 = vrot.lane.b32.xlu0 %v7674_v7, %s6005_s30 }
 0x5f9   : > { %5783 = vmatmul.mubr.msk.f32.gmra.mxu1 %vm709_vm2, %v5775_v31  ;;  %3389 = vrot.lane.b32.xlu1 %v7669_v21, %s6005_s30 }
 0x5fa   : > { %3284 = vmatprep.mubr.f32.mxu1 %v9000_v49 }
 0x5fb   : > { %3640 = vrot.lane.b32.xlu0 %v7674_v7, %s6006_s17 }
 0x5fd   : > { %5784 = vmatmul.mubr.msk.f32.gmra.mxu1 %vm709_vm2, %v5776_v46  ;;  %3638 = vrot.lane.b32.xlu1 %v7669_v21, %s6006_s17 }
 0x5fe   : > { %3290 = vmatprep.mubr.f32.mxu1 %v9000_v49 }
 0x5ff   : > { %3604 = vrot.lane.b32.xlu0 %v7597_v37, %s6006_s17 }
 0x601   : > { %5785 = vmatmul.mubr.msk.f32.gmra.mxu1 %vm709_vm2, %v5777_v38  ;;  %3349 = vrot.lane.b32.xlu1 %v7589_v25, %s6005_s30 }
 0x602   : > { %3296 = vmatprep.mubr.f32.mxu1 %v9000_v49 }
 0x603   : > { %3345 = vrot.lane.b32.xlu0 %v9042_v3, %s6005_s30  ;;  %s6015_s30 = smov 108  }
 0x605   : > { %5786 = vmatmul.mubr.msk.f32.gmra.mxu1 %vm709_vm2, %v5778_v47  ;;  %3606 = vrot.lane.b32.xlu1 %v9043_v36, %s6006_s17 }
 0x606   : > { %3302 = vmatprep.mubr.f32.mxu1 %v9000_v49 }
 0x607   : > { %3598 = vrot.lane.b32.xlu0 %v7589_v25, %s6006_s17 }
 0x609   : > { %5787 = vmatmul.mubr.msk.f32.gmra.mxu1 %vm709_vm2, %v5779_v0  ;;  %3602 = vrot.lane.b32.xlu1 %v7592_v12, %s6006_s17 }
 0x60a   : > { %3308 = vmatprep.mubr.f32.mxu1 %v9000_v49 }
 0x60b   : > { %3596 = vrot.lane.b32.xlu0 %v7583_v27, %s6006_s17  ;;  %v5821_v27 = vld [vmem:[%s8930_s4 + $0xf8] sm:$0xff] }
 0x60d   : > { %5788 = vmatmul.mubr.msk.f32.gmra.mxu1 %vm709_vm2, %v5780_v2  ;;  %3600 = vrot.lane.b32.xlu1 %v9044_v40, %s6006_s17  ;;  %s6008_s17 = smov 123  }
 0x60e   : > { %3314 = vmatprep.mubr.f32.mxu1 %v9000_v49 }
 0x60f   : > { %3871 = vperm.xlu0 %5931, %v5820_v56  }
 0x611   : > { %5789 = vmatmul.mubr.msk.f32.gmra.mxu1 %vm709_vm2, %v5781_v4  ;;  %3876 = vperm.xlu1 %5932, %v5821_v27  }
 0x612   : > { %3765 = vmatprep.mubr.f32.mxu1 %v9000_v49 }
 0x613   : > { %3861 = vperm.xlu0 %5931, %v5818_v53  }
 0x615   : > { %3866 = vperm.xlu1 %5932, %v5819_v5  }
 0x617   : > { %3851 = vperm.xlu0 %5931, %v5816_v34  }
 0x619   : > { %3856 = vperm.xlu1 %5932, %v5817_v20  }
 0x61b   : > { %3841 = vperm.xlu0 %5931, %v5814_v32  }
 0x61d   : > { %3846 = vperm.xlu1 %5932, %v5815_v19  }
 0x639   : > { %v7812_v15 = vpop.permute.xlu0 %3347 }
 0x63d   : > { %v7816_v1 = vpop.permute.xlu0 %3353 }
 0x63f   : > { %v7818_v52 = vpop.permute.xlu1 %3355 }
 0x641   : > { %v7820_v22 = vpop.permute.xlu0 %3359 }
 0x643   : > { %v7822_v13 = vpop.permute.xlu1 %3608 }
 0x645   : > { %v7824_v28 = vpop.permute.xlu0 %3610 }
 0x647   : > { %v3362_v9 = vpop.permute.xlu1 %3361 }
 0x649   : > { %v3366_v8 = vpop.permute.xlu0 %3365 }
 0x64b   : > { %v7826_v11 = vpop.permute.xlu1 %3614 }
 0x64d   : > { %v7828_v54 = vpop.permute.xlu0 %3616 }
 0x64f   : > { %v3368_v41 = vpop.permute.xlu1 %3367 }
 0x651   : > { %v3372_v35 = vpop.permute.xlu0 %3371 }
 0x653   : > { %v3621_v23 = vpop.permute.xlu1 %3620 }
 0x655   : > { %v3623_v63 = vpop.permute.xlu0 %3622 }
 0x657   : > { %v3374_v42 = vpop.permute.xlu1 %3373 }
 0x659   : > { %v3378_v59 = vpop.permute.xlu0 %3377 }
 0x65b   : > { %v3627_v62 = vpop.permute.xlu1 %3626 }
 0x65d   : > { %v3629_v31 = vpop.permute.xlu0 %3628 }
 0x65f   : > { %v3380_v46 = vpop.permute.xlu1 %3379 }
 0x660   : > { %v3405_v19 = vsel %vm3393_vm9, %v3378_v59, %v3380_v46  ;;  %v3656_v46 = vsel %vm3644_vm10, %v3629_v31, %v3631_v60  ;;  %v3653_v60 = vsel %vm3644_vm10, %v3621_v23, %v3623_v63 }
 0x661   : > { %v3384_v38 = vpop.permute.xlu0 %3383 }
 0x662   : > { %v3406_v34 = vsel %vm3393_vm9, %v3382_v45, %v3384_v38 }
 0x663   : > { %v3633_v47 = vpop.permute.xlu1 %3632 }
 0x665   : > { %v3635_v3 = vpop.permute.xlu0 %3634 }
 0x667   : > { %v3386_v36 = vpop.permute.xlu1 %3385 }
 0x668   : > { %v3407_v53 = vsel %vm3393_vm9, %v3384_v38, %v3386_v36  ;;  %v3403_v36 = vsel %vm3393_vm9, %v3372_v35, %v3374_v42  ;;  %v3402_v38 = vsel %vm3393_vm9, %v7800_v57, %v3372_v35  ;;  %v3400_v42 = vsel %vm3393_vm9, %v7802_v58, %v3366_v8 }
 0x669   : > { %v3392_v0 = vpop.permute.xlu0 %3391  ;;  %v3399_v57 = vsel %vm3393_vm9, %v7820_v22, %v3362_v9  ;;  %v3398_v35 = vsel %vm3393_vm9, %v7804_v51, %v7820_v22  ;;  %v3652_v58 = vsel %vm3644_vm10, %v7828_v54, %v7810_v33  ;;  %v3397_v9 = vsel %vm3393_vm9, %v7816_v1, %v7818_v52 }
 0x66a   : > { %v3396_v51 = vsel %vm3393_vm9, %v7808_v30, %v7816_v1  ;;  %v3650_v33 = vsel %vm3644_vm10, %v7824_v28, %v7814_v29  ;;  %v3649_v52 = vsel %vm3644_vm10, %v7822_v13, %v7824_v28  ;;  %v5767_v28 = vld [vmem:[%s8929_s3 + $0x248] sm:$0xff] }
 0x66b   : > { %v3390_v2 = vpop.permute.xlu1 %3389 }
 0x66c   : > { %v3409_v40 = vsel %vm3393_vm9, %v3390_v2, %v3392_v0  ;;  %v3408_v4 = vsel %vm3393_vm9, %v3388_v18, %v3390_v2  ;;  %v3404_v18 = vsel %vm3393_vm9, %v3376_v10, %v3378_v59  ;;  %v3657_v0 = vsel %vm3644_vm10, %v3633_v47, %v3635_v3  ;;  %v5799_v47 = vld [vmem:[%s8929_s3 + $0x2c8] sm:$0xff] }
 0x66d   : > { %v3641_v56 = vpop.permute.xlu0 %3640  ;;  %3466 = vmatprep.subr.mxu0 %v3409_v40  ;;  %v3401_v10 = vsel %vm3393_vm9, %v3366_v8, %v3368_v41  ;;  %v3654_v59 = vsel %vm3644_vm10, %v3623_v63, %v7806_v50  ;;  %v3651_v8 = vsel %vm3644_vm10, %v7826_v11, %v7828_v54  ;;  %v5766_v11 = vld [vmem:[%s8929_s3 + $0x240] sm:$0xff] }
 0x66e   : > { %v3660_v27 = vsel %vm3644_vm10, %v3641_v56, %v3643_v39  ;;  %3467 = vmatpush1.msra.mxu0 %v3408_v4  ;;  %v3658_v39 = vsel %vm3644_vm10, %v3635_v3, %v3637_v26  ;;  %v3655_v26 = vsel %vm3644_vm10, %v3627_v62, %v3629_v31  ;;  %v5798_v63 = vld [vmem:[%s8929_s3 + $0x2c0] sm:$0xff]  ;;  %v5768_v31 = vld [vmem:[%s8929_s3 + $0x250] sm:$0xff]  ;;  %v5769_v3 = vld [vmem:[%s8929_s3 + $0x258] sm:$0xff] }
 0x66f   : > { %3717 = vmatprep.subr.mxu1 %v3660_v27  ;;  %3468 = vmatprep.subr.mxu0 %v3407_v53  ;;  %v3639_v5 = vpop.permute.xlu1 %3638  ;;  %v5770_v40 = vld [vmem:[%s8929_s3 + $0x260] sm:$0xff]  ;;  %v5801_v4 = vld [vmem:[%s8929_s3 + $0x2d8] sm:$0xff]  ;;  %v5771_v27 = vld [vmem:[%s8929_s3 + $0x268] sm:$0xff] }
 0x670   : > { %v3659_v20 = vsel %vm3644_vm10, %v3639_v5, %v3641_v56  ;;  %3469 = vmatpush1.msra.mxu0 %v3406_v34  ;;  %v5800_v56 = vld [vmem:[%s8929_s3 + $0x2d0] sm:$0xff]  ;;  %v5802_v53 = vld [vmem:[%s8929_s3 + $0x2e0] sm:$0xff]  ;;  %v5803_v34 = vld [vmem:[%s8929_s3 + $0x2e8] sm:$0xff] }
 0x671   : > { %v3605_v32 = vpop.permute.xlu0 %3604  ;;  %3470 = vmatprep.subr.mxu0 %v3405_v19  ;;  %3718 = vmatpush1.msra.mxu1 %v3659_v20  ;;  %v5772_v5 = vld [vmem:[%s8929_s3 + $0x270] sm:$0xff]  ;;  %v5773_v20 = vld [vmem:[%s8929_s3 + $0x278] sm:$0xff] }
 0x672   : > { %3471 = vmatpush1.msra.mxu0 %v3404_v18  ;;  %3719 = vmatprep.subr.mxu1 %v3658_v39  ;;  %v5805_v19 = vld [vmem:[%s8929_s3 + $0x2f8] sm:$0xff] }
 0x673   : > { %3472 = vmatprep.subr.mxu0 %v3403_v36  ;;  %3720 = vmatpush1.msra.mxu1 %v3657_v0  ;;  %v3350_v45 = vpop.permute.xlu1 %3349 }
 0x674   : > { %3473 = vmatpush1.msra.mxu0 %v3402_v38  ;;  %3721 = vmatprep.subr.mxu1 %v3656_v46  ;;  %v3395_v22 = vsel %vm3393_vm9, %v7812_v15, %v3350_v45 }
 0x675   : > { %v3346_v2 = vpop.permute.xlu0 %3345  ;;  %3474 = vmatprep.subr.mxu0 %v3401_v10  ;;  %3722 = vmatpush1.msra.mxu1 %v3655_v26 }
 0x676   : > { %3475 = vmatpush1.msra.mxu0 %v3400_v42  ;;  %3723 = vmatprep.subr.mxu1 %v3654_v59  ;;  %v3394_v30 = vsel %vm3393_vm9, %v3346_v2, %v7812_v15  ;;  %vm5208_vm9 = vcmask 474112  }
 0x677   : > { %3476 = vmatprep.subr.mxu0 %v3399_v57  ;;  %3724 = vmatpush1.msra.mxu1 %v3653_v60  ;;  %v3607_v41 = vpop.permute.xlu1 %3606 }
 0x678   : > { %3477 = vmatpush1.msra.mxu0 %v3398_v35  ;;  %3725 = vmatprep.subr.mxu1 %v3652_v58  ;;  %v3648_v29 = vsel %vm3644_vm10, %v3605_v32, %v3607_v41 }
 0x679   : > { %v3599_v50 = vpop.permute.xlu0 %3598  ;;  %3478 = vmatprep.subr.mxu0 %v3397_v9  ;;  %3726 = vmatpush1.msra.mxu1 %v3651_v8 }
 0x67a   : > { %3479 = vmatpush1.msra.mxu0 %v3396_v51  ;;  %3727 = vmatprep.subr.mxu1 %v3650_v33 }
 0x67b   : > { %3480 = vmatprep.subr.mxu0 %v3395_v22  ;;  %3728 = vmatpush1.msra.mxu1 %v3649_v52  ;;  %v3603_v1 = vpop.permute.xlu1 %3602 }
 0x67c   : > { %v3647_v54 = vsel %vm3644_vm10, %v3603_v1, %v3605_v32  ;;  %3481 = vmatpush1.msra.mxu0 %v3394_v30  ;;  %3729 = vmatprep.subr.mxu1 %v3648_v29  ;;  %v5804_v32 = vld [vmem:[%s8929_s3 + $0x2f0] sm:$0xff] }
 0x67d   : > { %5790 = vmatmul.mubr.msk.f32.vlgmr.msra.gmra.mxu0 %vm709_vm2, %v5766_v11  ;;  %3730 = vmatpush1.msra.mxu1 %v3647_v54  ;;  %v3597_v13 = vpop.permute.xlu0 %3596 }
 0x67e   : > { %3520 = vmatprep.mubr.f32.mxu0 %v9000_v49  ;;  %v3645_v62 = vsel %vm3644_vm10, %v3597_v13, %v3599_v50 }
 0x67f   : > { %v3601_v15 = vpop.permute.xlu1 %3600 }
 0x680   : > { %v3646_v23 = vsel %vm3644_vm10, %v3599_v50, %v3601_v15  ;;  %vm4838_vm10 = vcmask 678912  }
 0x681   : > { %5791 = vmatmul.mubr.msk.f32.gmra.mxu0 %vm709_vm2, %v5767_v28  ;;  %3731 = vmatprep.subr.mxu1 %v3646_v23 }
 0x682   : > { %3732 = vmatpush1.msra.mxu1 %v3645_v62  ;;  %3526 = vmatprep.mubr.f32.mxu0 %v9000_v49 }
 0x683   : > { %5806 = vmatmul.mubr.msk.f32.vlgmr.msra.gmra.mxu1 %vm709_vm2, %v5798_v63 }
 0x684   : > { %3771 = vmatprep.mubr.f32.mxu1 %v9000_v49 }
 0x685   : > { %5792 = vmatmul.mubr.msk.f32.gmra.mxu0 %vm709_vm2, %v5768_v31 }
 0x686   : > { %3532 = vmatprep.mubr.f32.mxu0 %v9000_v49 }
 0x687   : > { %5807 = vmatmul.mubr.msk.f32.gmra.mxu1 %vm709_vm2, %v5799_v47 }
 0x688   : > { %3777 = vmatprep.mubr.f32.mxu1 %v9000_v49 }
 0x689   : > { %5793 = vmatmul.mubr.msk.f32.gmra.mxu0 %vm709_vm2, %v5769_v3 }
 0x68a   : > { %3538 = vmatprep.mubr.f32.mxu0 %v9000_v49 }
 0x68b   : > { %5808 = vmatmul.mubr.msk.f32.gmra.mxu1 %vm709_vm2, %v5800_v56 }
 0x68c   : > { %3783 = vmatprep.mubr.f32.mxu1 %v9000_v49 }
 0x68d   : > { %5794 = vmatmul.mubr.msk.f32.gmra.mxu0 %vm709_vm2, %v5770_v40 }
 0x68e   : > { %3544 = vmatprep.mubr.f32.mxu0 %v9000_v49 }
 0x68f   : > { %5809 = vmatmul.mubr.msk.f32.gmra.mxu1 %vm709_vm2, %v5801_v4 }
 0x690   : > { %3789 = vmatprep.mubr.f32.mxu1 %v9000_v49 }
 0x691   : > { %5795 = vmatmul.mubr.msk.f32.gmra.mxu0 %vm709_vm2, %v5771_v27  ;;  %v3877_v27 = vpop.permute.xlu1 %3876 }
 0x692   : > { %3550 = vmatprep.mubr.f32.mxu0 %v9000_v49 }
 0x693   : > { %5810 = vmatmul.mubr.msk.f32.gmra.mxu1 %vm709_vm2, %v5802_v53 }
 0x694   : > { %3795 = vmatprep.mubr.f32.mxu1 %v9000_v49 }
 0x695   : > { %5796 = vmatmul.mubr.msk.f32.gmra.mxu0 %vm709_vm2, %v5772_v5  ;;  %v3867_v55 = vpop.permute.xlu1 %3866 }
 0x696   : > { %3556 = vmatprep.mubr.f32.mxu0 %v9000_v49 }
 0x697   : > { %5811 = vmatmul.mubr.msk.f32.gmra.mxu1 %vm709_vm2, %v5803_v34  ;;  %v3872_v34 = vpop.permute.xlu0 %3871 }
 0x698   : > { %3801 = vmatprep.mubr.f32.mxu1 %v9000_v49 }
 0x699   : > { %5797 = vmatmul.mubr.msk.f32.gmra.mxu0 %vm709_vm2, %v5773_v20 }
 0x69a   : > { %4067 = vmatprep.mubr.f32.mxu0 %v9000_v49 }
 0x69b   : > { %5812 = vmatmul.mubr.msk.f32.gmra.mxu1 %vm709_vm2, %v5804_v32  ;;  %v3862_v44 = vpop.permute.xlu0 %3861 }
 0x69c   : > { %3807 = vmatprep.mubr.f32.mxu1 %v9000_v49 }
 0x69f   : > { %5813 = vmatmul.mubr.msk.f32.gmra.mxu1 %vm709_vm2, %v5805_v19 }
 0x6a0   : > { %4145 = vmatprep.mubr.f32.mxu1 %v9000_v49 }
 0x6b5   : > { %v3274_v18 = vpop.f32.mrf.mxu1 }
 0x6b7   : > { %v3276_v39 = vpop.f32.mrf.mxu1 }
 0x6b9   : > { %v7962_v36 = vpop.f32.mrf.mxu1 }
 0x6bb   : > { %v7964_v0 = vpop.f32.mrf.mxu1 }
 0x6bd   : > { %v7966_v45 = vpop.f32.mrf.mxu1 }
 0x6bf   : > { %v7968_v38 = vpop.f32.mrf.mxu1 }
 0x6c1   : > { %v7970_v46 = vpop.f32.mrf.mxu1 }
 0x6c3   : > { %v3294_v2 = vpop.f32.mrf.mxu1 }
 0x6c5   : > { %v3298_v10 = vpop.f32.mrf.mxu1 }
 0x6c7   : > { %v3300_v26 = vpop.f32.mrf.mxu1 }
 0x6c9   : > { %v3304_v42 = vpop.f32.mrf.mxu1 }
 0x6cb   : > { %v3306_v59 = vpop.f32.mrf.mxu1 }
 0x6cd   : > { %v3310_v57 = vpop.f32.mrf.mxu1 }
 0x6cf   : > { %v3312_v60 = vpop.f32.mrf.mxu1 }
 0x6d1   : > { %v3316_v41 = vpop.f32.mrf.mxu1 }
 0x6d3   : > { %v3318_v50 = vpop.f32.mrf.mxu1 }
 0x73d   : > { %v3516_v35 = vpop.f32.mrf.mxu0 }
 0x73e   : > { %v3517_v43 = vadd.f32 %v3516_v35, %v3274_v18 }
 0x73f   : > { %v3518_v58 = vpop.f32.mrf.mxu0 }
 0x741   : > { %v7972_v9 = vpop.f32.mrf.mxu0 }
 0x743   : > { %v3524_v8 = vpop.f32.mrf.mxu0  ;;  %v7974_v51 = vpop.f32.mrf.mxu1 }
 0x744   : > { %9045 = vst [vmem:[#allocation21_spill] sm:$0xff] %v7974_v51 }
 0x745   : > { %v3528_v33 = vpop.f32.mrf.mxu0  ;;  %v7976_v22 = vpop.f32.mrf.mxu1 }
 0x746   : > { %9046 = vst [vmem:[#allocation22_spill] sm:$0xff] %v7976_v22  ;;  %v3519_v22 = vadd.f32 %v3518_v58, %v3276_v39  ;;  %v3857_v39 = vpop.permute.xlu1 %3856 }
 0x747   : > { %v3530_v52 = vpop.f32.mrf.mxu0  ;;  %v7978_v11 = vpop.f32.mrf.mxu1 }
 0x748   : > { %9047 = vst [vmem:[#allocation23_spill] sm:$0xff] %v7978_v11 }
 0x749   : > { %v3534_v30 = vpop.f32.mrf.mxu0  ;;  %v7980_v1 = vpop.f32.mrf.mxu1 }
 0x74a   : > { %v3535_v18 = vadd.f32 %v3534_v30, %v7970_v46  ;;  %v3523_v46 = vadd.f32 %v7972_v9, %v7962_v36 }
 0x74b   : > { %v3536_v29 = vpop.f32.mrf.mxu0  ;;  %v7982_v54 = vpop.f32.mrf.mxu1 }
 0x74c   : > { %v3537_v21 = vadd.f32 %v3536_v29, %v3294_v2  ;;  %v3529_v2 = vadd.f32 %v3528_v33, %v7966_v45 }
 0x74d   : > { %v3540_v13 = vpop.f32.mrf.mxu0  ;;  %v3781_v28 = vpop.f32.mrf.mxu1  ;;  %v9050_v29 = vld [vmem:[#allocation22_spill] sm:$0xff] }
 0x74e   : > { %v3541_v11 = vadd.f32 %v3540_v13, %v3298_v10  ;;  %v3815_v36 = vadd.f32 %v9050_v29, %v3519_v22  ;;  %v9052_v13 = vld [vmem:[#allocation21_spill] sm:$0xff] }
 0x74f   : > { %v3542_v15 = vpop.f32.mrf.mxu0  ;;  %v3785_v23 = vpop.f32.mrf.mxu1  ;;  %v3945_v29 = vld [vmem:[%s8931_s5 + $0x90] sm:$0xff] }
 0x750   : > { %v3543_v24 = vadd.f32 %v3542_v15, %v3300_v26 }
 0x751   : > { %v3546_v63 = vpop.f32.mrf.mxu0  ;;  %v3787_v62 = vpop.f32.mrf.mxu1 }
 0x752   : > { %v3547_v17 = vadd.f32 %v3546_v63, %v3304_v42  ;;  %v9053_v63 = vld [vmem:[#allocation24_spill] sm:$0xff] }
 0x753   : > { %v3548_v31 = vpop.f32.mrf.mxu0  ;;  %v3791_v47 = vpop.f32.mrf.mxu1 }
 0x754   : > { %v3549_v12 = vadd.f32 %v3548_v31, %v3306_v59  ;;  %v3822_v42 = vadd.f32 %v3791_v47, %v3541_v11  ;;  %v9049_v11 = vld [vmem:[#allocation26_spill] sm:$0xff]  ;;  %v9054_v47 = vld [vmem:[#allocation20_spill] sm:$0xff] }
 0x755   : > { %v3552_v3 = vpop.f32.mrf.mxu0  ;;  %v3793_v56 = vpop.f32.mrf.mxu1 }
 0x756   : > { %v3553_v19 = vadd.f32 %v3552_v3, %v3310_v57  ;;  %v3823_v3 = vadd.f32 %v3793_v56, %v3543_v24 }
 0x757   : > { %v3554_v40 = vpop.f32.mrf.mxu0  ;;  %v3797_v4 = vpop.f32.mrf.mxu1 }
 0x758   : > { %v3555_v32 = vadd.f32 %v3554_v40, %v3312_v60  ;;  %v3824_v60 = vadd.f32 %v3797_v4, %v3547_v17  ;;  %v3820_v17 = vadd.f32 %v3785_v23, %v3535_v18  ;;  %v3888_v26 = vadd.f32 %v3862_v44, %v3823_v3  ;;  %v9057_v3 = vld [vmem:[#allocation15_spill] sm:$0xff] }
 0x759   : > { %v3558_v53 = vpop.f32.mrf.mxu0  ;;  %v3799_v5 = vpop.f32.mrf.mxu1 }
 0x75a   : > { %v3559_v37 = vadd.f32 %v3558_v53, %v3316_v41  ;;  %v3825_v6 = vadd.f32 %v3799_v5, %v3549_v12  ;;  %v3531_v12 = vadd.f32 %v3530_v52, %v7968_v38  ;;  %v3889_v10 = vadd.f32 %v3867_v55, %v3824_v60  ;;  %v9055_v53 = vld [vmem:[#allocation19_spill] sm:$0xff] }
 0x75b   : > { %v3803_v20 = vpop.f32.mrf.mxu1  ;;  %v3560_v49 = vpop.f32.mrf.mxu0  ;;  %v3887_v38 = vadd.f32 %v3862_v44, %v3822_v42  ;;  %v3885_v33 = vadd.f32 %v3857_v39, %v3820_v17  ;;  %v9051_v44 = vld [vmem:[#allocation25_spill] sm:$0xff]  ;;  %v9059_v42 = vld [vmem:[#allocation11_spill] sm:$0xff]  ;;  %v9062_v17 = vld [vmem:[#allocation14_spill] sm:$0xff] }
 0x75c   : > { %v3826_v14 = vadd.f32 %v3803_v20, %v3553_v19  ;;  %v3561_v61 = vadd.f32 %v3560_v49, %v3318_v50  ;;  %v3821_v49 = vadd.f32 %v3787_v62, %v3537_v21  ;;  %v3905_v52 = vmax.f32 %v3889_v10, 0.0 }
 0x75d   : > { %v3805_v25 = vpop.f32.mrf.mxu1  ;;  %v3903_v23 = vmax.f32 %v3887_v38, 0.0  ;;  %v9065_v38 = vmov 0.0  }
 0x75e   : > { %v3827_v48 = vadd.f32 %v3805_v25, %v3555_v32  ;;  %v3525_v25 = vadd.f32 %v3524_v8, %v7964_v0  ;;  %v3891_v35 = vadd.f32 %v3872_v34, %v3826_v14  ;;  %v3852_v0 = vpop.permute.xlu0 %3851  ;;  %v3818_v14 = vadd.f32 %v7982_v54, %v3529_v2  ;;  %v9056_v32 = vld [vmem:[#allocation17_spill] sm:$0xff] }
 0x75f   : > { %v3809_v16 = vpop.f32.mrf.mxu1  ;;  %v3886_v50 = vadd.f32 %v3857_v39, %v3821_v49  ;;  %v3904_v54 = vmax.f32 %v3888_v26, 0.0  ;;  %v8017_v5 = vadd.f32 %v3905_v52, %v9055_v53  ;;  %v9060_v49 = vld [vmem:[#allocation18_spill] sm:$0xff]  ;;  %v9061_v39 = vld [vmem:[#allocation16_spill] sm:$0xff] }
 0x760   : > { %v3828_v51 = vadd.f32 %v3809_v16, %v3559_v37  ;;  %v3892_v40 = vadd.f32 %v3872_v34, %v3827_v48  ;;  %v3890_v37 = vadd.f32 %v3867_v55, %v3825_v6  ;;  %v3819_v48 = vadd.f32 %v3781_v28, %v3531_v12  ;;  %v9048_v55 = vld [vmem:[#allocation23_spill] sm:$0xff]  ;;  %v9064_v26 = vld [vmem:[#allocation10_spill] sm:$0xff]  ;;  %v3944_v52 = vld [vmem:[%s8931_s5 + $0x88] sm:$0xff] }
 0x761   : > { %v3811_v57 = vpop.f32.mrf.mxu1  ;;  %v3907_v21 = vmax.f32 %v3891_v35, 0.0  ;;  %v3817_v6 = vadd.f32 %v7980_v1, %v3525_v25  ;;  %v3814_v28 = vadd.f32 %v9052_v13, %v3517_v43  ;;  %v3883_v15 = vadd.f32 %v3852_v0, %v3818_v14  ;;  %v3927_v14 = vld [vmem:[%s8931_s5] sm:$0xff]  ;;  %v3938_v13 = vld [vmem:[%s8931_s5 + $0x58] sm:$0xff] }
 0x762   : > { %v3893_v59 = vadd.f32 %v3877_v27, %v3828_v51  ;;  %v3829_v41 = vadd.f32 %v3811_v57, %v3561_v61  ;;  %v3908_v61 = vmax.f32 %v3892_v40, 0.0  ;;  %v3906_v8 = vmax.f32 %v3890_v37, 0.0  ;;  %v3842_v4 = vpop.permute.xlu0 %3841 }
 0x763   : > { %v3816_v51 = vadd.f32 %v9048_v55, %v3523_v46  ;;  %v3884_v9 = vadd.f32 %v3852_v0, %v3819_v48  ;;  %v8007_v62 = vadd.f32 %v3907_v21, %v9053_v63  ;;  %v3902_v31 = vmax.f32 %v3886_v50, 0.0  ;;  %v3940_v46 = vld [vmem:[%s8931_s5 + $0x68] sm:$0xff]  ;;  %v3942_v50 = vld [vmem:[%s8931_s5 + $0x78] sm:$0xff]  ;;  %v3943_v55 = vld [vmem:[%s8931_s5 + $0x80] sm:$0xff] }
 0x764   : > { %v3894_v16 = vadd.f32 %v3877_v27, %v3829_v41  ;;  %v3909_v24 = vmax.f32 %v3893_v59, 0.0  ;;  %v8003_v1 = vadd.f32 %v3908_v61, %v9051_v44  ;;  %v8014_v56 = vadd.f32 %v3906_v8, %v9054_v47  ;;  %v9058_v41 = vld [vmem:[#allocation13_spill] sm:$0xff] }
 0x765   : > { %v3901_v27 = vmax.f32 %v3885_v33, 0.0  ;;  %v3880_v34 = vadd.f32 %v3842_v4, %v3815_v36  ;;  %v3900_v20 = vmax.f32 %v3884_v9, 0.0  ;;  %v8024_v19 = vadd.f32 %v3904_v54, %v9056_v32  ;;  %v3928_v21 = vld [vmem:[%s8931_s5 + $0x8] sm:$0xff]  ;;  %v3929_v8 = vld [vmem:[%s8931_s5 + $0x10] sm:$0xff]  ;;  %v3931_v33 = vld [vmem:[%s8931_s5 + $0x20] sm:$0xff] }
 0x766   : > { %v3910_v58 = vmax.f32 %v3894_v16, 0.0  ;;  %v7997_v30 = vadd.f32 %v3909_v24, %v9049_v11  ;;  %v3879_v60 = vadd.f32 %v3842_v4, %v3814_v28  ;;  %v3899_v57 = vmax.f32 %v3883_v15, 0.0  ;;  %v9063_v24 = vld [vmem:[#allocation12_spill] sm:$0xff]  ;;  %v3933_v36 = vld [vmem:[%s8931_s5 + $0x30] sm:$0xff]  ;;  %v3934_v9 = vld [vmem:[%s8931_s5 + $0x38] sm:$0xff] }
 0x767   : > { %v8027_v40 = vadd.f32 %v3903_v23, %v9057_v3  ;;  %v8034_v25 = vadd.f32 %v3902_v31, %v9058_v41  ;;  %v8037_v35 = vadd.f32 %v3901_v27, %v9059_v42  ;;  %v3896_v12 = vmax.f32 %v3880_v34, 0.0  ;;  %v3932_v11 = vld [vmem:[%s8931_s5 + $0x28] sm:$0xff]  ;;  %v3935_v54 = vld [vmem:[%s8931_s5 + $0x40] sm:$0xff] }
 0x768   : > { %v7993_v45 = vadd.f32 %v3910_v58, %v7674_v7  ;;  %v3847_v7 = vpop.permute.xlu1 %3846  ;;  %v8044_v37 = vadd.f32 %v3900_v20, %v9060_v49  ;;  %v3895_v16 = vmax.f32 %v3879_v60, 0.0  ;;  %v8047_v2 = vadd.f32 %v3899_v57, %v9061_v39  ;;  %v5933_v58 = vld [vmem:[#allocation2 + $0xe0] sm:$0xff]  ;;  %v3936_v44 = vld [vmem:[%s8931_s5 + $0x48] sm:$0xff] }
 0x769   : > { %v3882_v22 = vadd.f32 %v3847_v7, %v3817_v6  ;;  %v3881_v43 = vadd.f32 %v3847_v7, %v3816_v51  ;;  %v8064_v61 = vadd.f32 %v3896_v12, %v9064_v26  ;;  %v3941_v6 = vld [vmem:[%s8931_s5 + $0x70] sm:$0xff]  ;;  %v3930_v51 = vld [vmem:[%s8931_s5 + $0x18] sm:$0xff]  ;;  %v3939_v28 = vld [vmem:[%s8931_s5 + $0x60] sm:$0xff] }
 0x76a   : > { %4019 = vmatprep.subr.mxu0 %v7993_v45  ;;  %5845 = vmatprep.subr.mxu1 %v7993_v45  ;;  %v8066_v0 = vadd.f32 %v5933_v58, %v3895_v16  ;;  %v3937_v7 = vld [vmem:[%s8931_s5 + $0x50] sm:$0xff] }
 0x76b   : > { %4020 = vmatpush1.msra.mxu0 %v7997_v30  ;;  %5853 = vmatpush1.msra.mxu1 %v7997_v30  ;;  %v3898_v59 = vmax.f32 %v3882_v22, 0.0  ;;  %v3897_v18 = vmax.f32 %v3881_v43, 0.0 }
 0x76c   : > { %4021 = vmatprep.subr.mxu0 %v8003_v1  ;;  %5846 = vmatprep.subr.mxu1 %v8003_v1 }
 0x76d   : > { %4022 = vmatpush1.msra.mxu0 %v8007_v62  ;;  %5854 = vmatpush1.msra.mxu1 %v8007_v62  ;;  %v8054_v10 = vadd.f32 %v3898_v59, %v9062_v17  ;;  %v8057_v48 = vadd.f32 %v3897_v18, %v9063_v24 }
 0x76e   : > { %4023 = vmatprep.subr.mxu0 %v8014_v56  ;;  %5847 = vmatprep.subr.mxu1 %v8014_v56 }
 0x76f   : > { %4024 = vmatpush1.msra.mxu0 %v8017_v5  ;;  %5855 = vmatpush1.msra.mxu1 %v8017_v5 }
 0x770   : > { %4025 = vmatprep.subr.mxu0 %v8024_v19  ;;  %5848 = vmatprep.subr.mxu1 %v8024_v19 }
 0x771   : > { %4026 = vmatpush1.msra.mxu0 %v8027_v40  ;;  %5856 = vmatpush1.msra.mxu1 %v8027_v40 }
 0x772   : > { %4027 = vmatprep.subr.mxu0 %v8034_v25  ;;  %5849 = vmatprep.subr.mxu1 %v8034_v25 }
 0x773   : > { %4028 = vmatpush1.msra.mxu0 %v8037_v35  ;;  %5857 = vmatpush1.msra.mxu1 %v8037_v35 }
 0x774   : > { %4029 = vmatprep.subr.mxu0 %v8044_v37  ;;  %5850 = vmatprep.subr.mxu1 %v8044_v37 }
 0x775   : > { %4030 = vmatpush1.msra.mxu0 %v8047_v2  ;;  %5858 = vmatpush1.msra.mxu1 %v8047_v2 }
 0x776   : > { %4031 = vmatprep.subr.mxu0 %v8054_v10  ;;  %5851 = vmatprep.subr.mxu1 %v8054_v10 }
 0x777   : > { %4032 = vmatpush1.msra.mxu0 %v8057_v48  ;;  %5859 = vmatpush1.msra.mxu1 %v8057_v48 }
 0x778   : > { %4033 = vmatprep.subr.mxu0 %v8064_v61  ;;  %5852 = vmatprep.subr.mxu1 %v8064_v61 }
 0x779   : > { %4034 = vmatpush1.msra.mxu0 %v8066_v0  ;;  %5860 = vmatpush1.msra.mxu1 %v8066_v0 }
 0x77a   : > { %5835 = vmatmul.mubr.msk.f32.vlgmr.msra.gmra.mxu1 %vm709_vm2, %v3940_v46  ;;  %5822 = vmatmul.mubr.msk.f32.vlgmr.msra.gmra.mxu0 %vm709_vm2, %v3927_v14 }
 0x77b   : > { %4073 = vmatprep.mubr.f32.mxu0 %v9065_v38  ;;  %4151 = vmatprep.mubr.f32.mxu1 %v9065_v38 }
 0x77e   : > { %5823 = vmatmul.mubr.msk.f32.gmra.mxu0 %vm709_vm2, %v3928_v21  ;;  %5836 = vmatmul.mubr.msk.f32.gmra.mxu1 %vm709_vm2, %v3941_v6 }
 0x77f   : > { %4157 = vmatprep.mubr.f32.mxu1 %v9065_v38  ;;  %4079 = vmatprep.mubr.f32.mxu0 %v9065_v38 }
 0x782   : > { %5837 = vmatmul.mubr.msk.f32.gmra.mxu1 %vm709_vm2, %v3942_v50  ;;  %5824 = vmatmul.mubr.msk.f32.gmra.mxu0 %vm709_vm2, %v3929_v8 }
 0x783   : > { %4163 = vmatprep.mubr.f32.mxu1 %v9065_v38  ;;  %4085 = vmatprep.mubr.f32.mxu0 %v9065_v38 }
 0x786   : > { %5838 = vmatmul.mubr.msk.f32.gmra.mxu1 %vm709_vm2, %v3943_v55  ;;  %5825 = vmatmul.mubr.msk.f32.gmra.mxu0 %vm709_vm2, %v3930_v51 }
 0x787   : > { %4091 = vmatprep.mubr.f32.mxu0 %v9065_v38  ;;  %4169 = vmatprep.mubr.f32.mxu1 %v9065_v38 }
 0x78a   : > { %5826 = vmatmul.mubr.msk.f32.gmra.mxu0 %vm709_vm2, %v3931_v33  ;;  %5839 = vmatmul.mubr.msk.f32.gmra.mxu1 %vm709_vm2, %v3944_v52 }
 0x78b   : > { %4097 = vmatprep.mubr.f32.mxu0 %v9065_v38  ;;  %4175 = vmatprep.mubr.f32.mxu1 %v9065_v38 }
 0x78e   : > { %5827 = vmatmul.mubr.msk.f32.gmra.mxu0 %vm709_vm2, %v3932_v11  ;;  %5840 = vmatmul.mubr.msk.f32.gmra.mxu1 %vm709_vm2, %v3945_v29 }
 0x78f   : > { %4103 = vmatprep.mubr.f32.mxu0 %v9065_v38 }
 0x792   : > { %5828 = vmatmul.mubr.msk.f32.gmra.mxu0 %vm709_vm2, %v3933_v36 }
 0x793   : > { %4109 = vmatprep.mubr.f32.mxu0 %v9065_v38 }
 0x796   : > { %5829 = vmatmul.mubr.msk.f32.gmra.mxu0 %vm709_vm2, %v3934_v9 }
 0x797   : > { %4115 = vmatprep.mubr.f32.mxu0 %v9065_v38 }
 0x79a   : > { %5830 = vmatmul.mubr.msk.f32.gmra.mxu0 %vm709_vm2, %v3935_v54 }
 0x79b   : > { %4121 = vmatprep.mubr.f32.mxu0 %v9065_v38 }
 0x79e   : > { %5831 = vmatmul.mubr.msk.f32.gmra.mxu0 %vm709_vm2, %v3936_v44 }
 0x79f   : > { %4127 = vmatprep.mubr.f32.mxu0 %v9065_v38 }
 0x7a2   : > { %5832 = vmatmul.mubr.msk.f32.gmra.mxu0 %vm709_vm2, %v3937_v7 }
 0x7a3   : > { %4133 = vmatprep.mubr.f32.mxu0 %v9065_v38 }
 0x7a6   : > { %5833 = vmatmul.mubr.msk.f32.gmra.mxu0 %vm709_vm2, %v3938_v13 }
 0x7a7   : > { %4139 = vmatprep.mubr.f32.mxu0 %v9065_v38 }
 0x7aa   : > { %5834 = vmatmul.mubr.msk.f32.gmra.mxu0 %vm709_vm2, %v3939_v28  ;;  %vm4770_vm2 = vcmask 719872  }
 0x83a   : > { %v4147_v15 = vpop.f32.mrf.mxu1  ;;  %v4069_v23 = vpop.f32.mrf.mxu0 }
 0x83b   : > { %4208 = vst [vmem:[#allocation3] sm:$0xff] %v4147_v15  ;;  %4182 = vst [vmem:[#allocation3 + $0x80] sm:$0xff] %v4069_v23 }
 0x83c   : > { %v4149_v63 = vpop.f32.mrf.mxu1  ;;  %v4071_v22 = vpop.f32.mrf.mxu0 }
 0x83d   : > { %4209 = vst [vmem:[#allocation3 + $0x108] sm:$0xff] %v4149_v63  ;;  %4183 = vst [vmem:[#allocation3 + $0xc8] sm:$0xff] %v4071_v22 }
 0x83e   : > { %v4075_v31 = vpop.f32.mrf.mxu0  ;;  %v4153_v47 = vpop.f32.mrf.mxu1 }
 0x83f   : > { %4184 = vst [vmem:[#allocation3 + $0xb8] sm:$0xff] %v4075_v31  ;;  %4210 = vst [vmem:[#allocation3 + $0x8] sm:$0xff] %v4153_v47 }
 0x840   : > { %v4077_v4 = vpop.f32.mrf.mxu0  ;;  %v4155_v43 = vpop.f32.mrf.mxu1 }
 0x841   : > { %4185 = vst [vmem:[#allocation3 + $0x70] sm:$0xff] %v4077_v4  ;;  %4211 = vst [vmem:[#allocation3 + $0xe0] sm:$0xff] %v4155_v43 }
 0x842   : > { %v4935_v27 = vld [vmem:[#allocation3] sm:$0x3]  ;;  %v4159_v53 = vpop.f32.mrf.mxu1  ;;  %v4081_v34 = vpop.f32.mrf.mxu0  ;;  %v4950_v60 = vld [vmem:[#allocation3] sm:$0xc]  ;;  %v4965_v49 = vld [vmem:[#allocation3] sm:$0x30] }
 0x843   : > { %v4939_v20 = vrot.slane %v4935_v27, 4  ;;  %4212 = vst [vmem:[#allocation3 + $0x50] sm:$0xff] %v4159_v53  ;;  %4186 = vst [vmem:[#allocation3 + $0x98] sm:$0xff] %v4081_v34  ;;  %v4954_v12 = vrot.slane %v4950_v60, 4  ;;  %v4969_v14 = vrot.slane %v4965_v49, 4 }
 0x844   : > { %v4936_v32 = vld [vmem:[#allocation3 + $0x108] sm:$0x3]  ;;  %v4161_v57 = vpop.f32.mrf.mxu1  ;;  %v4083_v3 = vpop.f32.mrf.mxu0  ;;  %v4951_v41 = vld [vmem:[#allocation3 + $0x108] sm:$0xc]  ;;  %v4966_v24 = vld [vmem:[#allocation3 + $0x108] sm:$0x30] }
 0x845   : > { %4941 = vrot.lane.b32.xlu1 %v4939_v20, %s6007_s12  ;;  %v4940_v59 = vrot.slane %v4936_v32, 4  ;;  %4213 = vst [vmem:[#allocation3 + $0x60] sm:$0xff] %v4161_v57  ;;  %4187 = vst [vmem:[#allocation3 + $0xa8] sm:$0xff] %v4083_v3  ;;  %v4955_v17 = vrot.slane %v4951_v41, 4  ;;  %v4970_v6 = vrot.slane %v4966_v24, 4 }
 0x846   : > { %v4165_v18 = vpop.f32.mrf.mxu1  ;;  %v4087_v42 = vpop.f32.mrf.mxu0  ;;  %v4240_v26 = vld [vmem:[#allocation3 + $0xb8] sm:$0xc]  ;;  %v4256_v33 = vld [vmem:[#allocation3 + $0xb8] sm:$0x30]  ;;  %v4271_v44 = vld [vmem:[#allocation3 + $0xb8] sm:$0xc0] }
 0x847   : > { %4943 = vrot.lane.b32.xlu0 %v4940_v59, %s6007_s12  ;;  %4214 = vst [vmem:[#allocation3 + $0x20] sm:$0xff] %v4165_v18  ;;  %4188 = vst [vmem:[#allocation3 + $0x120] sm:$0xff] %v4087_v42  ;;  %v4244_v50 = vrot.slane %v4240_v26, 2  ;;  %v4260_v9 = vrot.slane %v4256_v33, 2  ;;  %v4996_v28 = vld [vmem:[#allocation3 + $0x8] sm:$0x3] }
 0x848   : > { %v4167_v16 = vpop.f32.mrf.mxu1  ;;  %v4089_v39 = vpop.f32.mrf.mxu0  ;;  %v4241_v8 = vld [vmem:[#allocation3 + $0x70] sm:$0xc]  ;;  %v4257_v36 = vld [vmem:[#allocation3 + $0x70] sm:$0x30]  ;;  %v4272_v13 = vld [vmem:[#allocation3 + $0x70] sm:$0xc0] }
 0x849   : > { %4956 = vrot.lane.b32.xlu1 %v4954_v12, %s6007_s12  ;;  %4215 = vst [vmem:[#allocation3 + $0x18] sm:$0xff] %v4167_v16  ;;  %4189 = vst [vmem:[#allocation3 + $0xd0] sm:$0xff] %v4089_v39  ;;  %v4245_v29 = vrot.slane %v4241_v8, 2  ;;  %v4261_v7 = vrot.slane %v4257_v36, 2  ;;  %v4275_v23 = vrot.slane %v4271_v44, 2  ;;  %v4276_v63 = vrot.slane %v4272_v13, 2 }
 0x84a   : > { %v4093_v58 = vpop.f32.mrf.mxu0  ;;  %v4171_v46 = vpop.f32.mrf.mxu1  ;;  %v5000_v22 = vrot.slane %v4996_v28, 6  ;;  %v4997_v31 = vld [vmem:[#allocation3 + $0xe0] sm:$0x3]  ;;  %v5011_v47 = vld [vmem:[#allocation3 + $0x8] sm:$0xc] }
 0x84b   : > { %4958 = vrot.lane.b32.xlu0 %v4955_v17, %s6007_s12  ;;  %4190 = vst [vmem:[#allocation3 + $0xf0] sm:$0xff] %v4093_v58  ;;  %4216 = vst [vmem:[#allocation3 + $0xb0] sm:$0xff] %v4171_v46  ;;  %v5001_v4 = vrot.slane %v4997_v31, 6  ;;  %v5012_v43 = vld [vmem:[#allocation3 + $0xe0] sm:$0xc]  ;;  %v5015_v27 = vrot.slane %v5011_v47, 6 }
 0x84c   : > { %v4095_v38 = vpop.f32.mrf.mxu0  ;;  %v4173_v21 = vpop.f32.mrf.mxu1  ;;  %v5026_v53 = vld [vmem:[#allocation3 + $0x8] sm:$0x30]  ;;  %v5016_v34 = vrot.slane %v5012_v43, 6  ;;  %v5027_v20 = vld [vmem:[#allocation3 + $0xe0] sm:$0x30] }
 0x84d   : > { %4971 = vrot.lane.b32.xlu1 %v4969_v14, %s6007_s12  ;;  %4191 = vst [vmem:[#allocation3 + $0x100] sm:$0xff] %v4095_v38  ;;  %4217 = vst [vmem:[#allocation3 + $0x28] sm:$0xff] %v4173_v21  ;;  %v5030_v60 = vrot.slane %v5026_v53, 6  ;;  %v5041_v57 = vld [vmem:[#allocation3 + $0x8] sm:$0xc0]  ;;  %v5031_v59 = vrot.slane %v5027_v20, 6 }
 0x84e   : > { %v4099_v55 = vpop.f32.mrf.mxu0  ;;  %v4177_v51 = vpop.f32.mrf.mxu1  ;;  %v5042_v41 = vld [vmem:[#allocation3 + $0xe0] sm:$0xc0]  ;;  %v5045_v18 = vrot.slane %v5041_v57, 6  ;;  %v5070_v12 = vld [vmem:[#allocation3 + $0x50] sm:$0xc] }
 0x84f   : > { %4973 = vrot.lane.b32.xlu0 %v4970_v6, %s6007_s12  ;;  %4192 = vst [vmem:[#allocation3 + $0xf8] sm:$0xff] %v4099_v55  ;;  %4218 = vst [vmem:[#allocation3 + $0x90] sm:$0xff] %v4177_v51  ;;  %v5046_v42 = vrot.slane %v5042_v41, 6  ;;  %v5071_v49 = vld [vmem:[#allocation3 + $0x60] sm:$0xc] }
 0x850   : > { %v4101_v52 = vpop.f32.mrf.mxu0  ;;  %v4179_v11 = vpop.f32.mrf.mxu1  ;;  %v5083_v16 = vld [vmem:[#allocation3 + $0x50] sm:$0x30]  ;;  %v5084_v39 = vld [vmem:[#allocation3 + $0x60] sm:$0x30]  ;;  %v4286_v17 = vld [vmem:[#allocation3 + $0x98] sm:$0x3] }
 0x851   : > { %4246 = vrot.lane.b32.xlu1 %v4244_v50, %s6008_s17  ;;  %4193 = vst [vmem:[#allocation3 + $0x38] sm:$0xff] %v4101_v52  ;;  %4219 = vst [vmem:[#allocation3 + $0xa0] sm:$0xff] %v4179_v11  ;;  %v5096_v26 = vld [vmem:[#allocation3 + $0x50] sm:$0xc0]  ;;  %v4290_v58 = vrot.slane %v4286_v17, 2 }
 0x852   : > { %v4105_v54 = vpop.f32.mrf.mxu0  ;;  %v5097_v14 = vld [vmem:[#allocation3 + $0x60] sm:$0xc0]  ;;  %v4287_v38 = vld [vmem:[#allocation3 + $0xa8] sm:$0x3]  ;;  %v4301_v21 = vld [vmem:[#allocation3 + $0x98] sm:$0xc] }
 0x853   : > { %4248 = vrot.lane.b32.xlu0 %v4245_v29, %s6008_s17  ;;  %4194 = vst [vmem:[#allocation3 + $0x68] sm:$0xff] %v4105_v54  ;;  %v4291_v6 = vrot.slane %v4287_v38, 2  ;;  %v4302_v50 = vld [vmem:[#allocation3 + $0xa8] sm:$0xc]  ;;  %v4305_v8 = vrot.slane %v4301_v21, 2 }
 0x854   : > { %v4107_v15 = vpop.f32.mrf.mxu0  ;;  %v4316_v55 = vld [vmem:[#allocation3 + $0x98] sm:$0x30]  ;;  %v4306_v51 = vrot.slane %v4302_v50, 2  ;;  %v4317_v33 = vld [vmem:[#allocation3 + $0xa8] sm:$0x30] }
 0x855   : > { %4262 = vrot.lane.b32.xlu1 %v4260_v9, %s6008_s17  ;;  %4195 = vst [vmem:[#allocation3 + $0x58] sm:$0xff] %v4107_v15  ;;  %v4320_v52 = vrot.slane %v4316_v55, 4  ;;  %v4332_v11 = vld [vmem:[#allocation3 + $0x98] sm:$0xc0]  ;;  %v4321_v29 = vrot.slane %v4317_v33, 4 }
 0x856   : > { %v4111_v32 = vpop.f32.mrf.mxu0  ;;  %v4333_v36 = vld [vmem:[#allocation3 + $0xa8] sm:$0xc0]  ;;  %v4336_v9 = vrot.slane %v4332_v11, 4  ;;  %v5109_v13 = vld [vmem:[#allocation3 + $0x20] sm:$0x3] }
 0x857   : > { %4264 = vrot.lane.b32.xlu0 %v4261_v7, %s6008_s17  ;;  %4196 = vst [vmem:[#allocation3 + $0x88] sm:$0xff] %v4111_v32  ;;  %v4337_v44 = vrot.slane %v4333_v36, 4  ;;  %v4347_v28 = vld [vmem:[#allocation3 + $0x120] sm:$0x3]  ;;  %v4363_v47 = vld [vmem:[#allocation3 + $0xd0] sm:$0xc] }
 0x858   : > { %v4113_v3 = vpop.f32.mrf.mxu0  ;;  %v4351_v15 = vrot.slane %v4347_v28, 4  ;;  %v4377_v43 = vld [vmem:[#allocation3 + $0x120] sm:$0x30]  ;;  %v4378_v53 = vld [vmem:[#allocation3 + $0xd0] sm:$0x30] }
 0x859   : > { %4277 = vrot.lane.b32.xlu1 %v4275_v23, %s6008_s17  ;;  %4197 = vst [vmem:[#allocation3 + $0x48] sm:$0xff] %v4113_v3  ;;  %v5110_v23 = vld [vmem:[#allocation3 + $0x18] sm:$0x3]  ;;  %v4392_v32 = vld [vmem:[#allocation3 + $0x120] sm:$0xc0] }
 0x85a   : > { %v4117_v24 = vpop.f32.mrf.mxu0  ;;  %v4393_v57 = vld [vmem:[#allocation3 + $0xd0] sm:$0xc0]  ;;  %v5138_v41 = vld [vmem:[#allocation3 + $0x20] sm:$0x30]  ;;  %v4408_v17 = vld [vmem:[#allocation3 + $0xf0] sm:$0x3] }
 0x85b   : > { %4279 = vrot.lane.b32.xlu0 %v4276_v63, %s6008_s17  ;;  %4198 = vst [vmem:[#allocation3 + $0x10] sm:$0xff] %v4117_v24  ;;  %v4348_v63 = vld [vmem:[#allocation3 + $0xd0] sm:$0x3]  ;;  %v4423_v38 = vld [vmem:[#allocation3 + $0xf0] sm:$0xc] }
 0x85c   : > { %v4119_v46 = vpop.f32.mrf.mxu0  ;;  %v4352_v31 = vrot.slane %v4348_v63, 4  ;;  %v4427_v50 = vrot.slane %v4423_v38, 6  ;;  %v4438_v55 = vld [vmem:[#allocation3 + $0xf0] sm:$0x30]  ;;  %v4439_v33 = vld [vmem:[#allocation3 + $0x100] sm:$0x30] }
 0x85d   : > { %5002 = vrot.lane.b32.xlu1 %v5000_v22, %s6009_s19  ;;  %4199 = vst [vmem:[#allocation3 + $0x40] sm:$0xff] %v4119_v46  ;;  %v4362_v22 = vld [vmem:[#allocation3 + $0x120] sm:$0xc]  ;;  %v4409_v46 = vld [vmem:[#allocation3 + $0x100] sm:$0x3] }
 0x85e   : > { %v4123_v54 = vpop.f32.mrf.mxu0  ;;  %v4413_v21 = vrot.slane %v4409_v46, 6  ;;  %v4453_v11 = vld [vmem:[#allocation3 + $0xf0] sm:$0xc0]  ;;  %v4454_v36 = vld [vmem:[#allocation3 + $0x100] sm:$0xc0] }
 0x85f   : > { %5004 = vrot.lane.b32.xlu0 %v5001_v4, %s6009_s19  ;;  %4200 = vst [vmem:[#allocation3 + $0xe8] sm:$0xff] %v4123_v54  ;;  %v4366_v4 = vrot.slane %v4362_v22, 4  ;;  %v4457_v54 = vrot.slane %v4453_v11, 6  ;;  %v5169_v22 = vld [vmem:[#allocation3 + $0x28] sm:$0x3] }
 0x860   : > { %v4125_v7 = vpop.f32.mrf.mxu0  ;;  %v4508_v46 = vld [vmem:[#allocation3 + $0xf8] sm:$0xc0] }
 0x861   : > { %5017 = vrot.lane.b32.xlu1 %v5015_v27, %s6009_s19  ;;  %4201 = vst [vmem:[#allocation3 + $0xc0] sm:$0xff] %v4125_v7  ;;  %v4367_v27 = vrot.slane %v4363_v47, 4 }
 0x862   : > { %v4129_v20 = vpop.f32.mrf.mxu0 }
 0x863   : > { %5019 = vrot.lane.b32.xlu0 %v5016_v34, %s6009_s19  ;;  %v4381_v34 = vrot.slane %v4377_v43, 4  ;;  %4202 = vst [vmem:[#allocation3 + $0xd8] sm:$0xff] %v4129_v20 }
 0x864   : > { %v4131_v3 = vpop.f32.mrf.mxu0 }
 0x865   : > { %5032 = vrot.lane.b32.xlu1 %v5030_v60, %s6009_s19  ;;  %v4382_v60 = vrot.slane %v4378_v53, 4  ;;  %4203 = vst [vmem:[#allocation3 + $0x128] sm:$0xff] %v4131_v3  ;;  %v5184_v53 = vld [vmem:[#allocation3 + $0x28] sm:$0xc] }
 0x867   : > { %5034 = vrot.lane.b32.xlu0 %v5031_v59, %s6009_s19  ;;  %v4396_v59 = vrot.slane %v4392_v32, 6 }
 0x869   : > { %5047 = vrot.lane.b32.xlu1 %v5045_v18, %s6009_s19  ;;  %v4397_v18 = vrot.slane %v4393_v57, 6  ;;  %v4468_v57 = vld [vmem:[#allocation3 + $0xf8] sm:$0x3] }
 0x86b   : > { %5049 = vrot.lane.b32.xlu0 %v5046_v42, %s6009_s19  ;;  %v5139_v42 = vld [vmem:[#allocation3 + $0x18] sm:$0x30] }
 0x86d   : > { %5074 = vrot.lane.b32.xlu1 %v5070_v12, %s6010_s11  ;;  %v5142_v12 = vrot.slane %v5138_v41, 2  ;;  %v4469_v41 = vld [vmem:[#allocation3 + $0x38] sm:$0x3] }
 0x86f   : > { %5076 = vrot.lane.b32.xlu0 %v5071_v49, %s6010_s11  ;;  %v5153_v49 = vld [vmem:[#allocation3 + $0x20] sm:$0xc0] }
 0x870   : > { %v5157_v24 = vrot.slane %v5153_v49, 2  ;;  %v4483_v49 = vld [vmem:[#allocation3 + $0x38] sm:$0xc] }
 0x871   : > { %5087 = vrot.lane.b32.xlu1 %v5083_v16, %s6010_s11  ;;  %v5143_v16 = vrot.slane %v5139_v42, 2  ;;  %v4482_v42 = vld [vmem:[#allocation3 + $0xf8] sm:$0xc] }
 0x873   : > { %5089 = vrot.lane.b32.xlu0 %v5084_v39, %s6010_s11  ;;  %v5154_v39 = vld [vmem:[#allocation3 + $0x18] sm:$0xc0] }
 0x875   : > { %5100 = vrot.lane.b32.xlu1 %v5096_v26, %s6010_s11  ;;  %v5158_v26 = vrot.slane %v5154_v39, 2  ;;  %v4495_v39 = vld [vmem:[#allocation3 + $0xf8] sm:$0x30] }
 0x877   : > { %5102 = vrot.lane.b32.xlu0 %v5097_v14, %s6010_s11  ;;  %v4135_v14 = vpop.f32.mrf.mxu0 }
 0x878   : > { %4204 = vst [vmem:[#allocation3 + $0x118] sm:$0xff] %v4135_v14 }
 0x879   : > { %4292 = vrot.lane.b32.xlu1 %v4290_v58, %s6008_s17  ;;  %v4412_v58 = vrot.slane %v4408_v17, 6 }
 0x87b   : > { %4294 = vrot.lane.b32.xlu0 %v4291_v6, %s6008_s17  ;;  %v4424_v6 = vld [vmem:[#allocation3 + $0x100] sm:$0xc] }
 0x87d   : > { %4307 = vrot.lane.b32.xlu1 %v4305_v8, %s6008_s17  ;;  %v4137_v8 = vpop.f32.mrf.mxu0 }
 0x87e   : > { %4205 = vst [vmem:[#allocation3 + $0x78] sm:$0xff] %v4137_v8  ;;  %v5244_v8 = vld [vmem:[#allocation3 + $0x90] sm:$0xc] }
 0x87f   : > { %4309 = vrot.lane.b32.xlu0 %v4306_v51, %s6008_s17  ;;  %v4428_v51 = vrot.slane %v4424_v6, 6  ;;  %v4141_v28 = vpop.f32.mrf.mxu0  ;;  %v5230_v6 = vld [vmem:[#allocation3 + $0xa0] sm:$0x3]  ;;  %v5248_v11 = vrot.slane %v5244_v8, 4  ;;  %s6016_s17 = smov 103  }
 0x880   : > { %4206 = vst [vmem:[#allocation3 + $0x30] sm:$0xff] %v4141_v28 }
 0x881   : > { %4322 = vrot.lane.b32.xlu1 %v4320_v52, %s6011_s23  ;;  %v4442_v52 = vrot.slane %v4438_v55, 6 }
 0x883   : > { %4324 = vrot.lane.b32.xlu0 %v4321_v29, %s6011_s23  ;;  %v4443_v29 = vrot.slane %v4439_v33, 6  ;;  %v5245_v33 = vld [vmem:[#allocation3 + $0xa0] sm:$0xc] }
 0x885   : > { %4338 = vrot.lane.b32.xlu1 %v4336_v9, %s6011_s23  ;;  %v5214_v9 = vld [vmem:[#allocation3 + $0xb0] sm:$0xc0] }
 0x886   : > { %v5218_v7 = vrot.slane %v5214_v9, 4  ;;  %v5249_v9 = vrot.slane %v5245_v33, 4 }
 0x887   : > { %4340 = vrot.lane.b32.xlu0 %v4337_v44, %s6011_s23  ;;  %v4458_v44 = vrot.slane %v4454_v36, 6 }
 0x889   : > { %5113 = vrot.lane.b32.xlu1 %v5109_v13, %s6010_s11  ;;  %v5215_v13 = vld [vmem:[#allocation3 + $0x28] sm:$0xc0] }
 0x88a   : > { %v5219_v63 = vrot.slane %v5215_v13, 4 }
 0x88b   : > { %5115 = vrot.lane.b32.xlu0 %v5110_v23, %s6010_s11  ;;  %v4143_v23 = vpop.f32.mrf.mxu0 }
 0x88c   : > { %4207 = vst [vmem:[#allocation3 + $0x110] sm:$0xff] %v4143_v23 }
 0x88d   : > { %4353 = vrot.lane.b32.xlu1 %v4351_v15, %s6011_s23  ;;  %v5168_v15 = vld [vmem:[#allocation3 + $0xb0] sm:$0x3] }
 0x88e   : > { %v5172_v47 = vrot.slane %v5168_v15, 2  ;;  %v4521_v15 = vld [vmem:[#allocation3 + $0x68] sm:$0x3] }
 0x88f   : > { %4355 = vrot.lane.b32.xlu0 %v4352_v31, %s6011_s23 }
 0x891   : > { %4368 = vrot.lane.b32.xlu1 %v4366_v4, %s6011_s23  ;;  %v5183_v4 = vld [vmem:[#allocation3 + $0xb0] sm:$0xc] }
 0x892   : > { %v5187_v20 = vrot.slane %v5183_v4, 2  ;;  %v4535_v4 = vld [vmem:[#allocation3 + $0x58] sm:$0xc] }
 0x893   : > { %4370 = vrot.lane.b32.xlu0 %v4367_v27, %s6011_s23  ;;  %v5173_v27 = vrot.slane %v5169_v22, 2 }
 0x895   : > { %4383 = vrot.lane.b32.xlu1 %v4381_v34, %s6011_s23 }
 0x897   : > { %4385 = vrot.lane.b32.xlu0 %v4382_v60, %s6011_s23  ;;  %v5188_v60 = vrot.slane %v5184_v53, 2  ;;  %s6017_s23 = smov 98  }
 0x899   : > { %4398 = vrot.lane.b32.xlu1 %v4396_v59, %s6012_s14 }
 0x89b   : > { %4400 = vrot.lane.b32.xlu0 %v4397_v18, %s6012_s14 }
 0x89d   : > { %5144 = vrot.lane.b32.xlu1 %v5142_v12, %s6013_s22 }
 0x89f   : > { %5146 = vrot.lane.b32.xlu0 %v5143_v16, %s6013_s22 }
 0x8a1   : > { %5159 = vrot.lane.b32.xlu1 %v5157_v24, %s6013_s22  ;;  %v4496_v24 = vld [vmem:[#allocation3 + $0x38] sm:$0x30] }
 0x8a3   : > { %5161 = vrot.lane.b32.xlu0 %v5158_v26, %s6013_s22  ;;  %v5229_v26 = vld [vmem:[#allocation3 + $0x90] sm:$0x3] }
 0x8a4   : > { %v5233_v38 = vrot.slane %v5229_v26, 4 }
 0x8a5   : > { %4414 = vrot.lane.b32.xlu1 %v4412_v58, %s6012_s14 }
 0x8a7   : > { %4416 = vrot.lane.b32.xlu0 %v4413_v21, %s6012_s14  ;;  %v4509_v21 = vld [vmem:[#allocation3 + $0x38] sm:$0xc0] }
 0x8a9   : > { %4429 = vrot.lane.b32.xlu1 %v4427_v50, %s6012_s14 }
 0x8ab   : > { %4431 = vrot.lane.b32.xlu0 %v4428_v51, %s6012_s14  ;;  %v5234_v51 = vrot.slane %v5230_v6, 4 }
 0x8ad   : > { %4444 = vrot.lane.b32.xlu1 %v4442_v52, %s6012_s14 }
 0x8af   : > { %4446 = vrot.lane.b32.xlu0 %v4443_v29, %s6012_s14  ;;  %v5259_v29 = vld [vmem:[#allocation3 + $0x90] sm:$0x30] }
 0x8b1   : > { %4459 = vrot.lane.b32.xlu1 %v4457_v54, %s6012_s14  ;;  %v5260_v54 = vld [vmem:[#allocation3 + $0xa0] sm:$0x30] }
 0x8b2   : > { %v5264_v28 = vrot.slane %v5260_v54, 4 }
 0x8b3   : > { %4461 = vrot.lane.b32.xlu0 %v4458_v44, %s6012_s14  ;;  %s6018_s14 = smov 93  }
 0x8b5   : > { %5220 = vrot.lane.b32.xlu1 %v5218_v7, %s6014_s26  ;;  %v5263_v7 = vrot.slane %v5259_v29, 4 }
 0x8b7   : > { %v8224_v31 = vpop.permute.xlu1 %4941  ;;  %5222 = vrot.lane.b32.xlu0 %v5219_v63, %s6014_s26  ;;  %v4534_v63 = vld [vmem:[#allocation3 + $0x68] sm:$0xc] }
 0x8b8   : > { %v4538_v53 = vrot.slane %v4534_v63, 2 }
 0x8b9   : > { %v8227_v43 = vpop.permute.xlu0 %4943  ;;  %5174 = vrot.lane.b32.xlu1 %v5172_v47, %s6013_s22  ;;  %v4522_v47 = vld [vmem:[#allocation3 + $0x58] sm:$0x3] }
 0x8bb   : > { %v8230_v34 = vpop.permute.xlu1 %4956  ;;  %5176 = vrot.lane.b32.xlu0 %v5173_v27, %s6013_s22 }
 0x8bd   : > { %v8233_v32 = vpop.permute.xlu0 %4958  ;;  %5189 = vrot.lane.b32.xlu1 %v5187_v20, %s6013_s22  ;;  %v4550_v20 = vld [vmem:[#allocation3 + $0x68] sm:$0x30] }
 0x8be   : > { %9066 = vst [vmem:[#allocation23_spill] sm:$0xff] %v8233_v32 }
 0x8bf   : > { %v8236_v3 = vpop.permute.xlu1 %4971  ;;  %5191 = vrot.lane.b32.xlu0 %v5188_v60, %s6013_s22 }
 0x8c0   : > { %9067 = vst [vmem:[#allocation26_spill] sm:$0xff] %v8236_v3 }
 0x8c1   : > { %v8239_v59 = vpop.permute.xlu0 %4973  ;;  %4472 = vrot.lane.b32.xlu1 %v4468_v57, %s6015_s30  ;;  %v4539_v57 = vrot.slane %v4535_v4, 2 }
 0x8c2   : > { %9068 = vst [vmem:[#allocation22_spill] sm:$0xff] %v8239_v59  ;;  %v4733_v59 = vld [vmem:[#allocation3 + $0xc0] sm:$0x30] }
 0x8c3   : > { %v8242_v18 = vpop.permute.xlu1 %4246  ;;  %4474 = vrot.lane.b32.xlu0 %v4469_v41, %s6015_s30  ;;  %v4551_v41 = vld [vmem:[#allocation3 + $0x58] sm:$0x30] }
 0x8c4   : > { %v4555_v26 = vrot.slane %v4551_v41, 2 }
 0x8c5   : > { %v8245_v12 = vpop.permute.xlu0 %4248  ;;  %4486 = vrot.lane.b32.xlu1 %v4482_v42, %s6015_s30 }
 0x8c7   : > { %v8248_v16 = vpop.permute.xlu1 %4262  ;;  %4488 = vrot.lane.b32.xlu0 %v4483_v49, %s6015_s30  ;;  %v4554_v49 = vrot.slane %v4550_v20, 2  ;;  %v4251_v20 = vsel %vm4250_vm11, %v8242_v18, %v8245_v12  ;;  %v4641_v18 = vld [vmem:[#allocation3 + $0x10] sm:$0x3] }
 0x8c9   : > { %v8251_v17 = vpop.permute.xlu0 %4264  ;;  %4499 = vrot.lane.b32.xlu1 %v4495_v39, %s6015_s30  ;;  %v4565_v39 = vld [vmem:[#allocation3 + $0x68] sm:$0xc0] }
 0x8ca   : > { %v4569_v6 = vrot.slane %v4565_v39, 2  ;;  %v4220_v39 = vld [vmem:[#allocation3 + $0x80] sm:$0x3] }
 0x8cb   : > { %v8254_v58 = vpop.permute.xlu1 %4277  ;;  %4501 = vrot.lane.b32.xlu0 %v4496_v24, %s6015_s30 }
 0x8cd   : > { %v8257_v14 = vpop.permute.xlu0 %4279  ;;  %4512 = vrot.lane.b32.xlu1 %v4508_v46, %s6015_s30  ;;  %v4566_v46 = vld [vmem:[#allocation3 + $0x58] sm:$0xc0] }
 0x8cf   : > { %v8260_v50 = vpop.permute.xlu1 %5002  ;;  %4514 = vrot.lane.b32.xlu0 %v4509_v21, %s6015_s30 }
 0x8d1   : > { %v8263_v55 = vpop.permute.xlu0 %5004  ;;  %5235 = vrot.lane.b32.xlu1 %v5233_v38, %s6014_s26  ;;  %v4580_v38 = vld [vmem:[#allocation3 + $0x88] sm:$0x3] }
 0x8d2   : > { %9069 = vst [vmem:[#allocation25_spill] sm:$0xff] %v8263_v55  ;;  %v4584_v33 = vrot.slane %v4580_v38, 2 }
 0x8d3   : > { %v8266_v52 = vpop.permute.xlu1 %5017  ;;  %5237 = vrot.lane.b32.xlu0 %v5234_v51, %s6014_s26  ;;  %v4570_v51 = vrot.slane %v4566_v46, 2  ;;  %v4254_v46 = vadd.f32 %v4251_v20, %v4220_v39  ;;  %v4657_v39 = vld [vmem:[#allocation3 + $0x40] sm:$0xc] }
 0x8d5   : > { %v8269_v36 = vpop.permute.xlu0 %5019  ;;  %5250 = vrot.lane.b32.xlu1 %v5248_v11, %s6014_s26  ;;  %v4581_v11 = vld [vmem:[#allocation3 + $0x48] sm:$0x3] }
 0x8d7   : > { %v8272_v44 = vpop.permute.xlu1 %5032  ;;  %5252 = vrot.lane.b32.xlu0 %v5249_v9, %s6014_s26  ;;  %v4595_v9 = vld [vmem:[#allocation3 + $0x88] sm:$0xc] }
 0x8d8   : > { %9070 = vst [vmem:[#allocation21_spill] sm:$0xff] %v8272_v44  ;;  %v4599_v63 = vrot.slane %v4595_v9, 2 }
 0x8d9   : > { %v8275_v13 = vpop.permute.xlu0 %5034  ;;  %5265 = vrot.lane.b32.xlu1 %v5263_v7, %s6014_s26  ;;  %v4585_v7 = vrot.slane %v4581_v11, 2 }
 0x8da   : > { %9071 = vst [vmem:[#allocation24_spill] sm:$0xff] %v8275_v13 }
 0x8db   : > { %v8278_v23 = vpop.permute.xlu1 %5047  ;;  %5267 = vrot.lane.b32.xlu0 %v5264_v28, %s6014_s26  ;;  %v4596_v28 = vld [vmem:[#allocation3 + $0x48] sm:$0xc] }
 0x8dc   : > { %9072 = vst [vmem:[#allocation20_spill] sm:$0xff] %v8278_v23  ;;  %v4703_v23 = vld [vmem:[#allocation3 + $0xc0] sm:$0x3] }
 0x8dd   : > { %v8281_v22 = vpop.permute.xlu0 %5049  ;;  %4525 = vrot.lane.b32.xlu1 %v4521_v15, %s6015_s30 }
 0x8de   : > { %9073 = vst [vmem:[#allocation19_spill] sm:$0xff] %v8281_v22 }
 0x8df   : > { %v8284_v27 = vpop.permute.xlu1 %5074  ;;  %4527 = vrot.lane.b32.xlu0 %v4522_v47, %s6015_s30  ;;  %v4610_v47 = vld [vmem:[#allocation3 + $0x88] sm:$0x30]  ;;  %s6019_s30 = smov 88  }
 0x8e0   : > { %9074 = vst [vmem:[#allocation17_spill] sm:$0xff] %v8284_v27 }
 0x8e1   : > { %v8287_v60 = vpop.permute.xlu0 %5076  ;;  %4540 = vrot.lane.b32.xlu1 %v4538_v53, %s6016_s17  ;;  %v4600_v53 = vrot.slane %v4596_v28, 2 }
 0x8e2   : > { %9075 = vst [vmem:[#allocation15_spill] sm:$0xff] %v8287_v60 }
 0x8e3   : > { %v8290_v42 = vpop.permute.xlu1 %5087  ;;  %4542 = vrot.lane.b32.xlu0 %v4539_v57, %s6016_s17  ;;  %v4611_v57 = vld [vmem:[#allocation3 + $0x48] sm:$0x30] }
 0x8e4   : > { %9076 = vst [vmem:[#allocation13_spill] sm:$0xff] %v8290_v42  ;;  %v4829_v42 = vld [vmem:[#allocation3 + $0x78] sm:$0xc] }
 0x8e5   : > { %v8293_v24 = vpop.permute.xlu0 %5089  ;;  %4556 = vrot.lane.b32.xlu1 %v4554_v49, %s6016_s17  ;;  %v4614_v49 = vrot.slane %v4610_v47, 4  ;;  %v4645_v47 = vrot.slane %v4641_v18, 4  ;;  %v4672_v18 = vld [vmem:[#allocation3 + $0x40] sm:$0x30] }
 0x8e6   : > { %9077 = vst [vmem:[#allocation11_spill] sm:$0xff] %v8293_v24 }
 0x8e7   : > { %v8296_v21 = vpop.permute.xlu1 %5100  ;;  %4558 = vrot.lane.b32.xlu0 %v4555_v26, %s6016_s17  ;;  %v4626_v26 = vld [vmem:[#allocation3 + $0x88] sm:$0xc0] }
 0x8e8   : > { %9078 = vst [vmem:[#allocation18_spill] sm:$0xff] %v8296_v21  ;;  %v4707_v21 = vrot.slane %v4703_v23, 6 }
 0x8e9   : > { %v8299_v8 = vpop.permute.xlu0 %5102  ;;  %4571 = vrot.lane.b32.xlu1 %v4569_v6, %s6016_s17  ;;  %v4615_v6 = vrot.slane %v4611_v57, 4  ;;  %v4656_v57 = vld [vmem:[#allocation3 + $0x10] sm:$0xc] }
 0x8ea   : > { %9079 = vst [vmem:[#allocation16_spill] sm:$0xff] %v8299_v8 }
 0x8eb   : > { %v8302_v29 = vpop.permute.xlu1 %4292  ;;  %4573 = vrot.lane.b32.xlu0 %v4570_v51, %s6016_s17 }
 0x8ed   : > { %v8305_v54 = vpop.permute.xlu0 %4294  ;;  %4586 = vrot.lane.b32.xlu1 %v4584_v33, %s6016_s17  ;;  %v4627_v33 = vld [vmem:[#allocation3 + $0x48] sm:$0xc0] }
 0x8ef   : > { %v8308_v15 = vpop.permute.xlu1 %4307  ;;  %4588 = vrot.lane.b32.xlu0 %v4585_v7, %s6016_s17  ;;  %v4630_v7 = vrot.slane %v4626_v26, 4  ;;  %v4660_v26 = vrot.slane %v4656_v57, 4  ;;  %v4702_v57 = vld [vmem:[#allocation3 + $0xe8] sm:$0x3] }
 0x8f1   : > { %v8311_v4 = vpop.permute.xlu0 %4309  ;;  %4601 = vrot.lane.b32.xlu1 %v4599_v63, %s6016_s17  ;;  %v4631_v63 = vrot.slane %v4627_v33, 4  ;;  %v4661_v33 = vrot.slane %v4657_v39, 4 }
 0x8f3   : > { %v4323_v41 = vpop.permute.xlu1 %4322  ;;  %4603 = vrot.lane.b32.xlu0 %v4600_v53, %s6016_s17  ;;  %v4642_v53 = vld [vmem:[#allocation3 + $0x40] sm:$0x3]  ;;  %s6020_s17 = smov 83  }
 0x8f5   : > { %v8318_v38 = vpop.permute.xlu0 %4324  ;;  %4616 = vrot.lane.b32.xlu1 %v4614_v49, %s6017_s23  ;;  %v4646_v49 = vrot.slane %v4642_v53, 4 }
 0x8f6   : > { %v4327_v51 = vsel %vm4326_vm12, %v4323_v41, %v8318_v38 }
 0x8f7   : > { %v4330_v11 = vadd.f32 %v4327_v51, %v4254_v46  ;;  %v8323_v9 = vpop.permute.xlu1 %4338  ;;  %4618 = vrot.lane.b32.xlu0 %v4615_v6, %s6017_s23  ;;  %v4671_v6 = vld [vmem:[#allocation3 + $0x10] sm:$0x30] }
 0x8f9   : > { %v8326_v28 = vpop.permute.xlu0 %4340  ;;  %4632 = vrot.lane.b32.xlu1 %v4630_v7, %s6017_s23 }
 0x8fb   : > { %v8329_v20 = vpop.permute.xlu1 %5113  ;;  %4634 = vrot.lane.b32.xlu0 %v4631_v63, %s6017_s23  ;;  %v4675_v63 = vrot.slane %v4671_v6, 4  ;;  %v4706_v6 = vrot.slane %v4702_v57, 6  ;;  %v4732_v57 = vld [vmem:[#allocation3 + $0xe8] sm:$0x30] }
 0x8fc   : > { %9080 = vst [vmem:[#allocation14_spill] sm:$0xff] %v8329_v20  ;;  %v4676_v20 = vrot.slane %v4672_v18, 4  ;;  %v4717_v18 = vld [vmem:[#allocation3 + $0xe8] sm:$0xc]  ;;  %v4736_v23 = vrot.slane %v4732_v57, 6 }
 0x8fd   : > { %v8332_v41 = vpop.permute.xlu0 %5115  ;;  %4647 = vrot.lane.b32.xlu1 %v4645_v47, %s6017_s23  ;;  %v4686_v47 = vld [vmem:[#allocation3 + $0x10] sm:$0xc0] }
 0x8fe   : > { %9081 = vst [vmem:[#allocation12_spill] sm:$0xff] %v8332_v41 }
 0x8ff   : > { %v8335_v46 = vpop.permute.xlu1 %4353  ;;  %4649 = vrot.lane.b32.xlu0 %v4646_v49, %s6017_s23  ;;  %v4687_v49 = vld [vmem:[#allocation3 + $0x40] sm:$0xc0] }
 0x901   : > { %v8338_v51 = vpop.permute.xlu0 %4355  ;;  %4662 = vrot.lane.b32.xlu1 %v4660_v26, %s6017_s23  ;;  %v4690_v26 = vrot.slane %v4686_v47, 6  ;;  %v4718_v47 = vld [vmem:[#allocation3 + $0xc0] sm:$0xc] }
 0x902   : > { %v4722_v3 = vrot.slane %v4718_v47, 6 }
 0x903   : > { %v8341_v7 = vpop.permute.xlu1 %4368  ;;  %4664 = vrot.lane.b32.xlu0 %v4661_v33, %s6017_s23  ;;  %v4691_v33 = vrot.slane %v4687_v49, 6  ;;  %v4721_v49 = vrot.slane %v4717_v18, 6 }
 0x905   : > { %v8344_v53 = vpop.permute.xlu0 %4370  ;;  %4677 = vrot.lane.b32.xlu1 %v4675_v63, %s6017_s23 }
 0x907   : > { %v8347_v41 = vpop.permute.xlu1 %4383  ;;  %4679 = vrot.lane.b32.xlu0 %v4676_v20, %s6017_s23  ;;  %s6021_s23 = smov 101  }
 0x909   : > { %v8350_v39 = vpop.permute.xlu0 %4385  ;;  %4692 = vrot.lane.b32.xlu1 %v4690_v26, %s6018_s14 }
 0x90b   : > { %v4399_v22 = vpop.permute.xlu1 %4398  ;;  %4694 = vrot.lane.b32.xlu0 %v4691_v33, %s6018_s14 }
 0x90d   : > { %v8354_v63 = vpop.permute.xlu0 %4400  ;;  %4708 = vrot.lane.b32.xlu1 %v4706_v6, %s6018_s14 }
 0x90e   : > { %v4403_v20 = vsel %vm4402_vm13, %v4399_v22, %v8354_v63  ;;  %v4747_v22 = vld [vmem:[#allocation3 + $0xe8] sm:$0xc0] }
 0x90f   : > { %v8359_v8 = vadd.f32 %v4403_v20, %v4330_v11  ;;  %v8361_v26 = vpop.permute.xlu1 %5144  ;;  %4710 = vrot.lane.b32.xlu0 %v4707_v21, %s6018_s14  ;;  %v4737_v20 = vrot.slane %v4733_v59, 6  ;;  %v4748_v21 = vld [vmem:[#allocation3 + $0xc0] sm:$0xc0]  ;;  %v4763_v59 = vld [vmem:[#allocation3 + $0x128] sm:$0x3] }
 0x910   : > { %9082 = vst [vmem:[#allocation10_spill] sm:$0xff] %v8361_v26  ;;  %v4751_v26 = vrot.slane %v4747_v22, 6  ;;  %v4752_v47 = vrot.slane %v4748_v21, 6  ;;  %v4789_v21 = vld [vmem:[#allocation3 + $0xd8] sm:$0x30] }
 0x911   : > { %v8364_v33 = vpop.permute.xlu0 %5146  ;;  %4723 = vrot.lane.b32.xlu1 %v4721_v49, %s6018_s14 }
 0x912   : > { %9083 = vst [vmem:[#allocation27_spill] sm:$0xff] %v8364_v33 }
 0x913   : > { %v8367_v6 = vpop.permute.xlu1 %5159  ;;  %4725 = vrot.lane.b32.xlu0 %v4722_v3, %s6018_s14 }
 0x914   : > { %9084 = vst [vmem:[#allocation28_spill] sm:$0xff] %v8367_v6  ;;  %v4762_v6 = vld [vmem:[#allocation3 + $0xd8] sm:$0x3] }
 0x915   : > { %v8370_v11 = vpop.permute.xlu0 %5161  ;;  %4738 = vrot.lane.b32.xlu1 %v4736_v23, %s6018_s14 }
 0x916   : > { %9085 = vst [vmem:[#allocation29_spill] sm:$0xff] %v8370_v11  ;;  %v4777_v11 = vld [vmem:[#allocation3 + $0x128] sm:$0xc] }
 0x917   : > { %v8373_v18 = vpop.permute.xlu1 %4414  ;;  %4740 = vrot.lane.b32.xlu0 %v4737_v20, %s6018_s14  ;;  %v4776_v20 = vld [vmem:[#allocation3 + $0xd8] sm:$0xc] }
 0x918   : > { %9086 = vst [vmem:[#allocation30_spill] sm:$0xff] %v8373_v18 }
 0x919   : > { %v8376_v49 = vpop.permute.xlu0 %4416  ;;  %4753 = vrot.lane.b32.xlu1 %v4751_v26, %s6018_s14 }
 0x91a   : > { %9087 = vst [vmem:[#allocation31_spill] sm:$0xff] %v8376_v49 }
 0x91b   : > { %v8379_v3 = vpop.permute.xlu1 %4429  ;;  %4755 = vrot.lane.b32.xlu0 %v4752_v47, %s6018_s14  ;;  %v4790_v47 = vld [vmem:[#allocation3 + $0x128] sm:$0x30]  ;;  %s9173_s14 = sand.u32 1, %s5986_s16  }
 0x91c   : > { %9088 = vst [vmem:[#allocation32_spill] sm:$0xff] %v8379_v3 }
 0x91d   : > { %v8382_v57 = vpop.permute.xlu0 %4431  ;;  %4766 = vrot.lane.b32.xlu1 %v4762_v6, %s6019_s30  ;;  %v4802_v6 = vld [vmem:[#allocation3 + $0xd8] sm:$0xc0] }
 0x91e   : > { %9089 = vst [vmem:[#allocation33_spill] sm:$0xff] %v8382_v57 }
 0x91f   : > { %v8384_v23 = vpop.permute.xlu1 %4444  ;;  %4768 = vrot.lane.b32.xlu0 %v4763_v59, %s6019_s30  ;;  %v4803_v59 = vld [vmem:[#allocation3 + $0x128] sm:$0xc0] }
 0x920   : > { %9090 = vst [vmem:[#allocation34_spill] sm:$0xff] %v8384_v23  ;;  %v4815_v23 = vld [vmem:[#allocation3 + $0x118] sm:$0x3] }
 0x921   : > { %v8386_v22 = vpop.permute.xlu0 %4446  ;;  %4780 = vrot.lane.b32.xlu1 %v4776_v20, %s6019_s30  ;;  %v4828_v20 = vld [vmem:[#allocation3 + $0x118] sm:$0xc] }
 0x923   : > { %v8388_v26 = vpop.permute.xlu1 %4459  ;;  %4782 = vrot.lane.b32.xlu0 %v4777_v11, %s6019_s30  ;;  %v4816_v11 = vld [vmem:[#allocation3 + $0x78] sm:$0x3] }
 0x925   : > { %v8390_v33 = vpop.permute.xlu0 %4461  ;;  %4793 = vrot.lane.b32.xlu1 %v4789_v21, %s6019_s30 }
 0x927   : > { %v8392_v18 = vpop.permute.xlu1 %5220  ;;  %4795 = vrot.lane.b32.xlu0 %v4790_v47, %s6019_s30  ;;  %v4844_v47 = vld [vmem:[#allocation3 + $0x118] sm:$0x30] }
 0x928   : > { %9091 = vst [vmem:[#allocation35_spill] sm:$0xff] %v8392_v18  ;;  %v4832_v18 = vrot.slane %v4828_v20, 2 }
 0x929   : > { %v8394_v49 = vpop.permute.xlu0 %5222  ;;  %4806 = vrot.lane.b32.xlu1 %v4802_v6, %s6019_s30  ;;  %v4833_v6 = vrot.slane %v4829_v42, 2 }
 0x92a   : > { %9092 = vst [vmem:[#allocation36_spill] sm:$0xff] %v8394_v49  ;;  %v4845_v49 = vld [vmem:[#allocation3 + $0x78] sm:$0x30] }
 0x92b   : > { %v8396_v3 = vpop.permute.xlu1 %5174  ;;  %4808 = vrot.lane.b32.xlu0 %v4803_v59, %s6019_s30  ;;  %v4848_v59 = vrot.slane %v4844_v47, 2 }
 0x92c   : > { %9093 = vst [vmem:[#allocation37_spill] sm:$0xff] %v8396_v3 }
 0x92d   : > { %v8398_v57 = vpop.permute.xlu0 %5176  ;;  %4819 = vrot.lane.b32.xlu1 %v4815_v23, %s6019_s30  ;;  %v4859_v23 = vld [vmem:[#allocation3 + $0x118] sm:$0xc0] }
 0x92e   : > { %9094 = vst [vmem:[#allocation38_spill] sm:$0xff] %v8398_v57 }
 0x92f   : > { %v8400_v21 = vpop.permute.xlu1 %5189  ;;  %4821 = vrot.lane.b32.xlu0 %v4816_v11, %s6019_s30  ;;  %v4849_v11 = vrot.slane %v4845_v49, 2  ;;  %s5500_s30 = scalar_lea.sflag [#allocation6], %s9173_s14 }
 0x930   : > { %9095 = vst [vmem:[#allocation39_spill] sm:$0xff] %v8400_v21  ;;  %v4860_v21 = vld [vmem:[#allocation3 + $0x78] sm:$0xc0] }
 0x931   : > { %v8402_v24 = vpop.permute.xlu0 %5191  ;;  %4834 = vrot.lane.b32.xlu1 %v4832_v18, %s6020_s17  ;;  %v4864_v47 = vrot.slane %v4860_v21, 2 }
 0x932   : > { %9096 = vst [vmem:[#allocation40_spill] sm:$0xff] %v8402_v24  ;;  %v4920_v24 = vld [vmem:[#allocation3 + $0x30] sm:$0xc0] }
 0x933   : > { %v4473_v3 = vpop.permute.xlu1 %4472  ;;  %4836 = vrot.lane.b32.xlu0 %v4833_v6, %s6020_s17  ;;  %v4863_v6 = vrot.slane %v4859_v23, 2  ;;  %v4924_v60 = vrot.slane %v4920_v24, 4 }
 0x935   : > { %v8406_v57 = vpop.permute.xlu0 %4474  ;;  %4850 = vrot.lane.b32.xlu1 %v4848_v59, %s6020_s17  ;;  %v4921_v59 = vld [vmem:[#allocation3 + $0x110] sm:$0xc0] }
 0x936   : > { %v4477_v20 = vsel %vm4476_vm14, %v4473_v3, %v8406_v57  ;;  %v4874_v3 = vld [vmem:[#allocation3 + $0x30] sm:$0x3] }
 0x937   : > { %v4480_v18 = vadd.f32 %v4477_v20, %v8359_v8  ;;  %v8412_v42 = vpop.permute.xlu1 %4486  ;;  %4852 = vrot.lane.b32.xlu0 %v4849_v11, %s6020_s17  ;;  %v4925_v8 = vrot.slane %v4921_v59, 4  ;;  %v4875_v20 = vld [vmem:[#allocation3 + $0x110] sm:$0x3]  ;;  %v4878_v23 = vrot.slane %v4874_v3, 2 }
 0x938   : > { %9097 = vst [vmem:[#allocation41_spill] sm:$0xff] %v8412_v42  ;;  %v4879_v24 = vrot.slane %v4875_v20, 2  ;;  %v4890_v42 = vld [vmem:[#allocation3 + $0x110] sm:$0xc] }
 0x939   : > { %v8415_v27 = vpop.permute.xlu0 %4488  ;;  %4865 = vrot.lane.b32.xlu1 %v4863_v6, %s6020_s17  ;;  %v4889_v6 = vld [vmem:[#allocation3 + $0x30] sm:$0xc]  ;;  %v4894_v59 = vrot.slane %v4890_v42, 2 }
 0x93a   : > { %9098 = vst [vmem:[#allocation42_spill] sm:$0xff] %v8415_v27  ;;  %v4893_v27 = vrot.slane %v4889_v6, 2 }
 0x93b   : > { %v8418_v49 = vpop.permute.xlu1 %4499  ;;  %4867 = vrot.lane.b32.xlu0 %v4864_v47, %s6020_s17 }
 0x93d   : > { %v8421_v44 = vpop.permute.xlu0 %4501  ;;  %4926 = vrot.lane.b32.xlu1 %v4924_v60, %s6007_s12 }
 0x93f   : > { %v8424_v11 = vpop.permute.xlu1 %4512  ;;  %4928 = vrot.lane.b32.xlu0 %v4925_v8, %s6007_s12 }
 0x940   : > { %9099 = vst [vmem:[#allocation43_spill] sm:$0xff] %v8424_v11 }
 0x941   : > { %v8427_v21 = vpop.permute.xlu0 %4514  ;;  %4880 = vrot.lane.b32.xlu1 %v4878_v23, %s6020_s17 }
 0x943   : > { %v8430_v47 = vpop.permute.xlu1 %5235  ;;  %4882 = vrot.lane.b32.xlu0 %v4879_v24, %s6020_s17 }
 0x944   : > { %9100 = vst [vmem:[#allocation44_spill] sm:$0xff] %v8430_v47 }
 0x945   : > { %v8433_v60 = vpop.permute.xlu0 %5237  ;;  %4895 = vrot.lane.b32.xlu1 %v4893_v27, %s6020_s17 }
 0x946   : > { %9101 = vst [vmem:[#allocation45_spill] sm:$0xff] %v8433_v60 }
 0x947   : > { %v8436_v11 = vpop.permute.xlu1 %5250  ;;  %4897 = vrot.lane.b32.xlu0 %v4894_v59, %s6020_s17  ;;  %v4221_v59 = vld [vmem:[#allocation3 + $0xc8] sm:$0x3] }
 0x948   : > { %9102 = vst [vmem:[#allocation46_spill] sm:$0xff] %v8436_v11 }
 0x949   : > { %v8439_v3 = vpop.permute.xlu0 %5252  ;;  %5360 = vrot.lane.b32.xlu1 %v8066_v0, %s6021_s23 }
 0x94a   : > { %9103 = vst [vmem:[#allocation47_spill] sm:$0xff] %v8439_v3 }
 0x94b   : > { %v8443_v8 = vpop.permute.xlu1 %5265  ;;  %5362 = vrot.lane.b32.xlu0 %v8064_v61, %s6021_s23 }
 0x94c   : > { %9104 = vst [vmem:[#allocation48_spill] sm:$0xff] %v8443_v8 }
 0x94d   : > { %v8447_v20 = vpop.permute.xlu0 %5267  ;;  %5364 = vrot.lane.b32.xlu1 %v8057_v48, %s6021_s23 }
 0x94e   : > { %9105 = vst [vmem:[#allocation49_spill] sm:$0xff] %v8447_v20 }
 0x94f   : > { %v4526_v27 = vpop.permute.xlu1 %4525  ;;  %5366 = vrot.lane.b32.xlu0 %v8054_v10, %s6021_s23 }
 0x951   : > { %v8453_v42 = vpop.permute.xlu0 %4527  ;;  %5368 = vrot.lane.b32.xlu1 %v8047_v2, %s6021_s23 }
 0x953   : > { %v4541_v0 = vpop.permute.xlu1 %4540  ;;  %5370 = vrot.lane.b32.xlu0 %v8044_v37, %s6021_s23 }
 0x955   : > { %v4543_v61 = vpop.permute.xlu0 %4542  ;;  %5372 = vrot.lane.b32.xlu1 %v8037_v35, %s6021_s23  ;;  %v4311_v35 = vsel %vm4250_vm11, %v8308_v15, %v8311_v4  ;;  %v4255_v15 = vadd.f32 %v8245_v12, %v4221_v59 }
 0x956   : > { %v4545_v48 = vsel %vm4544_vm15, %v4541_v0, %v4543_v61 }
 0x957   : > { %v4548_v23 = vadd.f32 %v4545_v48, %v4480_v18  ;;  %v4557_v6 = vpop.permute.xlu1 %4556  ;;  %5374 = vrot.lane.b32.xlu0 %v8034_v25, %s6021_s23  ;;  %v4236_v25 = vld [vmem:[#allocation3 + $0xb8] sm:$0x3] }
 0x959   : > { %v8464_v10 = vpop.permute.xlu0 %4558  ;;  %5376 = vrot.lane.b32.xlu1 %v8027_v40, %s6021_s23  ;;  %v4387_v40 = vsel %vm4326_vm12, %v8347_v41, %v8350_v39  ;;  %v4331_v41 = vadd.f32 %v8318_v38, %v4255_v15  ;;  %v4980_v15 = vld [vmem:[#allocation3] sm:$0xc0] }
 0x95a   : > { %v8470_v37 = vsel %vm4544_vm15, %v4557_v6, %v8464_v10 }
 0x95b   : > { %v4572_v2 = vpop.permute.xlu1 %4571  ;;  %5378 = vrot.lane.b32.xlu0 %v8024_v19, %s6021_s23  ;;  %v4314_v19 = vadd.f32 %v4311_v35, %v4236_v25  ;;  %v4407_v12 = vadd.f32 %v8354_v63, %v4331_v41  ;;  %v4233_v41 = vld [vmem:[#allocation3 + $0xc8] sm:$0xc0] }
 0x95d   : > { %v8477_v18 = vpop.permute.xlu0 %4573  ;;  %5380 = vrot.lane.b32.xlu1 %v8017_v5, %s6021_s23  ;;  %v4463_v5 = vsel %vm4402_vm13, %v8388_v26, %v8390_v33  ;;  %v4390_v48 = vadd.f32 %v4387_v40, %v4314_v19  ;;  %v4904_v26 = vld [vmem:[#allocation3 + $0x30] sm:$0x30] }
 0x95e   : > { %v8486_v24 = vsel %vm4544_vm15, %v4572_v2, %v8477_v18  ;;  %v4529_v2 = vsel %vm4476_vm14, %v4526_v27, %v8453_v42  ;;  %v4981_v27 = vld [vmem:[#allocation3 + $0x108] sm:$0xc0] }
 0x95f   : > { %v4587_v0 = vpop.permute.xlu1 %4586  ;;  %5382 = vrot.lane.b32.xlu0 %v8014_v56, %s6021_s23  ;;  %v4466_v56 = vadd.f32 %v4463_v5, %v4390_v48 }
 0x961   : > { %v4589_v6 = vpop.permute.xlu0 %4588  ;;  %5384 = vrot.lane.b32.xlu1 %v8007_v62, %s6021_s23  ;;  %v4532_v40 = vadd.f32 %v4529_v2, %v4466_v56  ;;  %v4481_v62 = vadd.f32 %v8406_v57, %v4407_v12 }
 0x962   : > { %v8500_v35 = vsel %vm4544_vm15, %v4587_v0, %v4589_v6 }
 0x963   : > { %v4602_v25 = vpop.permute.xlu1 %4601  ;;  %5386 = vrot.lane.b32.xlu0 %v8003_v1, %s6021_s23  ;;  %v4908_v1 = vrot.slane %v4904_v26, 4  ;;  %v4549_v63 = vadd.f32 %v4543_v61, %v4481_v62  ;;  %v5057_v26 = vld [vmem:[#allocation3 + $0x60] sm:$0x3] }
 0x965   : > { %v8505_v59 = vpop.permute.xlu0 %4603  ;;  %5388 = vrot.lane.b32.xlu1 %v7997_v30, %s6021_s23  ;;  %v4985_v30 = vrot.slane %v4981_v27, 6  ;;  %v5122_v27 = vld [vmem:[#allocation3 + $0x20] sm:$0xc] }
 0x966   : > { %v4605_v38 = vsel %vm4544_vm15, %v4602_v25, %v8505_v59  ;;  %v4984_v25 = vrot.slane %v4980_v15, 6  ;;  %v5199_v15 = vld [vmem:[#allocation3 + $0x28] sm:$0x30] }
 0x967   : > { %v8512_v19 = vadd.f32 %v4605_v38, %v4532_v40  ;;  %v4617_v0 = vpop.permute.xlu1 %4616  ;;  %5390 = vrot.lane.b32.xlu0 %v7993_v45, %s6021_s23  ;;  %v4300_v45 = vadd.f32 %v8305_v54, %v4233_v41  ;;  %v5123_v40 = vld [vmem:[#allocation3 + $0x18] sm:$0xc]  ;;  %v5056_v38 = vld [vmem:[#allocation3 + $0x50] sm:$0x3]  ;;  %v5198_v41 = vld [vmem:[#allocation3 + $0xb0] sm:$0x30] }
 0x969   : > { %9106 = vst [vmem:[#allocation50_spill] sm:$0xff] %v8512_v19  ;;  %v4619_v5 = vpop.permute.xlu0 %4618  ;;  %4910 = vrot.lane.b32.xlu1 %v4908_v1, %s6007_s12  ;;  %v4376_v61 = vadd.f32 %v8344_v53, %v4300_v45  ;;  %v5127_v1 = vrot.slane %v5123_v40, 2  ;;  %v5203_v45 = vrot.slane %v5199_v15, 4 }
 0x96a   : > { %v4621_v57 = vsel %vm4620_vm0, %v4617_v0, %v4619_v5  ;;  %v4625_v48 = vadd.f32 %v4619_v5, %v4549_v63 }
 0x96b   : > { %v4624_v2 = vadd.f32 %v4621_v57, %v4548_v23  ;;  %v8518_v56 = vpop.permute.xlu1 %4632  ;;  %4988 = vrot.lane.b32.xlu0 %v4985_v30, %s6009_s19  ;;  %v4452_v23 = vadd.f32 %v8386_v22, %v4376_v61  ;;  %v5126_v30 = vrot.slane %v5122_v27, 2  ;;  %v5326_v27 = vld [vmem:[%s8932_s6] sm:$0x3] }
 0x96d   : > { %v8522_v12 = vpop.permute.xlu0 %4634  ;;  %4986 = vrot.lane.b32.xlu1 %v4984_v25, %s6009_s19  ;;  %v4520_v63 = vadd.f32 %v8427_v21, %v4452_v23  ;;  %v5202_v23 = vrot.slane %v5198_v41, 4  ;;  %s5842_s19 = sshll.u32 %s6104_s8, 5  ;;  %s6024_s8 = smov [#allocation5]  }
 0x96e   : > { %s5938_s28 = sshll.u32 %s6024_s8, 4  ;;  %s5939_s28 = int_to_ptr.vmem [resolvable:$false] %s5938_s28 }
 0x96f   : > { %v8526_v62 = vpop.permute.xlu1 %4647  ;;  %5062 = vrot.lane.b32.xlu0 %v5057_v26, %s6010_s11  ;;  %v4594_v57 = vadd.f32 %v4589_v6, %v4520_v63  ;;  %v4905_v26 = vld [vmem:[#allocation3 + $0x110] sm:$0x30] }
 0x970   : > { %v4909_v6 = vrot.slane %v4905_v26, 4 }
 0x971   : > { %v8530_v0 = vpop.permute.xlu0 %4649  ;;  %5060 = vrot.lane.b32.xlu1 %v5056_v38, %s6010_s11  ;;  %s9171_s11 = scalar_lea.vmem [#allocation5], %s6135_s27 }
 0x973   : > { %v8534_v5 = vpop.permute.xlu1 %4662  ;;  %5130 = vrot.lane.b32.xlu0 %v5127_v1, %s6013_s22 }
 0x975   : > { %v8537_v25 = vpop.permute.xlu0 %4664  ;;  %5128 = vrot.lane.b32.xlu1 %v5126_v30, %s6013_s22  ;;  %s8886_s22 = scalar_lea.hbm %s8935_s9, %s5842_s19 }
 0x976   : > { %v8541_v61 = vadd.f32 %v8537_v25, %v4594_v57 }
 0x977   : > { %v8543_v40 = vpop.permute.xlu1 %4677  ;;  %5206 = vrot.lane.b32.xlu0 %v5203_v45, %s6014_s26 }
 0x978   : > { %9107 = vst [vmem:[#allocation51_spill] sm:$0xff] %v8541_v61 }
 0x979   : > { %v8546_v38 = vpop.permute.xlu0 %4679  ;;  %5204 = vrot.lane.b32.xlu1 %v5202_v23, %s6014_s26  ;;  %s9172_s26 = smov %s9171_s11 }
 0x97b   : > { %v4693_v1 = vpop.permute.xlu1 %4692  ;;  %4912 = vrot.lane.b32.xlu0 %v4909_v6, %s6007_s12  ;;  %s6023_s12 = smov 125  }
 0x97d   : > { %v4695_v63 = vpop.permute.xlu0 %4694  ;;  %5329 = vperm.xlu1 %5932, %v5326_v27  }
 0x97e   : > { %v4697_v15 = vsel %vm4696_vm1, %v4693_v1, %v4695_v63  ;;  %v4701_v30 = vadd.f32 %v4695_v63, %v4625_v48 }
 0x97f   : > { %v4700_v57 = vadd.f32 %v4697_v15, %v4624_v2  ;;  %v8554_v41 = vpop.permute.xlu1 %4708 }
 0x981   : > { %v8556_v45 = vpop.permute.xlu0 %4710 }
 0x983   : > { %v8558_v23 = vpop.permute.xlu1 %4723 }
 0x985   : > { %v8560_v26 = vpop.permute.xlu0 %4725 }
 0x987   : > { %v8562_v8 = vpop.permute.xlu1 %4738 }
 0x988   : > { %9108 = vst [vmem:[#allocation52_spill] sm:$0xff] %v8562_v8  ;;  %v4229_v8 = vld [vmem:[#allocation3 + $0xc8] sm:$0x30] }
 0x989   : > { %v8564_v20 = vpop.permute.xlu0 %4740  ;;  %v4285_v60 = vadd.f32 %v8257_v14, %v4229_v8 }
 0x98a   : > { %9109 = vst [vmem:[#allocation53_spill] sm:$0xff] %v8564_v20  ;;  %v4296_v20 = vsel %vm4250_vm11, %v8302_v29, %v8305_v54  ;;  %v4342_v29 = vsel %vm4326_vm12, %v8323_v9, %v8326_v28  ;;  %v9115_v54 = vld [vmem:[#allocation21_spill] sm:$0xff]  ;;  %v9120_v9 = vld [vmem:[#allocation11_spill] sm:$0xff] }
 0x98b   : > { %v8566_v6 = vpop.permute.xlu1 %4753  ;;  %v8630_v8 = vsel %vm4990_vm5, %v9115_v54, %v8275_v13  ;;  %v4361_v54 = vadd.f32 %v8338_v51, %v4285_v60  ;;  %v9124_v13 = vld [vmem:[#allocation32_spill] sm:$0xff] }
 0x98c   : > { %9110 = vst [vmem:[#allocation54_spill] sm:$0xff] %v8566_v6  ;;  %v4266_v6 = vsel %vm4250_vm11, %v8248_v16, %v8251_v17  ;;  %v4224_v16 = vld [vmem:[#allocation3 + $0x80] sm:$0xc]  ;;  %9116 = vst [vmem:[#allocation21_spill] sm:$0xff] %v8630_v8  ;;  %v9123_v8 = vld [vmem:[#allocation33_spill] sm:$0xff] }
 0x98d   : > { %v8568_v11 = vpop.permute.xlu0 %4755 }
 0x98e   : > { %9111 = vst [vmem:[#allocation55_spill] sm:$0xff] %v8568_v11 }
 0x98f   : > { %v4767_v27 = vpop.permute.xlu1 %4766 }
 0x991   : > { %v4769_v48 = vpop.permute.xlu0 %4768 }
 0x992   : > { %v4771_v2 = vsel %vm4770_vm2, %v4767_v27, %v4769_v48  ;;  %v8571_v1 = vadd.f32 %v4769_v48, %v4701_v30  ;;  %v4281_v30 = vsel %vm4250_vm11, %v8254_v58, %v8257_v14  ;;  %v8594_v48 = vsel %vm4914_vm3, %v8224_v31, %v8227_v43  ;;  %v4228_v58 = vld [vmem:[#allocation3 + $0x80] sm:$0x30] }
 0x993   : > { %v8573_v63 = vadd.f32 %v4771_v2, %v4700_v57  ;;  %v8575_v15 = vpop.permute.xlu1 %4780  ;;  %v4225_v57 = vld [vmem:[#allocation3 + $0xc8] sm:$0xc]  ;;  %v8599_v2 = vsel %vm4914_vm3, %v8230_v34, %v8233_v32  ;;  %v4284_v47 = vadd.f32 %v4281_v30, %v4228_v58  ;;  %v8609_v31 = vsel %vm4990_vm5, %v8260_v50, %v8263_v55  ;;  %v9125_v55 = vld [vmem:[#allocation31_spill] sm:$0xff] }
 0x994   : > { %9113 = vst [vmem:[#allocation57_spill] sm:$0xff] %v8599_v2  ;;  %v4270_v11 = vadd.f32 %v8251_v17, %v4225_v57  ;;  %9114 = vst [vmem:[#allocation58_spill] sm:$0xff] %v8609_v31  ;;  %v8616_v17 = vsel %vm4990_vm5, %v8266_v52, %v8269_v36  ;;  %v4232_v57 = vld [vmem:[#allocation3 + $0x80] sm:$0xc0]  ;;  %v4357_v14 = vsel %vm4326_vm12, %v8335_v46, %v8338_v51  ;;  %v9117_v52 = vld [vmem:[#allocation15_spill] sm:$0xff]  ;;  %vm5340_vm11 = vcmask 826368  }
 0x995   : > { %v8577_v3 = vpop.permute.xlu0 %4782  ;;  %v4372_v50 = vsel %vm4326_vm12, %v8341_v7, %v8344_v53  ;;  %v4299_v46 = vadd.f32 %v4296_v20, %v4232_v57  ;;  %v4237_v2 = vld [vmem:[#allocation3 + $0x70] sm:$0x3]  ;;  %vm5416_vm12 = vcmask 605184  }
 0x996   : > { %v4315_v7 = vadd.f32 %v8311_v4, %v4237_v2  ;;  %v4346_v53 = vadd.f32 %v8326_v28, %v4270_v11  ;;  %v4437_v4 = vadd.f32 %v9123_v8, %v4361_v54  ;;  %v9127_v28 = vld [vmem:[#allocation34_spill] sm:$0xff]  ;;  %v9128_v11 = vld [vmem:[#allocation27_spill] sm:$0xff] }
 0x997   : > { %v8579_v61 = vpop.permute.xlu1 %4793  ;;  %v4375_v31 = vadd.f32 %v4372_v50, %v4299_v46  ;;  %v4448_v51 = vsel %vm4402_vm13, %v9127_v28, %v8386_v22  ;;  %v9133_v46 = vld [vmem:[#allocation41_spill] sm:$0xff] }
 0x999   : > { %v8581_v19 = vpop.permute.xlu0 %4795  ;;  %v4451_v54 = vadd.f32 %v4448_v51, %v4375_v31 }
 0x99b   : > { %v8589_v27 = vpop.permute.xlu1 %4806 }
 0x99c   : > { %9112 = vst [vmem:[#allocation56_spill] sm:$0xff] %v8589_v27  ;;  %v4269_v27 = vadd.f32 %v4266_v6, %v4224_v16  ;;  %v9118_v6 = vld [vmem:[#allocation17_spill] sm:$0xff] }
 0x99d   : > { %v8611_v34 = vpop.permute.xlu0 %4808  ;;  %v8635_v30 = vsel %vm5064_vm7, %v9118_v6, %v9117_v52  ;;  %v9121_v16 = vld [vmem:[#allocation13_spill] sm:$0xff]  ;;  %v4433_v6 = vsel %vm4402_vm13, %v9124_v13, %v9123_v8  ;;  %v4360_v52 = vadd.f32 %v4357_v14, %v4284_v47  ;;  %v4503_v13 = vsel %vm4476_vm14, %v8418_v49, %v8421_v44  ;;  %v9129_v47 = vld [vmem:[#allocation10_spill] sm:$0xff]  ;;  %v9131_v14 = vld [vmem:[#allocation28_spill] sm:$0xff] }
 0x99e   : > { %9119 = vst [vmem:[#allocation17_spill] sm:$0xff] %v8635_v30  ;;  %v8640_v58 = vsel %vm5064_vm7, %v9121_v16, %v9120_v9  ;;  %v4345_v30 = vadd.f32 %v4342_v29, %v4269_v27  ;;  %v9126_v16 = vld [vmem:[#allocation30_spill] sm:$0xff]  ;;  %v8666_v60 = vsel %vm5132_vm8, %v9129_v47, %v9128_v11  ;;  %v4422_v27 = vadd.f32 %v9125_v55, %v4346_v53 }
 0x99f   : > { %9122 = vst [vmem:[#allocation11_spill] sm:$0xff] %v8640_v58  ;;  %v8642_v32 = vpop.permute.xlu1 %4819  ;;  %v4418_v20 = vsel %vm4402_vm13, %v9126_v16, %v9125_v55  ;;  %v4391_v58 = vadd.f32 %v8350_v39, %v4315_v7  ;;  %v4436_v2 = vadd.f32 %v4433_v6, %v4360_v52  ;;  %v9130_v39 = vld [vmem:[#allocation29_spill] sm:$0xff]  ;;  %v9132_v8 = vld [vmem:[#allocation42_spill] sm:$0xff]  ;;  %v4507_v7 = vadd.f32 %v8421_v44, %v4437_v4  ;;  %v9134_v55 = vld [vmem:[#allocation43_spill] sm:$0xff] }
 0x9a0   : > { %v8672_v50 = vsel %vm5132_vm8, %v9131_v14, %v9130_v39  ;;  %v4421_v22 = vadd.f32 %v4418_v20, %v4345_v30  ;;  %v4490_v49 = vsel %vm4476_vm14, %v9133_v46, %v9132_v8  ;;  %v4494_v16 = vadd.f32 %v9132_v8, %v4422_v27 }
 0x9a1   : > { %v8653_v57 = vpop.permute.xlu0 %4821  ;;  %v4506_v28 = vadd.f32 %v4503_v13, %v4436_v2  ;;  %v4516_v52 = vsel %vm4476_vm14, %v9134_v55, %v8427_v21  ;;  %v4579_v6 = vadd.f32 %v8477_v18, %v4507_v7  ;;  %v4651_v30 = vsel %vm4620_vm0, %v8526_v62, %v8530_v0 }
 0x9a2   : > { %v4467_v44 = vadd.f32 %v8390_v33, %v4391_v58  ;;  %v4493_v31 = vadd.f32 %v4490_v49, %v4421_v22  ;;  %v4564_v18 = vadd.f32 %v8464_v10, %v4494_v16  ;;  %v4636_v62 = vsel %vm4620_vm0, %v8518_v56, %v8522_v12  ;;  %v9135_v33 = vld [vmem:[#allocation36_spill] sm:$0xff]  ;;  %v9136_v58 = vld [vmem:[#allocation35_spill] sm:$0xff] }
 0x9a3   : > { %v4835_v29 = vpop.permute.xlu1 %4834  ;;  %v4578_v4 = vadd.f32 %v8486_v24, %v4506_v28  ;;  %v4655_v13 = vadd.f32 %v8530_v0, %v4579_v6  ;;  %v8706_v24 = vsel %vm5208_vm9, %v9136_v58, %v9135_v33  ;;  %v4712_v56 = vsel %vm4696_vm1, %v8554_v41, %v8556_v45  ;;  %v9137_v28 = vld [vmem:[#allocation45_spill] sm:$0xff]  ;;  %v9143_v58 = vld [vmem:[#allocation56_spill] sm:$0xff] }
 0x9a4   : > { %v4563_v27 = vadd.f32 %v8470_v37, %v4493_v31  ;;  %v4533_v14 = vadd.f32 %v8453_v42, %v4467_v44  ;;  %v4784_v41 = vsel %vm4770_vm2, %v8575_v15, %v8577_v3  ;;  %v4681_v42 = vsel %vm4620_vm0, %v8543_v40, %v8546_v38  ;;  %v9138_v15 = vld [vmem:[#allocation44_spill] sm:$0xff]  ;;  %v9139_v6 = vld [vmem:[#allocation53_spill] sm:$0xff]  ;;  %v9141_v31 = vld [vmem:[#allocation50_spill] sm:$0xff] }
 0x9a5   : > { %v4837_v53 = vpop.permute.xlu0 %4836  ;;  %v4654_v2 = vadd.f32 %v4651_v30, %v4578_v4  ;;  %v4731_v0 = vadd.f32 %v8560_v26, %v4655_v13  ;;  %v9140_v30 = vld [vmem:[#allocation52_spill] sm:$0xff]  ;;  %v4684_v4 = vadd.f32 %v4681_v42, %v9141_v31  ;;  %vm5282_vm13 = vcmask 1039360  }
 0x9a6   : > { %v4839_v20 = vsel %vm4838_vm10, %v4835_v29, %v4837_v53  ;;  %v8688_v47 = vadd.f32 %v4837_v53, %v8571_v1  ;;  %v4727_v1 = vsel %vm4696_vm1, %v8558_v23, %v8560_v26  ;;  %v4640_v29 = vadd.f32 %v8522_v12, %v4564_v18 }
 0x9a7   : > { %v8693_v51 = vadd.f32 %v4839_v20, %v8573_v63  ;;  %v4851_v21 = vpop.permute.xlu1 %4850  ;;  %v4519_v63 = vadd.f32 %v4516_v52, %v4451_v54  ;;  %v4797_v23 = vsel %vm4770_vm2, %v8579_v61, %v8581_v19  ;;  %v4639_v8 = vadd.f32 %v4636_v62, %v4563_v27 }
 0x9a8   : > { %v4730_v37 = vadd.f32 %v4727_v1, %v4654_v2  ;;  %v4666_v12 = vsel %vm4620_vm0, %v8534_v5, %v8537_v25  ;;  %v4716_v49 = vadd.f32 %v8556_v45, %v4640_v29  ;;  %v4801_v26 = vadd.f32 %v8581_v19, %v4731_v0  ;;  %v9145_v29 = vld [vmem:[#allocation54_spill] sm:$0xff] }
 0x9a9   : > { %v4853_v10 = vpop.permute.xlu0 %4852  ;;  %v4593_v22 = vadd.f32 %v8500_v35, %v4519_v63  ;;  %v4609_v61 = vadd.f32 %v8505_v59, %v4533_v14  ;;  %v4715_v35 = vadd.f32 %v4712_v56, %v4639_v8  ;;  %v5239_v19 = vsel %vm5208_vm9, %v9138_v15, %v9137_v28 }
 0x9aa   : > { %v4800_v7 = vadd.f32 %v4797_v23, %v4730_v37  ;;  %v4788_v16 = vadd.f32 %v8577_v3, %v4716_v49  ;;  %v4854_v5 = vsel %vm4838_vm10, %v4851_v21, %v4853_v10  ;;  %v4742_v20 = vsel %vm4696_vm1, %v9140_v30, %v9139_v6  ;;  %v9142_v21 = vld [vmem:[#allocation51_spill] sm:$0xff]  ;;  %v9146_v37 = vld [vmem:[#allocation25_spill] sm:$0xff] }
 0x9ab   : > { %v4866_v46 = vpop.permute.xlu1 %4865  ;;  %v4669_v55 = vadd.f32 %v4666_v12, %v4593_v22  ;;  %v4787_v59 = vadd.f32 %v4784_v41, %v4715_v35  ;;  %v4685_v40 = vadd.f32 %v8546_v38, %v4609_v61  ;;  %v4746_v18 = vadd.f32 %v9139_v6, %v9142_v21  ;;  %v9147_v49 = vld [vmem:[#allocation11_spill] sm:$0xff]  ;;  %v9154_v21 = vld [vmem:[#allocation21_spill] sm:$0xff] }
 0x9ac   : > { %v4858_v3 = vadd.f32 %v4853_v10, %v4788_v16  ;;  %v4810_v38 = vsel %vm4770_vm2, %v9143_v58, %v8611_v34  ;;  %v4823_v12 = vsel %vm4770_vm2, %v8642_v32, %v8653_v57  ;;  %v9149_v35 = vld [vmem:[#allocation15_spill] sm:$0xff]  ;;  %v9150_v16 = vld [vmem:[#allocation17_spill] sm:$0xff]  ;;  %v9157_v58 = vld [vmem:[#allocation16_spill] sm:$0xff]  ;;  %vm5309_vm14 = vcmask 1022976  }
 0x9ad   : > { %v4868_v54 = vpop.permute.xlu0 %4867  ;;  %v4857_v62 = vadd.f32 %v4854_v5, %v4787_v59  ;;  %v4745_v10 = vadd.f32 %v4742_v20, %v4669_v55  ;;  %v4814_v22 = vadd.f32 %v8611_v34, %v4746_v18  ;;  %v9151_v55 = vld [vmem:[#allocation23_spill] sm:$0xff] }
 0x9ae   : > { %v4869_v25 = vsel %vm4838_vm10, %v4866_v46, %v4868_v54  ;;  %v4873_v45 = vadd.f32 %v4868_v54, %v4801_v26  ;;  %v9148_v26 = vld [vmem:[#allocation58_spill] sm:$0xff] }
 0x9af   : > { %v4872_v52 = vadd.f32 %v4869_v25, %v4800_v7  ;;  %v4927_v53 = vpop.permute.xlu1 %4926  ;;  %v4813_v46 = vadd.f32 %v4810_v38, %v4745_v10  ;;  %v9158_v38 = vld [vmem:[#allocation18_spill] sm:$0xff] }
 0x9b0   : > { %v4949_v44 = vadd.f32 %v8227_v43, %v4873_v45  ;;  %v9144_v43 = vld [vmem:[#allocation55_spill] sm:$0xff] }
 0x9b1   : > { %v4948_v13 = vadd.f32 %v8594_v48, %v4872_v52  ;;  %v4929_v1 = vpop.permute.xlu0 %4928  ;;  %v4757_v56 = vsel %vm4696_vm1, %v9145_v29, %v9144_v43  ;;  %v4761_v48 = vadd.f32 %v9144_v43, %v4685_v40  ;;  %v9152_v40 = vld [vmem:[#allocation57_spill] sm:$0xff]  ;;  %v9160_v29 = vld [vmem:[#allocation20_spill] sm:$0xff] }
 0x9b2   : > { %v5025_v63 = vadd.f32 %v8269_v36, %v4949_v44  ;;  %v4930_v27 = vsel %vm4914_vm3, %v4927_v53, %v4929_v1  ;;  %v4934_v2 = vadd.f32 %v4929_v1, %v4858_v3  ;;  %v9153_v44 = vld [vmem:[#allocation24_spill] sm:$0xff]  ;;  %v9156_v1 = vld [vmem:[#allocation26_spill] sm:$0xff] }
 0x9b3   : > { %v5024_v0 = vadd.f32 %v8616_v17, %v4948_v13  ;;  %v4933_v23 = vadd.f32 %v4930_v27, %v4857_v62  ;;  %v4881_v14 = vpop.permute.xlu1 %4880  ;;  %v4827_v32 = vadd.f32 %v8653_v57, %v4761_v48  ;;  %v9155_v13 = vld [vmem:[#allocation22_spill] sm:$0xff] }
 0x9b4   : > { %v5095_v8 = vadd.f32 %v9120_v9, %v5025_v63  ;;  %v5010_v36 = vadd.f32 %v9146_v37, %v4934_v2  ;;  %v4760_v9 = vadd.f32 %v4757_v56, %v4684_v4 }
 0x9b5   : > { %v5094_v41 = vadd.f32 %v9147_v49, %v5024_v0  ;;  %v5009_v61 = vadd.f32 %v9148_v26, %v4933_v23  ;;  %v4883_v17 = vpop.permute.xlu0 %4882  ;;  %v9161_v0 = vld [vmem:[#allocation38_spill] sm:$0xff]  ;;  %v9162_v23 = vld [vmem:[#allocation37_spill] sm:$0xff]  ;;  %v9165_v49 = vld [vmem:[#allocation47_spill] sm:$0xff] }
 0x9b6   : > { %v5167_v42 = vadd.f32 %v9130_v39, %v5095_v8  ;;  %v5082_v7 = vadd.f32 %v9149_v35, %v5010_v36  ;;  %v4884_v34 = vsel %vm4838_vm10, %v4881_v14, %v4883_v17  ;;  %v4888_v54 = vadd.f32 %v4883_v17, %v4814_v22  ;;  %v9163_v36 = vld [vmem:[#allocation12_spill] sm:$0xff] }
 0x9b7   : > { %v5081_v5 = vadd.f32 %v9150_v16, %v5009_v61  ;;  %v4887_v25 = vadd.f32 %v4884_v34, %v4813_v46  ;;  %v5166_v45 = vadd.f32 %v8672_v50, %v5094_v41  ;;  %v4826_v39 = vadd.f32 %v4823_v12, %v4760_v9  ;;  %v4896_v30 = vpop.permute.xlu1 %4895  ;;  %v9164_v46 = vld [vmem:[#allocation14_spill] sm:$0xff]  ;;  %v9168_v34 = vld [vmem:[#allocation39_spill] sm:$0xff] }
 0x9b8   : > { %v5152_v15 = vadd.f32 %v9128_v11, %v5082_v7  ;;  %v4964_v59 = vadd.f32 %v9151_v55, %v4888_v54  ;;  %v5243_v52 = vadd.f32 %v9137_v28, %v5167_v42  ;;  %v5178_v14 = vsel %vm5132_vm8, %v9162_v23, %v9161_v0  ;;  %v9166_v41 = vld [vmem:[#allocation46_spill] sm:$0xff]  ;;  %v9167_v7 = vld [vmem:[#allocation40_spill] sm:$0xff] }
 0x9b9   : > { %v5151_v53 = vadd.f32 %v8666_v60, %v5081_v5  ;;  %v4963_v6 = vadd.f32 %v9152_v40, %v4887_v25  ;;  %v4898_v20 = vpop.permute.xlu0 %4897  ;;  %v5242_v3 = vadd.f32 %v5239_v19, %v5166_v45  ;;  %v4975_v60 = vsel %vm4914_vm3, %v9156_v1, %v9155_v13  ;;  %v9169_v25 = vld [vmem:[#allocation49_spill] sm:$0xff]  ;;  %v9170_v45 = vld [vmem:[#allocation48_spill] sm:$0xff] }
 0x9ba   : > { %v5040_v31 = vadd.f32 %v9153_v44, %v4964_v59  ;;  %v4899_v50 = vsel %vm4838_vm10, %v4896_v30, %v4898_v20  ;;  %v4903_v4 = vadd.f32 %v4898_v20, %v4827_v32  ;;  %v5291_v57 = vrot.slane %v5243_v52, 4 }
 0x9bb   : > { %v5039_v11 = vadd.f32 %v9154_v21, %v4963_v6  ;;  %v4902_v18 = vadd.f32 %v4899_v50, %v4826_v39  ;;  %v5290_v62 = vrot.slane %v5242_v3, 4  ;;  %v5228_v28 = vadd.f32 %v9135_v33, %v5152_v15  ;;  %v9159_v33 = vld [vmem:[#allocation19_spill] sm:$0xff] }
 0x9bc   : > { %v5104_v19 = vsel %vm5064_vm7, %v9158_v38, %v9157_v58  ;;  %v4979_v63 = vadd.f32 %v9155_v13, %v4903_v4  ;;  %5294 = vrot.lane.b32.xlu0 %v5291_v57, %s6000_s13  ;;  %v5227_v27 = vadd.f32 %v8706_v24, %v5151_v53  ;;  %v5108_v10 = vadd.f32 %v9157_v58, %v5040_v31  ;;  %v5361_v53 = vpop.permute.xlu1 %5360 }
 0x9bd   : > { %v5107_v2 = vadd.f32 %v5104_v19, %v5039_v11  ;;  %v4978_v43 = vadd.f32 %v4975_v60, %v4902_v18  ;;  %5292 = vrot.lane.b32.xlu1 %v5290_v62, %s6000_s13  ;;  %v5051_v56 = vsel %vm4990_vm5, %v9160_v29, %v9159_v33  ;;  %v5277_v22 = vrot.slane %v5228_v28, 2  ;;  %s6022_s13 = smov 127   ;;  %v5363_v52 = vpop.permute.xlu0 %5362 }
 0x9be   : > { %v5055_v48 = vadd.f32 %v9159_v33, %v4979_v63  ;;  %v5276_v37 = vrot.slane %v5227_v27, 2  ;;  %v5117_v12 = vsel %vm5064_vm7, %v9164_v46, %v9163_v36  ;;  %v5254_v26 = vsel %vm5208_vm9, %v9166_v41, %v9165_v49 }
 0x9bf   : > { %v5054_v8 = vadd.f32 %v5051_v56, %v4978_v43  ;;  %v5181_v24 = vadd.f32 %v5178_v14, %v5107_v2  ;;  %v5182_v17 = vadd.f32 %v9161_v0, %v5108_v10  ;;  %v5193_v54 = vsel %vm5132_vm8, %v9168_v34, %v9167_v7 }
 0x9c0   : > { %v5121_v61 = vadd.f32 %v9163_v36, %v5055_v48  ;;  %5280 = vrot.lane.b32.xlu0 %v5277_v22, %s6022_s13  ;;  %v5269_v32 = vsel %vm5208_vm9, %v9170_v45, %v9169_v25  ;;  %v5365_v6 = vpop.permute.xlu1 %5364  ;;  %v5392_v4 = vsel %vm5340_vm11, %v5361_v53, %v5363_v52  ;;  %v5417_v57 = vsel %vm5416_vm12, %v5363_v52, 0.0 }
 0x9c1   : > { %v5120_v42 = vadd.f32 %v5117_v12, %v5054_v8  ;;  %5278 = vrot.lane.b32.xlu1 %v5276_v37, %s6022_s13  ;;  %v5257_v35 = vadd.f32 %v5254_v26, %v5181_v24  ;;  %v5258_v55 = vadd.f32 %v9165_v49, %v5182_v17  ;;  %v5367_v40 = vpop.permute.xlu0 %5366  ;;  %v5418_v11 = vadd.f32 %v5417_v57, %v5392_v4  ;;  %s5516_s13 = sshll.u32 %s9171_s11, 4  ;;  %s5517_s13 = int_to_ptr.vmem [resolvable:$true] %s5516_s13 }
 0x9c2   : > { %v5197_v5 = vadd.f32 %v9167_v7, %v5121_v61  ;;  %v5393_v18 = vsel %vm5340_vm11, %v5365_v6, %v5367_v40  ;;  %v5421_v62 = vsel %vm5416_vm12, %v5367_v40, 0.0  ;;  %s5934_s17 = scalar_lea.vmem %s5517_s13, 32  ;;  %p5941_p1 = scmp.lt.s32.totalorder %s5517_s13, %s5939_s28 }
 0x9c3   : > { %v5303_v9 = vrot.slane %v5257_v35, 6  ;;  %v5196_v16 = vadd.f32 %v5193_v54, %v5120_v42  ;;  %v5304_v39 = vrot.slane %v5258_v55, 6  ;;  %v5422_v60 = vadd.f32 %v5421_v62, %v5393_v18  ;;  %p5935_p12 = scmp.ne.s32.totalorder %s5517_s13, %s5934_s17 }
 0x9c4   : > { %v5273_v59 = vadd.f32 %v9169_v25, %v5197_v5  ;;  %v5369_v20 = vpop.permute.xlu1 %5368 }
 0x9c5   : > { %5305 = vrot.lane.b32.xlu1 %v5303_v9, %s6023_s12  ;;  %v5272_v15 = vadd.f32 %v5269_v32, %v5196_v16  ;;  %v5371_v30 = vpop.permute.xlu0 %5370  ;;  %p5936_p13 = pnand %p5935_p12, %p6121_p5 }
 0x9c6   : > { %v5394_v13 = vsel %vm5340_vm11, %v5369_v20, %v5371_v30  ;;  %v5425_v1 = vsel %vm5416_vm12, %v5371_v30, 0.0 }
 0x9c7   : > { %5317 = vrot.lane.b32.xlu0 %v5272_v15, %s6002_s29  ;;  %v5426_v58 = vadd.f32 %v5425_v1, %v5394_v13  ;;  %p5937_p0 = pneg %p5936_p13 }
 0x9c8   : > { %v5373_v44 = vpop.permute.xlu1 %5372 }
 0x9c9   : > { %5319 = vrot.lane.b32.xlu1 %v5273_v59, %s6002_s29  ;;  %v5375_v3 = vpop.permute.xlu0 %5374 }
 0x9ca   : > { %v5395_v27 = vsel %vm5340_vm11, %v5373_v44, %v5375_v3  ;;  %v5429_v2 = vsel %vm5416_vm12, %v5375_v3, 0.0 }
 0x9cb   : > { %5307 = vrot.lane.b32.xlu0 %v5304_v39, %s6023_s12  ;;  %v5430_v33 = vadd.f32 %v5429_v2, %v5395_v27  ;;  %v5457_v2 = vld [vmem:[%s8933_s7] sm:$0xff] }
 0x9cc   : > { %v5377_v50 = vpop.permute.xlu1 %5376 }
 0x9cd   : > { %v5379_v31 = vpop.permute.xlu0 %5378 }
 0x9ce   : > { %v5396_v38 = vsel %vm5340_vm11, %v5377_v50, %v5379_v31  ;;  %v5433_v19 = vsel %vm5416_vm12, %v5379_v31, 0.0 }
 0x9cf   : > { %v5434_v43 = vadd.f32 %v5433_v19, %v5396_v38 }
 0x9d0   : > { %v5381_v28 = vpop.permute.xlu1 %5380 }
 0x9d1   : > { %v5383_v21 = vpop.permute.xlu0 %5382 }
 0x9d2   : > { %v5397_v0 = vsel %vm5340_vm11, %v5381_v28, %v5383_v21  ;;  %v5437_v23 = vsel %vm5416_vm12, %v5383_v21, 0.0 }
 0x9d3   : > { %v5438_v22 = vadd.f32 %v5437_v23, %v5397_v0  ;;  %v5459_v0 = vld [vmem:[%s8933_s7 + $0x10] sm:$0xff] }
 0x9d4   : > { %v5385_v10 = vpop.permute.xlu1 %5384 }
 0x9d5   : > { %v5387_v63 = vpop.permute.xlu0 %5386 }
 0x9d6   : > { %v5398_v29 = vsel %vm5340_vm11, %v5385_v10, %v5387_v63  ;;  %v5441_v56 = vsel %vm5416_vm12, %v5387_v63, 0.0 }
 0x9d7   : > { %v5442_v48 = vadd.f32 %v5441_v56, %v5398_v29 }
 0x9d8   : > { %v5389_v8 = vpop.permute.xlu1 %5388 }
 0x9d9   : > { %v5391_v14 = vpop.permute.xlu0 %5390 }
 0x9da   : > { %v5399_v37 = vsel %vm5340_vm11, %v5389_v8, %v5391_v14  ;;  %v5445_v24 = vsel %vm5416_vm12, %v5391_v14, 0.0 }
 0x9db   : > { %v5446_v36 = vadd.f32 %v5445_v24, %v5399_v37 }
 0x9dc   : > { %v4911_v12 = vpop.permute.xlu1 %4910 }
 0x9dd   : > { %v4989_v46 = vpop.permute.xlu0 %4988 }
 0x9e0   : > { %v4987_v41 = vpop.permute.xlu1 %4986 }
 0x9e1   : > { %v5063_v49 = vpop.permute.xlu0 %5062  ;;  %v4991_v16 = vsel %vm4990_vm5, %v4987_v41, %v4989_v46 }
 0x9e4   : > { %v5061_v61 = vpop.permute.xlu1 %5060 }
 0x9e5   : > { %v5131_v26 = vpop.permute.xlu0 %5130  ;;  %v5065_v32 = vsel %vm5064_vm7, %v5061_v61, %v5063_v49 }
 0x9e8   : > { %v5129_v42 = vpop.permute.xlu1 %5128 }
 0x9e9   : > { %v5207_v17 = vpop.permute.xlu0 %5206  ;;  %v5133_v39 = vsel %vm5132_vm8, %v5129_v42, %v5131_v26 }
 0x9ea   : > { %5419 = vadd.xlane.f32.xlu0 %v5418_v11 }
 0x9ec   : > { %v5205_v54 = vpop.permute.xlu1 %5204 }
 0x9ed   : > { %5423 = vadd.xlane.f32.xlu1 %v5422_v60  ;;  %v4913_v35 = vpop.permute.xlu0 %4912 }
 0x9ee   : > { %5427 = vadd.xlane.f32.xlu0 %v5426_v58  ;;  %v4915_v7 = vsel %vm4914_vm3, %v4911_v12, %v4913_v35  ;;  %v4919_v34 = vadd.f32 %v4913_v35, %v8688_v47  ;;  %v5460_v12 = vld [vmem:[%s8933_s7 + $0x18] sm:$0xff] }
 0x9ef   : > { %v4918_v9 = vadd.f32 %v4915_v7, %v8693_v51  ;;  %v5209_v51 = vsel %vm5208_vm9, %v5205_v54, %v5207_v17 }
 0x9f0   : > { %v4995_v5 = vadd.f32 %v4989_v46, %v4919_v34  ;;  %v5463_v34 = vld [vmem:[%s8933_s7 + $0x30] sm:$0xff] }
 0x9f1   : > { %5435 = vadd.xlane.f32.xlu1 %v5434_v43  ;;  %v4994_v25 = vadd.f32 %v4991_v16, %v4918_v9  ;;  %v5458_v43 = vld [vmem:[%s8933_s7 + $0x8] sm:$0xff] }
 0x9f2   : > { %5431 = vadd.xlane.f32.xlu0 %v5430_v33  ;;  %v5069_v15 = vadd.f32 %v5063_v49, %v4995_v5  ;;  %v5462_v9 = vld [vmem:[%s8933_s7 + $0x28] sm:$0xff] }
 0x9f3   : > { %v5068_v59 = vadd.f32 %v5065_v32, %v4994_v25 }
 0x9f4   : > { %v5137_v53 = vadd.f32 %v5131_v26, %v5069_v15 }
 0x9f5   : > { %5443 = vadd.xlane.f32.xlu1 %v5442_v48  ;;  %v5136_v6 = vadd.f32 %v5133_v39, %v5068_v59 }
 0x9f6   : > { %5439 = vadd.xlane.f32.xlu0 %v5438_v22  ;;  %v5213_v30 = vadd.f32 %v5207_v17, %v5137_v53 }
 0x9f7   : > { %v5212_v3 = vadd.f32 %v5209_v51, %v5136_v6 }
 0x9f8   : > { %v5330_v45 = vpop.permute.xlu1 %5329 }
 0x9fa   : > { %5447 = vadd.xlane.f32.xlu0 %v5446_v36  ;;  %v5461_v36 = vld [vmem:[%s8933_s7 + $0x20] sm:$0xff] }
 0xa2e   : > { %v5295_v55 = vpop.permute.xlu0 %5294 }
 0xa2f   : > { %v5293_v52 = vpop.permute.xlu1 %5292 }
 0xa30   : > { %v5296_v57 = vsel %vm1170_vm4, %v5293_v52, %v5295_v55  ;;  %vm5473_vm4 = vcmask 7168   ;;  %v5464_v52 = vld [vmem:[%s8933_s7 + $0x38] sm:$0xff] }
 0xa32   : > { %v5281_v40 = vpop.permute.xlu0 %5280 }
 0xa33   : > { %v5279_v47 = vpop.permute.xlu1 %5278  ;;  %v5287_v31 = vadd.f32 %v5281_v40, %v5213_v30 }
 0xa34   : > { %v5283_v20 = vsel %vm5282_vm13, %v5279_v47, %v5281_v40 }
 0xa35   : > { %v5286_v50 = vadd.f32 %v5283_v20, %v5212_v3  ;;  %v5300_v21 = vadd.f32 %v5295_v55, %v5287_v31 }
 0xa37   : > { %v5306_v44 = vpop.permute.xlu1 %5305  ;;  %v5299_v18 = vadd.f32 %v5296_v57, %v5286_v50 }
 0xa39   : > { %v5318_v4 = vpop.permute.xlu0 %5317 }
 0xa3b   : > { %v5320_v11 = vpop.permute.xlu1 %5319 }
 0xa3c   : > { %v5321_v60 = vsel %vm1994_vm6, %v5318_v4, %v5320_v11  ;;  %vm5497_vm6 = vcmask 0  }
 0xa3d   : > { %v5308_v62 = vpop.permute.xlu0 %5307 }
 0xa3e   : > { %v5310_v28 = vsel %vm5309_vm14, %v5306_v44, %v5308_v62  ;;  %v5314_v13 = vadd.f32 %v5308_v62, %v5300_v21  ;;  %v5495_v21 = vld [vmem:[#allocation4] sm:$0x1] }
 0xa3f   : > { %v5313_v1 = vadd.f32 %v5310_v28, %v5299_v18 }
 0xa40   : > { %v5325_v58 = vadd.f32 %v5320_v11, %v5314_v13 }
 0xa41   : > { %v5324_v38 = vadd.f32 %v5321_v60, %v5313_v1 }
 0xa42   : > { %v5333_v19 = vadd.f32 %v5330_v45, %v5325_v58 }
 0xa43   : > { %v5332_v63 = vadd.f32 %v5330_v45, %v5324_v38 }
 0xa44   : > { %5338 = vrot.lane.b32.xlu0 %v5333_v19, %s6021_s23 }
 0xa45   : > { %5336 = vrot.lane.b32.xlu1 %v5332_v63, %s6021_s23 }
 0xa73   : > { %v5420_v27 = vpop.xlane.xlu0 %5419 }
 0xa74   : > { %v5449_v10 = vmul.f32 0.004950495, %v5420_v27 }
 0xa76   : > { %v5424_v33 = vpop.xlane.xlu1 %5423  ;;  %v5465_v29 = vmul.f32 %v5457_v2, %v5449_v10 }
 0xa77   : > { %v5450_v56 = vmul.f32 0.004950495, %v5424_v33  ;;  %v5428_v23 = vpop.xlane.xlu0 %5427 }
 0xa78   : > { %v5451_v14 = vmul.f32 0.004950495, %v5428_v23  ;;  %v5474_v37 = vsel %vm5473_vm4, %v5465_v29, 0.0 }
 0xa79   : > { %v5466_v48 = vmul.f32 %v5458_v43, %v5450_v56 }
 0xa7a   : > { %v5467_v22 = vmul.f32 %v5459_v0, %v5451_v14  ;;  %v5436_v8 = vpop.xlane.xlu1 %5435 }
 0xa7b   : > { %v5475_v24 = vsel %vm5473_vm4, %v5466_v48, 0.0  ;;  %v5453_v46 = vmul.f32 0.004950495, %v5436_v8  ;;  %v5432_v49 = vpop.xlane.xlu0 %5431 }
 0xa7c   : > { %v5476_v41 = vadd.f32 %v5475_v24, %v5474_v37  ;;  %v5477_v26 = vsel %vm5473_vm4, %v5467_v22, 0.0  ;;  %v5452_v61 = vmul.f32 0.004950495, %v5432_v49 }
 0xa7d   : > { %v5469_v42 = vmul.f32 %v5461_v36, %v5453_v46 }
 0xa7e   : > { %v5478_v17 = vadd.f32 %v5477_v26, %v5476_v41  ;;  %v5468_v35 = vmul.f32 %v5460_v12, %v5452_v61  ;;  %v5444_v7 = vpop.xlane.xlu1 %5443 }
 0xa7f   : > { %v5455_v54 = vmul.f32 0.004950495, %v5444_v7  ;;  %v5440_v16 = vpop.xlane.xlu0 %5439  ;;  %v5481_v32 = vsel %vm5473_vm4, %v5469_v42, 0.0 }
 0xa80   : > { %v5479_v5 = vsel %vm5473_vm4, %v5468_v35, 0.0  ;;  %v5454_v25 = vmul.f32 0.004950495, %v5440_v16 }
 0xa81   : > { %v5480_v45 = vadd.f32 %v5479_v5, %v5478_v17  ;;  %v5471_v15 = vmul.f32 %v5463_v34, %v5455_v54 }
 0xa82   : > { %v5470_v55 = vmul.f32 %v5462_v9, %v5454_v25 }
 0xa83   : > { %v5482_v59 = vadd.f32 %v5481_v32, %v5480_v45  ;;  %v5448_v39 = vpop.xlane.xlu0 %5447  ;;  %v5485_v6 = vsel %vm5473_vm4, %v5471_v15, 0.0 }
 0xa84   : > { %v5483_v53 = vsel %vm5473_vm4, %v5470_v55, 0.0  ;;  %v5456_v40 = vmul.f32 0.004950495, %v5448_v39 }
 0xa85   : > { %v5484_v47 = vadd.f32 %v5483_v53, %v5482_v59 }
 0xa86   : > { %v5472_v51 = vmul.f32 %v5464_v52, %v5456_v40 }
 0xa87   : > { %v5486_v30 = vadd.f32 %v5485_v6, %v5484_v47 }
 0xa88   : > { %v5487_v20 = vsel %vm5473_vm4, %v5472_v51, 0.0 }
 0xa89   : > { %v5488_v3 = vadd.f32 %v5487_v20, %v5486_v30 }
 0xa8b   : > { %v5489_v44 = vrot.slane %v5488_v3, 4 }
 0xa8d   : > { %v5490_v31 = vadd.f32 %v5489_v44, %v5488_v3 }
 0xa8f   : > { %v5491_v50 = vrot.slane %v5490_v31, 2 }
 0xa91   : > { %v5492_v4 = vadd.f32 %v5491_v50, %v5490_v31 }
 0xa93   : > { %v5493_v57 = vrot.slane %v5492_v4, 1 }
 0xa95   : > { %v5494_v11 = vadd.f32 %v5493_v57, %v5492_v4 }
 0xa97   : > { %v5496_v18 = vadd.f32 %v5495_v21, %v5494_v11 }
 0xa99   : > { %5498 = vst.msk [vmem:[%s368_s21] sm:$0x1] %vm5497_vm6, %v5496_v18  ;;  %s5940_s21 = scalar_lea.vmem %s5939_s28, 64 }
 0xa9a   : > { %p5942_p2 = scmp.lt.s32.totalorder %s5940_s21, %s5934_s17 }
 0xa9c   : > { %p5943_p3 = por %p5942_p2, %p5941_p1 }
 0xa9e   : > { %p5944_p4 = pnand %p5943_p3, %p5937_p0 }
 0xab6   : > { %v5339_v62 = vpop.permute.xlu0 %5338 }
 0xab7   : > { %v5337_v28 = vpop.permute.xlu1 %5336 }
 0xab8   : > { %v5341_v13 = vsel %vm5340_vm11, %v5337_v28, %v5339_v62 }
 0xab9   : > { %5343 = vst [vmem:[%s9172_s26] sm:$0x3] %v5341_v13 }
 0xaba   : > { %5947 = shalt.err (!%p5944_p4)
}
 0xabb   : > { %s5948_s27 = scalar_lea.hbm %s8886_s22, 32  ;;  %s5952_s11 = scalar_lea.hbm %s8935_s9, 64 }
 0xabc   : > { %p5949_p7 = scmp.ne.s32.totalorder %s8886_s22, %s5948_s27  ;;  %p5953_p10 = scmp.lt.s32.totalorder %s8886_s22, %s8935_s9 }
 0xabd   : > { %p5954_p11 = scmp.lt.s32.totalorder %s5952_s11, %s5948_s27 }
 0xabe   : > { %p5950_p8 = pnand %p5949_p7, %p6121_p5 }
 0xabf   : > { %p5955_p12 = por %p5954_p11, %p5953_p10 }
 0xac0   : > { %p5951_p9 = pneg %p5950_p8 }
 0xac2   : > { %p5956_p13 = pnand %p5955_p12, %p5951_p9 }
 0xac4   : > { %5959 = shalt.err (!%p5956_p13)
}
 0xac5   : > { %5862 = dma.vmem_to_hbm [thread:$0]  (%p6121_p5), %s5517_s13, 32, %s8886_s22, %s5500_s30  }
 0xac6 PF: > { %p5868_p0 = scmp.ge.s32.totalorder %s5994_s18, 2  ;;  %s5531_s26 = sand.u32 1, %s5982_s15  }
 0xac7   : > { %s5532_s14 = scalar_lea.sflag [#allocation6], %s5531_s26 }
 0xac8   : > { %p5865_p1 = pnand %p5868_p0, %p6125_p6 }
 0xaca   : > { %p5866_p2 = pneg %p5865_p1 }
 0xacc   : > { %5977 = dma.done.wait (%p5866_p2), %s5532_s14, 32  }
 0xacd   : > { %5979 = vsyncadd (%p5866_p2), %s5532_s14, 4294967264  ;;  %s9174_s17 = sld [smem:[#allocation8_spill]]  ;;  %p23_p3 = scmp.ge.s32.totalorder %s6108_s20, 4  }
 0xace   : > { %s9175_s8 = sld [smem:[#allocation9_spill]]  ;;  %s9176_s15 = smov %s5986_s16 }
 0xacf   : > { %s9179_s18 = smov %s6108_s20 }
 0xad0   :  { %25 = sbr.rel (!%p23_p3) target bundleno = 6 (0x6), region = 121 }
 0xad3   : > { %s9177_s16 = smov %s9174_s17 }
 0xad4   : > { %s9178_s17 = smov %s9175_s8 }
 0xad5   :  { %5543 = vsyncpa [#allocation6], 1 }
 0xad6   :  { %5545 = vsyncpa [#allocation6 + $0x1], 1 }

</bundles_post_ra>
